<compile_context>
chip_gen: v7x
topology: tpu7x:2x2x1
jax: 0.10.0
libtpu: 0.0.40
codegen_flags: <defaults>
</compile_context>

<pallas_src>
import functools

import jax
import jax.numpy as jnp
import numpy as np
from jax.experimental import pallas as pl
from jax.experimental.pallas import tpu as pltpu


# ----------------------------------------------------------------------------
# in-kernel helpers
# ----------------------------------------------------------------------------
def _stable_sigmoid(x):
    # exp(-|x|) never overflows; one reciprocal + select (not two divides).
    z = jnp.exp(-jnp.abs(x))
    r = 1.0 / (1.0 + z)
    return jnp.where(x >= 0, r, z * r)


def _swish(x):
    return x * _stable_sigmoid(x)


def _row_coords(row, *, H, W):
    """(oh, ow) int32 lane-replicated planes for flattened spatial rows."""
    if (W & (W - 1)) == 0 and (H & (H - 1)) == 0:
        ow = jnp.bitwise_and(row, W - 1)
        q = jnp.right_shift(row, W.bit_length() - 1)
        oh = jnp.bitwise_and(q, H - 1)
    else:
        # f32 divisions are correctly rounded -> exact for row < 2**24.
        rf = row.astype(jnp.float32)
        qw = jnp.floor(rf / float(W))
        ow = (rf - qw * float(W)).astype(jnp.int32)
        qh = jnp.floor(qw / float(H))
        oh = (qw - qh * float(H)).astype(jnp.int32)
    return oh, ow


# ----------------------------------------------------------------------------
# the fused Block3D kernel (one grid step == one batch sample)
# ----------------------------------------------------------------------------
def _block3d_kernel(x_ref, w1_ref, b1_ref, wdw_ref, b2_ref,
                    wse1_ref, bse1_ref, wse2_ref, bse2_ref, w3_ref, b3_ref,
                    out_ref, hp_ref, dw_ref,
                    *, D, H, W, K, pad, s_pad, CH, apply_expand, has_skip):
    M = D * H * W
    C = w3_ref.shape[0]                      # expanded channel count
    n_full = M // CH
    rem = M - n_full * CH
    f32 = jnp.float32

    # ---- zero the halo rows of the row-padded activation scratch.
    # Per grid step; scratch is per-core under megacore, so do NOT guard this
    # with program_id == 0.
    hp_ref[0:s_pad, :] = jnp.zeros((s_pad, C), f32)
    hp_ref[s_pad + M:2 * s_pad + M, :] = jnp.zeros((s_pad, C), f32)

    # ---- pass 0: 1x1x1 expansion conv (+ folded BN1) + swish, chunked,
    #      staged into hp with sublane-aligned stores -------------------------
    def expand_chunk(r0, rows):
        xc = x_ref[pl.ds(r0, rows), :]
        if apply_expand:
            hc = jnp.dot(xc, w1_ref[...], preferred_element_type=f32)
            hc = _swish(hc + b1_ref[...])
        else:
            hc = xc.astype(f32)
        hp_ref[pl.ds(s_pad + r0, rows), :] = hc

    def expand_body(c, carry):
        expand_chunk(pl.multiple_of(c * CH, CH), CH)
        return carry

    jax.lax.fori_loop(0, n_full, expand_body, 0)
    if rem:
        expand_chunk(n_full * CH, rem)

    # ---- pass 1: depthwise KxKxK conv (+ folded BN2 scale) + swish.
    #      Register-resident accumulator per row chunk; each chunk is written
    #      to dw exactly once and reduced into a partial SE pool. -------------
    taps = [(kd, kh, kw) for kd in range(K) for kh in range(K)
            for kw in range(K)]

    def dw_chunk(r0, rows):
        row = jax.lax.broadcasted_iota(jnp.int32, (rows, C), 0) + r0
        oh, ow = _row_coords(row, H=H, W=W)
        acc = None
        for idx, (kd, kh, kw) in enumerate(taps):
            shift = (kd - pad) * H * W + (kh - pad) * W + (kw - pad)
            win = hp_ref[pl.ds(s_pad + shift + r0, rows), :]
            # Depth overflow lands in the zero halo rows -> no depth mask.
            # Only H/W boundaries of off-centre taps need masking.
            conds = []
            if kh < pad:
                conds.append(oh >= (pad - kh))
            if kh > pad:
                conds.append(oh < (H + pad - kh))
            if kw < pad:
                conds.append(ow >= (pad - kw))
            if kw > pad:
                conds.append(ow < (W + pad - kw))
            if conds:
                m = conds[0]
                for cnd in conds[1:]:
                    m = jnp.logical_and(m, cnd)
                win = jnp.where(m, win, 0.0)
            term = win * wdw_ref[idx]                     # (1, C) bcast
            acc = term if acc is None else acc + term     # no zeros init
        dwc = _swish(acc + b2_ref[...])
        dw_ref[pl.ds(r0, rows), :] = dwc
        return jnp.sum(dwc, axis=0, keepdims=True)        # (1, C) partial sum

    def dw_body(c, psum):
        return psum + dw_chunk(pl.multiple_of(c * CH, CH), CH)

    psum = jax.lax.fori_loop(0, n_full, dw_body, jnp.zeros((1, C), f32))
    if rem:
        psum = psum + dw_chunk(n_full * CH, rem)
    pooled = psum * (1.0 / M)                              # (1, C)

    # ---- squeeze-and-excitation gate -----------------------------------------
    s = jnp.dot(pooled, wse1_ref[...], preferred_element_type=f32)
    s = _swish(s + bse1_ref[...])                          # (1, Cse)
    g = jnp.dot(s, wse2_ref[...], preferred_element_type=f32)
    g = _stable_sigmoid(g + bse2_ref[...])                 # (1, C)

    # ---- pass 2: SE gate + 1x1x1 projection (+ folded BN3) + skip, chunked ---
    def proj_chunk(r0, rows):
        dwc = dw_ref[pl.ds(r0, rows), :] * g
        oc = jnp.dot(dwc, w3_ref[...], preferred_element_type=f32)
        oc = oc + b3_ref[...]
        if has_skip:
            oc = oc + x_ref[pl.ds(r0, rows), :].astype(f32)
        out_ref[pl.ds(r0, rows), :] = oc.astype(out_ref.dtype)

    def proj_body(c, carry):
        proj_chunk(pl.multiple_of(c * CH, CH), CH)
        return carry

    jax.lax.fori_loop(0, n_full, proj_body, 0)
    if rem:
        proj_chunk(n_full * CH, rem)


# ----------------------------------------------------------------------------
# wrapper: layout plumbing + BN folding + pallas_call
# ----------------------------------------------------------------------------
def block3d_forward(x, params, *, kernel_size, stride=1, expand_ratio=1,
                    eps=1e-5):
    """Eval-mode Block3D forward. x: (N, Cin, D, H, W) float32 (NCDHW)."""
    # TODO(synk): stride > 1 (strided depthwise) and training-mode
    # drop_connect_3d are not implemented in the kernel (inference, stride=1).
    assert stride == 1, "Pallas kernel implements stride == 1 only"

    N, Cin, D, H, W = x.shape
    K = kernel_size
    pad = 1 if K == 3 else 2
    M = D * H * W

    C = params["conv2_w"].shape[0]            # expanded channels
    Cout = params["conv3_w"].shape[0]

    apply_expand = (expand_ratio != 1)
    has_skip = (stride == 1 and Cin == Cout)
    f32 = jnp.float32

    def fold(g, b, m, v):
        s = g / jnp.sqrt(v + eps)
        return s, b - m * s

    # --- fold eval-mode BatchNorm into the conv weights (wrapper side) -------
    if apply_expand:
        s1, t1 = fold(params["bn1_g"], params["bn1_b"],
                      params["bn1_m"], params["bn1_v"])
        w1f = (params["conv1_w"] * s1[:, None]).T.astype(f32)    # (Cin, C)
        b1f = t1[None, :].astype(f32)                            # (1, C)
    else:
        w1f = jnp.zeros((Cin, C), f32)                           # unused
        b1f = jnp.zeros((1, C), f32)

    s2, t2 = fold(params["bn2_g"], params["bn2_b"],
                  params["bn2_m"], params["bn2_v"])
    wdwf = params["conv2_w"] * s2[:, None, None, None]           # (C,K,K,K)
    wdwf = jnp.transpose(wdwf, (1, 2, 3, 0)).reshape(K ** 3, 1, C).astype(f32)
    b2f = t2[None, :].astype(f32)

    s3, t3 = fold(params["bn3_g"], params["bn3_b"],
                  params["bn3_m"], params["bn3_v"])
    w3f = (params["conv3_w"] * s3[:, None]).T.astype(f32)        # (C, Cout)
    b3f = t3[None, :].astype(f32)

    wse1 = params["se1_w"].T.astype(f32)                         # (C, Cse)
    bse1 = params["se1_b"][None, :].astype(f32)
    wse2 = params["se2_w"].T.astype(f32)                         # (Cse, C)
    bse2 = params["se2_b"][None, :].astype(f32)

    # sublane-aligned halo rows (absorb depth spill of the shifted taps)
    max_shift = pad * (H * W + W + 1)
    s_pad = ((max_shift + 7) // 8) * 8
    rows = 2 * s_pad + M

    # row-chunk size: keep the register accumulator around ~8 vregs
    cap = max(8, min(256, 8192 // max(C, 1)))
    cap = max(8, (cap // 8) * 8)
    CH = min(cap, M)
    if M >= 8:
        CH = max(8, (CH // 8) * 8)

    # channels-last, spatial flattened to rows -> each pointwise conv is one
    # wide matmul over M rows per sample.
    x_flat = jnp.transpose(x, (0, 2, 3, 4, 1)).reshape(N, M, Cin).astype(f32)

    def full(shape):
        r = len(shape)
        return pl.BlockSpec(shape, lambda b, _r=r: (0,) * _r)

    kernel = functools.partial(
        _block3d_kernel, D=D, H=H, W=W, K=K, pad=pad, s_pad=s_pad, CH=CH,
        apply_expand=apply_expand, has_skip=has_skip)

    out_flat = pl.pallas_call(
        kernel,
        out_shape=jax.ShapeDtypeStruct((N, M, Cout), f32),
        grid_spec=pltpu.PrefetchScalarGridSpec(
            num_scalar_prefetch=0,
            grid=(N,),
            in_specs=[
                pl.BlockSpec((None, M, Cin), lambda b: (b, 0, 0)),  # x / sample
                full(w1f.shape), full(b1f.shape),
                full(wdwf.shape), full(b2f.shape),
                full(wse1.shape), full(bse1.shape),
                full(wse2.shape), full(bse2.shape),
                full(w3f.shape), full(b3f.shape),
            ],
            out_specs=pl.BlockSpec((None, M, Cout), lambda b: (b, 0, 0)),
            scratch_shapes=[
                pltpu.VMEM((rows, C), f32),   # row-padded expanded activations
                pltpu.VMEM((M, C), f32),      # depthwise output (pre-gate)
            ],
        ),
        compiler_params=pltpu.CompilerParams(
            dimension_semantics=("parallel",),
            vmem_limit_bytes=32 * 1024 * 1024),
    )(x_flat, w1f, b1f, wdwf, b2f, wse1, bse1, wse2, bse2, w3f, b3f)

    return out_flat.reshape(N, D, H, W, Cout).transpose(0, 4, 1, 2, 3)


# ----------------------------------------------------------------------------
# parameters (mirrors the PyTorch module, eval-mode BN stats included)
# ----------------------------------------------------------------------------
def init_params(key, in_channels, out_channels, kernel_size, expand_ratio,
                se_ratio):
    C = expand_ratio * in_channels
    Cse = max(1, int(in_channels * se_ratio))
    K = kernel_size
    keys = jax.random.split(key, 8)

    def bn_params(k, n):
        k1, k2, k3, k4 = jax.random.split(k, 4)
        return (jax.random.uniform(k1, (n,), jnp.float32, 0.7, 1.3),    # gamma
                0.1 * jax.random.normal(k2, (n,), jnp.float32),         # beta
                0.1 * jax.random.normal(k3, (n,), jnp.float32),         # mean
                jax.random.uniform(k4, (n,), jnp.float32, 0.5, 1.5))    # var

    p = {}
    p["conv1_w"] = (jax.random.normal(keys[0], (C, in_channels), jnp.float32)
                    / np.sqrt(in_channels))
    p["bn1_g"], p["bn1_b"], p["bn1_m"], p["bn1_v"] = bn_params(keys[1], C)
    p["conv2_w"] = (jax.random.normal(keys[2], (C, K, K, K), jnp.float32)
                    / np.sqrt(K ** 3))
    p["bn2_g"], p["bn2_b"], p["bn2_m"], p["bn2_v"] = bn_params(keys[3], C)
    p["se1_w"] = jax.random.normal(keys[4], (Cse, C), jnp.float32) / np.sqrt(C)
    p["se1_b"] = jnp.zeros((Cse,), jnp.float32)
    p["se2_w"] = jax.random.normal(keys[5], (C, Cse), jnp.float32) / np.sqrt(Cse)
    p["se2_b"] = jnp.zeros((C,), jnp.float32)
    p["conv3_w"] = (jax.random.normal(keys[6], (out_channels, C), jnp.float32)
                    / np.sqrt(C))
    p["bn3_g"], p["bn3_b"], p["bn3_m"], p["bn3_v"] = bn_params(keys[7],
                                                               out_channels)
    return p


# ----------------------------------------------------------------------------
# pure-JAX reference of the PyTorch eval forward (unfolded BN, XLA conv)
# ----------------------------------------------------------------------------
def block3d_reference(x, p, *, kernel_size, stride, expand_ratio, eps=1e-5):
    hi = jax.lax.Precision.HIGHEST

    def bn(h, g, b, m, v):
        return (h - m) / jnp.sqrt(v + eps) * g + b

    def swish(h):
        return h * jax.nn.sigmoid(h)

    K = kernel_size
    pad = 1 if K == 3 else 2
    xl = jnp.transpose(x, (0, 2, 3, 4, 1))                     # NDHWC
    if expand_ratio != 1:
        h = jnp.einsum("ndhwi,oi->ndhwo", xl, p["conv1_w"], precision=hi)
        h = swish(bn(h, p["bn1_g"], p["bn1_b"], p["bn1_m"], p["bn1_v"]))
    else:
        h = xl
    C = h.shape[-1]
    rhs = jnp.transpose(p["conv2_w"], (1, 2, 3, 0))[:, :, :, None, :]  # DHWIO
    d = jax.lax.conv_general_dilated(
        h, rhs, window_strides=(stride,) * 3, padding=[(pad, pad)] * 3,
        dimension_numbers=("NDHWC", "DHWIO", "NDHWC"),
        feature_group_count=C, precision=hi)
    d = swish(bn(d, p["bn2_g"], p["bn2_b"], p["bn2_m"], p["bn2_v"]))
    pooled = jnp.mean(d, axis=(1, 2, 3), keepdims=True)
    s = swish(jnp.einsum("ndhwc,oc->ndhwo", pooled, p["se1_w"], precision=hi)
              + p["se1_b"])
    g = jax.nn.sigmoid(jnp.einsum("ndhwc,oc->ndhwo", s, p["se2_w"],
                                  precision=hi) + p["se2_b"])
    d = d * g
    o = jnp.einsum("ndhwc,oc->ndhwo", d, p["conv3_w"], precision=hi)
    o = bn(o, p["bn3_g"], p["bn3_b"], p["bn3_m"], p["bn3_v"])
    if stride == 1 and xl.shape[-1] == o.shape[-1]:
        o = o + xl
    return jnp.transpose(o, (0, 4, 1, 2, 3))


if __name__ == "__main__":
    # small but representative Block3D config: 16 -> (x8 expand = 128) -> 16,
    # 3x3x3 depthwise, stride 1, SE ratio 0.25, skip connection active.
    N, Cin, D, H, W = 2, 16, 8, 8, 8
    out_channels = 16
    kernel_size, stride = 3, 1
    expand_ratio, se_ratio = 8, 0.25

    key = jax.random.PRNGKey(0)
    kx, kp = jax.random.split(key)
    x = jax.random.normal(kx, (N, Cin, D, H, W), jnp.float32)
    params = init_params(kp, Cin, out_channels, kernel_size, expand_ratio,
                         se_ratio)

    out = block3d_forward(x, params, kernel_size=kernel_size, stride=stride,
                          expand_ratio=expand_ratio)
    out = jax.block_until_ready(out)

    ref = jax.block_until_ready(
        block3d_reference(x, params, kernel_size=kernel_size, stride=stride,
                          expand_ratio=expand_ratio))
    np.testing.assert_allclose(np.asarray(out), np.asarray(ref),
                               rtol=2e-4, atol=2e-4)
    print("KERNEL_OK")
</pallas_src>

<mosaic_0001>
module attributes {stable_mosaic.version = 11 : i64} {
  func.func @_block3d_kernel(%arg0: i32, %arg1: memref<1x512x16xf32, #tpu.memory_space<vmem>>, %arg2: memref<16x128xf32, #tpu.memory_space<vmem>>, %arg3: memref<1x128xf32, #tpu.memory_space<vmem>>, %arg4: memref<27x1x128xf32, #tpu.memory_space<vmem>>, %arg5: memref<1x128xf32, #tpu.memory_space<vmem>>, %arg6: memref<128x4xf32, #tpu.memory_space<vmem>>, %arg7: memref<1x4xf32, #tpu.memory_space<vmem>>, %arg8: memref<4x128xf32, #tpu.memory_space<vmem>>, %arg9: memref<1x128xf32, #tpu.memory_space<vmem>>, %arg10: memref<128x16xf32, #tpu.memory_space<vmem>>, %arg11: memref<1x16xf32, #tpu.memory_space<vmem>>, %arg12: memref<1x512x16xf32, #tpu.memory_space<vmem>>, %arg13: memref<672x128xf32, #tpu.memory_space<vmem>>, %arg14: memref<512x128xf32, #tpu.memory_space<vmem>>) attributes {dimension_semantics = [#tpu.dimension_semantics<parallel>], iteration_bounds = array<i64: 2>, scalar_prefetch = 0 : i64, scratch_operands = 2 : i64, tpu.core_type = #tpu.core_type<tc>, window_params = [{transform_indices = @transform_0, window_bounds = array<i64: 1, 512, 16>}, {pipeline_mode = #tpu.pipeline_mode<synchronous>, transform_indices = @transform_1, window_bounds = array<i64: 16, 128>}, {pipeline_mode = #tpu.pipeline_mode<synchronous>, transform_indices = @transform_2, window_bounds = array<i64: 1, 128>}, {pipeline_mode = #tpu.pipeline_mode<synchronous>, transform_indices = @transform_3, window_bounds = array<i64: 27, 1, 128>}, {pipeline_mode = #tpu.pipeline_mode<synchronous>, transform_indices = @transform_4, window_bounds = array<i64: 1, 128>}, {pipeline_mode = #tpu.pipeline_mode<synchronous>, transform_indices = @transform_5, window_bounds = array<i64: 128, 4>}, {pipeline_mode = #tpu.pipeline_mode<synchronous>, transform_indices = @transform_6, window_bounds = array<i64: 1, 4>}, {pipeline_mode = #tpu.pipeline_mode<synchronous>, transform_indices = @transform_7, window_bounds = array<i64: 4, 128>}, {pipeline_mode = #tpu.pipeline_mode<synchronous>, transform_indices = @transform_8, window_bounds = array<i64: 1, 128>}, {pipeline_mode = #tpu.pipeline_mode<synchronous>, transform_indices = @transform_9, window_bounds = array<i64: 128, 16>}, {pipeline_mode = #tpu.pipeline_mode<synchronous>, transform_indices = @transform_10, window_bounds = array<i64: 1, 16>}, {transform_indices = @transform_11, window_bounds = array<i64: 1, 512, 16>}]} {
    %cst = arith.constant 0.000000e+00 : f32
    %0 = vector.broadcast %cst : f32 to vector<80x128xf32>
    %c0 = arith.constant 0 : index
    %c0_0 = arith.constant 0 : index
    %1 = vector.load %arg13[%c0, %c0_0] : memref<672x128xf32, #tpu.memory_space<vmem>>, vector<80x128xf32>
    tpu.vector_store %arg13[%c0, %c0_0], %0 {strides = array<i32>} : memref<672x128xf32, #tpu.memory_space<vmem>>, vector<80x128xf32>,
    %cst_1 = arith.constant 0.000000e+00 : f32
    %2 = vector.broadcast %cst_1 : f32 to vector<80x128xf32>
    %c592 = arith.constant 592 : index
    %c0_2 = arith.constant 0 : index
    %3 = vector.load %arg13[%c592, %c0_2] : memref<672x128xf32, #tpu.memory_space<vmem>>, vector<80x128xf32>
    tpu.vector_store %arg13[%c592, %c0_2], %2 {strides = array<i32>} : memref<672x128xf32, #tpu.memory_space<vmem>>, vector<80x128xf32>,
    %c0_i32 = arith.constant 0 : i32
    %c8_i32 = arith.constant 8 : i32
    %4 = arith.addi %c0_i32, %c8_i32 : i32
    %c1_i32 = arith.constant 1 : i32
    scf.for %arg15 = %c0_i32 to %4 step %c1_i32  : i32 {
      %c64_i32 = arith.constant 64 : i32
      %44 = arith.muli %arg15, %c64_i32 : i32
      %45 = tpu.assume_multiple %44, 64 : i32
      %c0_32 = arith.constant 0 : index
      %46 = arith.index_cast %45 : i32 to index
      %c0_33 = arith.constant 0 : index
      %47 = vector.load %arg1[%c0_32, %46, %c0_33] : memref<1x512x16xf32, #tpu.memory_space<vmem>>, vector<1x64x16xf32>
      %48 = vector.shape_cast %47 : vector<1x64x16xf32> to vector<64x16xf32>
      %c0_34 = arith.constant 0 : index
      %c0_35 = arith.constant 0 : index
      %49 = vector.load %arg2[%c0_34, %c0_35] : memref<16x128xf32, #tpu.memory_space<vmem>>, vector<16x128xf32>
      %cst_36 = arith.constant dense<0.000000e+00> : vector<64x128xf32>
      %50 = tpu.matmul %48, %49, %cst_36 {dimension_numbers = #tpu.dot_dimension_numbers<[1], [0], [0], [1], [0, 0, 1, 1], [], []>} : vector<64x16xf32>, vector<16x128xf32>, vector<64x128xf32> -> vector<64x128xf32>
      %c0_37 = arith.constant 0 : index
      %c0_38 = arith.constant 0 : index
      %51 = vector.load %arg3[%c0_37, %c0_38] : memref<1x128xf32, #tpu.memory_space<vmem>>, vector<1x128xf32>
      %52 = vector.broadcast %51 : vector<1x128xf32> to vector<64x128xf32>
      %53 = arith.addf %50, %52 : vector<64x128xf32>
      %54 = math.absf %53 : vector<64x128xf32>
      %cst_39 = arith.constant 0.000000e+00 : f32
      %55 = vector.broadcast %cst_39 : f32 to vector<64x128xf32>
      %56 = arith.subf %55, %54 : vector<64x128xf32>
      %57 = math.exp %56 : vector<64x128xf32>
      %cst_40 = arith.constant 1.000000e+00 : f32
      %58 = vector.broadcast %cst_40 : f32 to vector<64x128xf32>
      %59 = arith.addf %58, %57 : vector<64x128xf32>
      %cst_41 = arith.constant 1.000000e+00 : f32
      %60 = vector.broadcast %cst_41 : f32 to vector<64x128xf32>
      %61 = arith.divf %60, %59 : vector<64x128xf32>
      %cst_42 = arith.constant 0.000000e+00 : f32
      %62 = vector.broadcast %cst_42 : f32 to vector<64x128xf32>
      %63 = arith.cmpf oge, %53, %62 : vector<64x128xf32>
      %64 = arith.mulf %57, %61 : vector<64x128xf32>
      %65 = arith.select %63, %61, %64 : vector<64x128xi1>, vector<64x128xf32>
      %66 = arith.mulf %53, %65 : vector<64x128xf32>
      %c80_i32 = arith.constant 80 : i32
      %67 = arith.addi %c80_i32, %45 : i32
      %68 = arith.index_cast %67 : i32 to index
      %c0_43 = arith.constant 0 : index
      %69 = vector.load %arg13[%68, %c0_43] : memref<672x128xf32, #tpu.memory_space<vmem>>, vector<64x128xf32>
      tpu.vector_store %arg13[%68, %c0_43], %66 {strides = array<i32>} : memref<672x128xf32, #tpu.memory_space<vmem>>, vector<64x128xf32>,
    }
    %c8_i32_3 = arith.constant 8 : i32
    %cst_4 = arith.constant 0.000000e+00 : f32
    %5 = vector.broadcast %cst_4 : f32 to vector<1x128xf32>
    %c0_i32_5 = arith.constant 0 : i32
    %c8_i32_6 = arith.constant 8 : i32
    %6 = arith.addi %c0_i32_5, %c8_i32_6 : i32
    %c1_i32_7 = arith.constant 1 : i32
    %7 = scf.for %arg15 = %c0_i32_5 to %6 step %c1_i32_7 iter_args(%arg16 = %5) -> (vector<1x128xf32>)  : i32 {
      %c64_i32 = arith.constant 64 : i32
      %44 = arith.muli %arg15, %c64_i32 : i32
      %45 = tpu.assume_multiple %44, 64 : i32
      %46 = tpu.iota {dimensions = array<i32: 0>} : vector<64x128xi32>
      %47 = vector.broadcast %45 : i32 to vector<64x128xi32>
      %48 = arith.addi %46, %47 : vector<64x128xi32>
      %c7_i32 = arith.constant 7 : i32
      %49 = vector.broadcast %c7_i32 : i32 to vector<64x128xi32>
      %50 = arith.andi %48, %49 : vector<64x128xi32>
      %c3_i32 = arith.constant 3 : i32
      %51 = vector.broadcast %c3_i32 : i32 to vector<64x128xi32>
      %52 = arith.shrsi %48, %51 : vector<64x128xi32>
      %c7_i32_32 = arith.constant 7 : i32
      %53 = vector.broadcast %c7_i32_32 : i32 to vector<64x128xi32>
      %54 = arith.andi %52, %53 : vector<64x128xi32>
      %c7_i32_33 = arith.constant 7 : i32
      %55 = arith.addi %c7_i32_33, %45 : i32
      %56 = arith.index_cast %55 : i32 to index
      %c0_34 = arith.constant 0 : index
      %57 = vector.load %arg13[%56, %c0_34] : memref<672x128xf32, #tpu.memory_space<vmem>>, vector<64x128xf32>
      %c1_i32_35 = arith.constant 1 : i32
      %58 = vector.broadcast %c1_i32_35 : i32 to vector<64x128xi32>
      %59 = arith.cmpi sge, %54, %58 : vector<64x128xi32>
      %c1_i32_36 = arith.constant 1 : i32
      %60 = vector.broadcast %c1_i32_36 : i32 to vector<64x128xi32>
      %61 = arith.cmpi sge, %50, %60 : vector<64x128xi32>
      %62 = arith.andi %59, %61 : vector<64x128xi1>
      %cst_37 = arith.constant 0.000000e+00 : f32
      %63 = vector.broadcast %cst_37 : f32 to vector<64x128xf32>
      %64 = arith.select %62, %57, %63 : vector<64x128xi1>, vector<64x128xf32>
      %c0_38 = arith.constant 0 : index
      %c0_39 = arith.constant 0 : index
      %c0_40 = arith.constant 0 : index
      %65 = vector.load %arg4[%c0_38, %c0_39, %c0_40] : memref<27x1x128xf32, #tpu.memory_space<vmem>>, vector<1x1x128xf32>
      %66 = vector.shape_cast %65 : vector<1x1x128xf32> to vector<1x128xf32>
      %67 = vector.broadcast %66 : vector<1x128xf32> to vector<64x128xf32>
      %68 = arith.mulf %64, %67 : vector<64x128xf32>
      %c8_i32_41 = arith.constant 8 : i32
      %69 = arith.addi %c8_i32_41, %45 : i32
      %70 = arith.index_cast %69 : i32 to index
      %c0_42 = arith.constant 0 : index
      %71 = vector.load %arg13[%70, %c0_42] : memref<672x128xf32, #tpu.memory_space<vmem>>, vector<64x128xf32>
      %c1_i32_43 = arith.constant 1 : i32
      %72 = vector.broadcast %c1_i32_43 : i32 to vector<64x128xi32>
      %73 = arith.cmpi sge, %54, %72 : vector<64x128xi32>
      %cst_44 = arith.constant 0.000000e+00 : f32
      %74 = vector.broadcast %cst_44 : f32 to vector<64x128xf32>
      %75 = arith.select %73, %71, %74 : vector<64x128xi1>, vector<64x128xf32>
      %c1 = arith.constant 1 : index
      %c0_45 = arith.constant 0 : index
      %c0_46 = arith.constant 0 : index
      %76 = vector.load %arg4[%c1, %c0_45, %c0_46] : memref<27x1x128xf32, #tpu.memory_space<vmem>>, vector<1x1x128xf32>
      %77 = vector.shape_cast %76 : vector<1x1x128xf32> to vector<1x128xf32>
      %78 = vector.broadcast %77 : vector<1x128xf32> to vector<64x128xf32>
      %79 = arith.mulf %75, %78 : vector<64x128xf32>
      %80 = arith.addf %68, %79 : vector<64x128xf32>
      %c9_i32 = arith.constant 9 : i32
      %81 = arith.addi %c9_i32, %45 : i32
      %82 = arith.index_cast %81 : i32 to index
      %c0_47 = arith.constant 0 : index
      %83 = vector.load %arg13[%82, %c0_47] : memref<672x128xf32, #tpu.memory_space<vmem>>, vector<64x128xf32>
      %c1_i32_48 = arith.constant 1 : i32
      %84 = vector.broadcast %c1_i32_48 : i32 to vector<64x128xi32>
      %85 = arith.cmpi sge, %54, %84 : vector<64x128xi32>
      %c7_i32_49 = arith.constant 7 : i32
      %86 = vector.broadcast %c7_i32_49 : i32 to vector<64x128xi32>
      %87 = arith.cmpi slt, %50, %86 : vector<64x128xi32>
      %88 = arith.andi %85, %87 : vector<64x128xi1>
      %cst_50 = arith.constant 0.000000e+00 : f32
      %89 = vector.broadcast %cst_50 : f32 to vector<64x128xf32>
      %90 = arith.select %88, %83, %89 : vector<64x128xi1>, vector<64x128xf32>
      %c2 = arith.constant 2 : index
      %c0_51 = arith.constant 0 : index
      %c0_52 = arith.constant 0 : index
      %91 = vector.load %arg4[%c2, %c0_51, %c0_52] : memref<27x1x128xf32, #tpu.memory_space<vmem>>, vector<1x1x128xf32>
      %92 = vector.shape_cast %91 : vector<1x1x128xf32> to vector<1x128xf32>
      %93 = vector.broadcast %92 : vector<1x128xf32> to vector<64x128xf32>
      %94 = arith.mulf %90, %93 : vector<64x128xf32>
      %95 = arith.addf %80, %94 : vector<64x128xf32>
      %c15_i32 = arith.constant 15 : i32
      %96 = arith.addi %c15_i32, %45 : i32
      %97 = arith.index_cast %96 : i32 to index
      %c0_53 = arith.constant 0 : index
      %98 = vector.load %arg13[%97, %c0_53] : memref<672x128xf32, #tpu.memory_space<vmem>>, vector<64x128xf32>
      %c1_i32_54 = arith.constant 1 : i32
      %99 = vector.broadcast %c1_i32_54 : i32 to vector<64x128xi32>
      %100 = arith.cmpi sge, %50, %99 : vector<64x128xi32>
      %cst_55 = arith.constant 0.000000e+00 : f32
      %101 = vector.broadcast %cst_55 : f32 to vector<64x128xf32>
      %102 = arith.select %100, %98, %101 : vector<64x128xi1>, vector<64x128xf32>
      %c3 = arith.constant 3 : index
      %c0_56 = arith.constant 0 : index
      %c0_57 = arith.constant 0 : index
      %103 = vector.load %arg4[%c3, %c0_56, %c0_57] : memref<27x1x128xf32, #tpu.memory_space<vmem>>, vector<1x1x128xf32>
      %104 = vector.shape_cast %103 : vector<1x1x128xf32> to vector<1x128xf32>
      %105 = vector.broadcast %104 : vector<1x128xf32> to vector<64x128xf32>
      %106 = arith.mulf %102, %105 : vector<64x128xf32>
      %107 = arith.addf %95, %106 : vector<64x128xf32>
      %c16_i32 = arith.constant 16 : i32
      %108 = arith.addi %c16_i32, %45 : i32
      %109 = arith.index_cast %108 : i32 to index
      %c0_58 = arith.constant 0 : index
      %110 = vector.load %arg13[%109, %c0_58] : memref<672x128xf32, #tpu.memory_space<vmem>>, vector<64x128xf32>
      %c4 = arith.constant 4 : index
      %c0_59 = arith.constant 0 : index
      %c0_60 = arith.constant 0 : index
      %111 = vector.load %arg4[%c4, %c0_59, %c0_60] : memref<27x1x128xf32, #tpu.memory_space<vmem>>, vector<1x1x128xf32>
      %112 = vector.shape_cast %111 : vector<1x1x128xf32> to vector<1x128xf32>
      %113 = vector.broadcast %112 : vector<1x128xf32> to vector<64x128xf32>
      %114 = arith.mulf %110, %113 : vector<64x128xf32>
      %115 = arith.addf %107, %114 : vector<64x128xf32>
      %c17_i32 = arith.constant 17 : i32
      %116 = arith.addi %c17_i32, %45 : i32
      %117 = arith.index_cast %116 : i32 to index
      %c0_61 = arith.constant 0 : index
      %118 = vector.load %arg13[%117, %c0_61] : memref<672x128xf32, #tpu.memory_space<vmem>>, vector<64x128xf32>
      %c7_i32_62 = arith.constant 7 : i32
      %119 = vector.broadcast %c7_i32_62 : i32 to vector<64x128xi32>
      %120 = arith.cmpi slt, %50, %119 : vector<64x128xi32>
      %cst_63 = arith.constant 0.000000e+00 : f32
      %121 = vector.broadcast %cst_63 : f32 to vector<64x128xf32>
      %122 = arith.select %120, %118, %121 : vector<64x128xi1>, vector<64x128xf32>
      %c5 = arith.constant 5 : index
      %c0_64 = arith.constant 0 : index
      %c0_65 = arith.constant 0 : index
      %123 = vector.load %arg4[%c5, %c0_64, %c0_65] : memref<27x1x128xf32, #tpu.memory_space<vmem>>, vector<1x1x128xf32>
      %124 = vector.shape_cast %123 : vector<1x1x128xf32> to vector<1x128xf32>
      %125 = vector.broadcast %124 : vector<1x128xf32> to vector<64x128xf32>
      %126 = arith.mulf %122, %125 : vector<64x128xf32>
      %127 = arith.addf %115, %126 : vector<64x128xf32>
      %c23_i32 = arith.constant 23 : i32
      %128 = arith.addi %c23_i32, %45 : i32
      %129 = arith.index_cast %128 : i32 to index
      %c0_66 = arith.constant 0 : index
      %130 = vector.load %arg13[%129, %c0_66] : memref<672x128xf32, #tpu.memory_space<vmem>>, vector<64x128xf32>
      %c7_i32_67 = arith.constant 7 : i32
      %131 = vector.broadcast %c7_i32_67 : i32 to vector<64x128xi32>
      %132 = arith.cmpi slt, %54, %131 : vector<64x128xi32>
      %c1_i32_68 = arith.constant 1 : i32
      %133 = vector.broadcast %c1_i32_68 : i32 to vector<64x128xi32>
      %134 = arith.cmpi sge, %50, %133 : vector<64x128xi32>
      %135 = arith.andi %132, %134 : vector<64x128xi1>
      %cst_69 = arith.constant 0.000000e+00 : f32
      %136 = vector.broadcast %cst_69 : f32 to vector<64x128xf32>
      %137 = arith.select %135, %130, %136 : vector<64x128xi1>, vector<64x128xf32>
      %c6 = arith.constant 6 : index
      %c0_70 = arith.constant 0 : index
      %c0_71 = arith.constant 0 : index
      %138 = vector.load %arg4[%c6, %c0_70, %c0_71] : memref<27x1x128xf32, #tpu.memory_space<vmem>>, vector<1x1x128xf32>
      %139 = vector.shape_cast %138 : vector<1x1x128xf32> to vector<1x128xf32>
      %140 = vector.broadcast %139 : vector<1x128xf32> to vector<64x128xf32>
      %141 = arith.mulf %137, %140 : vector<64x128xf32>
      %142 = arith.addf %127, %141 : vector<64x128xf32>
      %c24_i32 = arith.constant 24 : i32
      %143 = arith.addi %c24_i32, %45 : i32
      %144 = arith.index_cast %143 : i32 to index
      %c0_72 = arith.constant 0 : index
      %145 = vector.load %arg13[%144, %c0_72] : memref<672x128xf32, #tpu.memory_space<vmem>>, vector<64x128xf32>
      %c7_i32_73 = arith.constant 7 : i32
      %146 = vector.broadcast %c7_i32_73 : i32 to vector<64x128xi32>
      %147 = arith.cmpi slt, %54, %146 : vector<64x128xi32>
      %cst_74 = arith.constant 0.000000e+00 : f32
      %148 = vector.broadcast %cst_74 : f32 to vector<64x128xf32>
      %149 = arith.select %147, %145, %148 : vector<64x128xi1>, vector<64x128xf32>
      %c7 = arith.constant 7 : index
      %c0_75 = arith.constant 0 : index
      %c0_76 = arith.constant 0 : index
      %150 = vector.load %arg4[%c7, %c0_75, %c0_76] : memref<27x1x128xf32, #tpu.memory_space<vmem>>, vector<1x1x128xf32>
      %151 = vector.shape_cast %150 : vector<1x1x128xf32> to vector<1x128xf32>
      %152 = vector.broadcast %151 : vector<1x128xf32> to vector<64x128xf32>
      %153 = arith.mulf %149, %152 : vector<64x128xf32>
      %154 = arith.addf %142, %153 : vector<64x128xf32>
      %c25_i32 = arith.constant 25 : i32
      %155 = arith.addi %c25_i32, %45 : i32
      %156 = arith.index_cast %155 : i32 to index
      %c0_77 = arith.constant 0 : index
      %157 = vector.load %arg13[%156, %c0_77] : memref<672x128xf32, #tpu.memory_space<vmem>>, vector<64x128xf32>
      %c7_i32_78 = arith.constant 7 : i32
      %158 = vector.broadcast %c7_i32_78 : i32 to vector<64x128xi32>
      %159 = arith.cmpi slt, %54, %158 : vector<64x128xi32>
      %c7_i32_79 = arith.constant 7 : i32
      %160 = vector.broadcast %c7_i32_79 : i32 to vector<64x128xi32>
      %161 = arith.cmpi slt, %50, %160 : vector<64x128xi32>
      %162 = arith.andi %159, %161 : vector<64x128xi1>
      %cst_80 = arith.constant 0.000000e+00 : f32
      %163 = vector.broadcast %cst_80 : f32 to vector<64x128xf32>
      %164 = arith.select %162, %157, %163 : vector<64x128xi1>, vector<64x128xf32>
      %c8 = arith.constant 8 : index
      %c0_81 = arith.constant 0 : index
      %c0_82 = arith.constant 0 : index
      %165 = vector.load %arg4[%c8, %c0_81, %c0_82] : memref<27x1x128xf32, #tpu.memory_space<vmem>>, vector<1x1x128xf32>
      %166 = vector.shape_cast %165 : vector<1x1x128xf32> to vector<1x128xf32>
      %167 = vector.broadcast %166 : vector<1x128xf32> to vector<64x128xf32>
      %168 = arith.mulf %164, %167 : vector<64x128xf32>
      %169 = arith.addf %154, %168 : vector<64x128xf32>
      %c71_i32 = arith.constant 71 : i32
      %170 = arith.addi %c71_i32, %45 : i32
      %171 = arith.index_cast %170 : i32 to index
      %c0_83 = arith.constant 0 : index
      %172 = vector.load %arg13[%171, %c0_83] : memref<672x128xf32, #tpu.memory_space<vmem>>, vector<64x128xf32>
      %c1_i32_84 = arith.constant 1 : i32
      %173 = vector.broadcast %c1_i32_84 : i32 to vector<64x128xi32>
      %174 = arith.cmpi sge, %54, %173 : vector<64x128xi32>
      %c1_i32_85 = arith.constant 1 : i32
      %175 = vector.broadcast %c1_i32_85 : i32 to vector<64x128xi32>
      %176 = arith.cmpi sge, %50, %175 : vector<64x128xi32>
      %177 = arith.andi %174, %176 : vector<64x128xi1>
      %cst_86 = arith.constant 0.000000e+00 : f32
      %178 = vector.broadcast %cst_86 : f32 to vector<64x128xf32>
      %179 = arith.select %177, %172, %178 : vector<64x128xi1>, vector<64x128xf32>
      %c9 = arith.constant 9 : index
      %c0_87 = arith.constant 0 : index
      %c0_88 = arith.constant 0 : index
      %180 = vector.load %arg4[%c9, %c0_87, %c0_88] : memref<27x1x128xf32, #tpu.memory_space<vmem>>, vector<1x1x128xf32>
      %181 = vector.shape_cast %180 : vector<1x1x128xf32> to vector<1x128xf32>
      %182 = vector.broadcast %181 : vector<1x128xf32> to vector<64x128xf32>
      %183 = arith.mulf %179, %182 : vector<64x128xf32>
      %184 = arith.addf %169, %183 : vector<64x128xf32>
      %c72_i32 = arith.constant 72 : i32
      %185 = arith.addi %c72_i32, %45 : i32
      %186 = arith.index_cast %185 : i32 to index
      %c0_89 = arith.constant 0 : index
      %187 = vector.load %arg13[%186, %c0_89] : memref<672x128xf32, #tpu.memory_space<vmem>>, vector<64x128xf32>
      %c1_i32_90 = arith.constant 1 : i32
      %188 = vector.broadcast %c1_i32_90 : i32 to vector<64x128xi32>
      %189 = arith.cmpi sge, %54, %188 : vector<64x128xi32>
      %cst_91 = arith.constant 0.000000e+00 : f32
      %190 = vector.broadcast %cst_91 : f32 to vector<64x128xf32>
      %191 = arith.select %189, %187, %190 : vector<64x128xi1>, vector<64x128xf32>
      %c10 = arith.constant 10 : index
      %c0_92 = arith.constant 0 : index
      %c0_93 = arith.constant 0 : index
      %192 = vector.load %arg4[%c10, %c0_92, %c0_93] : memref<27x1x128xf32, #tpu.memory_space<vmem>>, vector<1x1x128xf32>
      %193 = vector.shape_cast %192 : vector<1x1x128xf32> to vector<1x128xf32>
      %194 = vector.broadcast %193 : vector<1x128xf32> to vector<64x128xf32>
      %195 = arith.mulf %191, %194 : vector<64x128xf32>
      %196 = arith.addf %184, %195 : vector<64x128xf32>
      %c73_i32 = arith.constant 73 : i32
      %197 = arith.addi %c73_i32, %45 : i32
      %198 = arith.index_cast %197 : i32 to index
      %c0_94 = arith.constant 0 : index
      %199 = vector.load %arg13[%198, %c0_94] : memref<672x128xf32, #tpu.memory_space<vmem>>, vector<64x128xf32>
      %c1_i32_95 = arith.constant 1 : i32
      %200 = vector.broadcast %c1_i32_95 : i32 to vector<64x128xi32>
      %201 = arith.cmpi sge, %54, %200 : vector<64x128xi32>
      %c7_i32_96 = arith.constant 7 : i32
      %202 = vector.broadcast %c7_i32_96 : i32 to vector<64x128xi32>
      %203 = arith.cmpi slt, %50, %202 : vector<64x128xi32>
      %204 = arith.andi %201, %203 : vector<64x128xi1>
      %cst_97 = arith.constant 0.000000e+00 : f32
      %205 = vector.broadcast %cst_97 : f32 to vector<64x128xf32>
      %206 = arith.select %204, %199, %205 : vector<64x128xi1>, vector<64x128xf32>
      %c11 = arith.constant 11 : index
      %c0_98 = arith.constant 0 : index
      %c0_99 = arith.constant 0 : index
      %207 = vector.load %arg4[%c11, %c0_98, %c0_99] : memref<27x1x128xf32, #tpu.memory_space<vmem>>, vector<1x1x128xf32>
      %208 = vector.shape_cast %207 : vector<1x1x128xf32> to vector<1x128xf32>
      %209 = vector.broadcast %208 : vector<1x128xf32> to vector<64x128xf32>
      %210 = arith.mulf %206, %209 : vector<64x128xf32>
      %211 = arith.addf %196, %210 : vector<64x128xf32>
      %c79_i32 = arith.constant 79 : i32
      %212 = arith.addi %c79_i32, %45 : i32
      %213 = arith.index_cast %212 : i32 to index
      %c0_100 = arith.constant 0 : index
      %214 = vector.load %arg13[%213, %c0_100] : memref<672x128xf32, #tpu.memory_space<vmem>>, vector<64x128xf32>
      %c1_i32_101 = arith.constant 1 : i32
      %215 = vector.broadcast %c1_i32_101 : i32 to vector<64x128xi32>
      %216 = arith.cmpi sge, %50, %215 : vector<64x128xi32>
      %cst_102 = arith.constant 0.000000e+00 : f32
      %217 = vector.broadcast %cst_102 : f32 to vector<64x128xf32>
      %218 = arith.select %216, %214, %217 : vector<64x128xi1>, vector<64x128xf32>
      %c12 = arith.constant 12 : index
      %c0_103 = arith.constant 0 : index
      %c0_104 = arith.constant 0 : index
      %219 = vector.load %arg4[%c12, %c0_103, %c0_104] : memref<27x1x128xf32, #tpu.memory_space<vmem>>, vector<1x1x128xf32>
      %220 = vector.shape_cast %219 : vector<1x1x128xf32> to vector<1x128xf32>
      %221 = vector.broadcast %220 : vector<1x128xf32> to vector<64x128xf32>
      %222 = arith.mulf %218, %221 : vector<64x128xf32>
      %223 = arith.addf %211, %222 : vector<64x128xf32>
      %c80_i32 = arith.constant 80 : i32
      %224 = arith.addi %c80_i32, %45 : i32
      %225 = arith.index_cast %224 : i32 to index
      %c0_105 = arith.constant 0 : index
      %226 = vector.load %arg13[%225, %c0_105] : memref<672x128xf32, #tpu.memory_space<vmem>>, vector<64x128xf32>
      %c13 = arith.constant 13 : index
      %c0_106 = arith.constant 0 : index
      %c0_107 = arith.constant 0 : index
      %227 = vector.load %arg4[%c13, %c0_106, %c0_107] : memref<27x1x128xf32, #tpu.memory_space<vmem>>, vector<1x1x128xf32>
      %228 = vector.shape_cast %227 : vector<1x1x128xf32> to vector<1x128xf32>
      %229 = vector.broadcast %228 : vector<1x128xf32> to vector<64x128xf32>
      %230 = arith.mulf %226, %229 : vector<64x128xf32>
      %231 = arith.addf %223, %230 : vector<64x128xf32>
      %c81_i32 = arith.constant 81 : i32
      %232 = arith.addi %c81_i32, %45 : i32
      %233 = arith.index_cast %232 : i32 to index
      %c0_108 = arith.constant 0 : index
      %234 = vector.load %arg13[%233, %c0_108] : memref<672x128xf32, #tpu.memory_space<vmem>>, vector<64x128xf32>
      %c7_i32_109 = arith.constant 7 : i32
      %235 = vector.broadcast %c7_i32_109 : i32 to vector<64x128xi32>
      %236 = arith.cmpi slt, %50, %235 : vector<64x128xi32>
      %cst_110 = arith.constant 0.000000e+00 : f32
      %237 = vector.broadcast %cst_110 : f32 to vector<64x128xf32>
      %238 = arith.select %236, %234, %237 : vector<64x128xi1>, vector<64x128xf32>
      %c14 = arith.constant 14 : index
      %c0_111 = arith.constant 0 : index
      %c0_112 = arith.constant 0 : index
      %239 = vector.load %arg4[%c14, %c0_111, %c0_112] : memref<27x1x128xf32, #tpu.memory_space<vmem>>, vector<1x1x128xf32>
      %240 = vector.shape_cast %239 : vector<1x1x128xf32> to vector<1x128xf32>
      %241 = vector.broadcast %240 : vector<1x128xf32> to vector<64x128xf32>
      %242 = arith.mulf %238, %241 : vector<64x128xf32>
      %243 = arith.addf %231, %242 : vector<64x128xf32>
      %c87_i32 = arith.constant 87 : i32
      %244 = arith.addi %c87_i32, %45 : i32
      %245 = arith.index_cast %244 : i32 to index
      %c0_113 = arith.constant 0 : index
      %246 = vector.load %arg13[%245, %c0_113] : memref<672x128xf32, #tpu.memory_space<vmem>>, vector<64x128xf32>
      %c7_i32_114 = arith.constant 7 : i32
      %247 = vector.broadcast %c7_i32_114 : i32 to vector<64x128xi32>
      %248 = arith.cmpi slt, %54, %247 : vector<64x128xi32>
      %c1_i32_115 = arith.constant 1 : i32
      %249 = vector.broadcast %c1_i32_115 : i32 to vector<64x128xi32>
      %250 = arith.cmpi sge, %50, %249 : vector<64x128xi32>
      %251 = arith.andi %248, %250 : vector<64x128xi1>
      %cst_116 = arith.constant 0.000000e+00 : f32
      %252 = vector.broadcast %cst_116 : f32 to vector<64x128xf32>
      %253 = arith.select %251, %246, %252 : vector<64x128xi1>, vector<64x128xf32>
      %c15 = arith.constant 15 : index
      %c0_117 = arith.constant 0 : index
      %c0_118 = arith.constant 0 : index
      %254 = vector.load %arg4[%c15, %c0_117, %c0_118] : memref<27x1x128xf32, #tpu.memory_space<vmem>>, vector<1x1x128xf32>
      %255 = vector.shape_cast %254 : vector<1x1x128xf32> to vector<1x128xf32>
      %256 = vector.broadcast %255 : vector<1x128xf32> to vector<64x128xf32>
      %257 = arith.mulf %253, %256 : vector<64x128xf32>
      %258 = arith.addf %243, %257 : vector<64x128xf32>
      %c88_i32 = arith.constant 88 : i32
      %259 = arith.addi %c88_i32, %45 : i32
      %260 = arith.index_cast %259 : i32 to index
      %c0_119 = arith.constant 0 : index
      %261 = vector.load %arg13[%260, %c0_119] : memref<672x128xf32, #tpu.memory_space<vmem>>, vector<64x128xf32>
      %c7_i32_120 = arith.constant 7 : i32
      %262 = vector.broadcast %c7_i32_120 : i32 to vector<64x128xi32>
      %263 = arith.cmpi slt, %54, %262 : vector<64x128xi32>
      %cst_121 = arith.constant 0.000000e+00 : f32
      %264 = vector.broadcast %cst_121 : f32 to vector<64x128xf32>
      %265 = arith.select %263, %261, %264 : vector<64x128xi1>, vector<64x128xf32>
      %c16 = arith.constant 16 : index
      %c0_122 = arith.constant 0 : index
      %c0_123 = arith.constant 0 : index
      %266 = vector.load %arg4[%c16, %c0_122, %c0_123] : memref<27x1x128xf32, #tpu.memory_space<vmem>>, vector<1x1x128xf32>
      %267 = vector.shape_cast %266 : vector<1x1x128xf32> to vector<1x128xf32>
      %268 = vector.broadcast %267 : vector<1x128xf32> to vector<64x128xf32>
      %269 = arith.mulf %265, %268 : vector<64x128xf32>
      %270 = arith.addf %258, %269 : vector<64x128xf32>
      %c89_i32 = arith.constant 89 : i32
      %271 = arith.addi %c89_i32, %45 : i32
      %272 = arith.index_cast %271 : i32 to index
      %c0_124 = arith.constant 0 : index
      %273 = vector.load %arg13[%272, %c0_124] : memref<672x128xf32, #tpu.memory_space<vmem>>, vector<64x128xf32>
      %c7_i32_125 = arith.constant 7 : i32
      %274 = vector.broadcast %c7_i32_125 : i32 to vector<64x128xi32>
      %275 = arith.cmpi slt, %54, %274 : vector<64x128xi32>
      %c7_i32_126 = arith.constant 7 : i32
      %276 = vector.broadcast %c7_i32_126 : i32 to vector<64x128xi32>
      %277 = arith.cmpi slt, %50, %276 : vector<64x128xi32>
      %278 = arith.andi %275, %277 : vector<64x128xi1>
      %cst_127 = arith.constant 0.000000e+00 : f32
      %279 = vector.broadcast %cst_127 : f32 to vector<64x128xf32>
      %280 = arith.select %278, %273, %279 : vector<64x128xi1>, vector<64x128xf32>
      %c17 = arith.constant 17 : index
      %c0_128 = arith.constant 0 : index
      %c0_129 = arith.constant 0 : index
      %281 = vector.load %arg4[%c17, %c0_128, %c0_129] : memref<27x1x128xf32, #tpu.memory_space<vmem>>, vector<1x1x128xf32>
      %282 = vector.shape_cast %281 : vector<1x1x128xf32> to vector<1x128xf32>
      %283 = vector.broadcast %282 : vector<1x128xf32> to vector<64x128xf32>
      %284 = arith.mulf %280, %283 : vector<64x128xf32>
      %285 = arith.addf %270, %284 : vector<64x128xf32>
      %c135_i32 = arith.constant 135 : i32
      %286 = arith.addi %c135_i32, %45 : i32
      %287 = arith.index_cast %286 : i32 to index
      %c0_130 = arith.constant 0 : index
      %288 = vector.load %arg13[%287, %c0_130] : memref<672x128xf32, #tpu.memory_space<vmem>>, vector<64x128xf32>
      %c1_i32_131 = arith.constant 1 : i32
      %289 = vector.broadcast %c1_i32_131 : i32 to vector<64x128xi32>
      %290 = arith.cmpi sge, %54, %289 : vector<64x128xi32>
      %c1_i32_132 = arith.constant 1 : i32
      %291 = vector.broadcast %c1_i32_132 : i32 to vector<64x128xi32>
      %292 = arith.cmpi sge, %50, %291 : vector<64x128xi32>
      %293 = arith.andi %290, %292 : vector<64x128xi1>
      %cst_133 = arith.constant 0.000000e+00 : f32
      %294 = vector.broadcast %cst_133 : f32 to vector<64x128xf32>
      %295 = arith.select %293, %288, %294 : vector<64x128xi1>, vector<64x128xf32>
      %c18 = arith.constant 18 : index
      %c0_134 = arith.constant 0 : index
      %c0_135 = arith.constant 0 : index
      %296 = vector.load %arg4[%c18, %c0_134, %c0_135] : memref<27x1x128xf32, #tpu.memory_space<vmem>>, vector<1x1x128xf32>
      %297 = vector.shape_cast %296 : vector<1x1x128xf32> to vector<1x128xf32>
      %298 = vector.broadcast %297 : vector<1x128xf32> to vector<64x128xf32>
      %299 = arith.mulf %295, %298 : vector<64x128xf32>
      %300 = arith.addf %285, %299 : vector<64x128xf32>
      %c136_i32 = arith.constant 136 : i32
      %301 = arith.addi %c136_i32, %45 : i32
      %302 = arith.index_cast %301 : i32 to index
      %c0_136 = arith.constant 0 : index
      %303 = vector.load %arg13[%302, %c0_136] : memref<672x128xf32, #tpu.memory_space<vmem>>, vector<64x128xf32>
      %c1_i32_137 = arith.constant 1 : i32
      %304 = vector.broadcast %c1_i32_137 : i32 to vector<64x128xi32>
      %305 = arith.cmpi sge, %54, %304 : vector<64x128xi32>
      %cst_138 = arith.constant 0.000000e+00 : f32
      %306 = vector.broadcast %cst_138 : f32 to vector<64x128xf32>
      %307 = arith.select %305, %303, %306 : vector<64x128xi1>, vector<64x128xf32>
      %c19 = arith.constant 19 : index
      %c0_139 = arith.constant 0 : index
      %c0_140 = arith.constant 0 : index
      %308 = vector.load %arg4[%c19, %c0_139, %c0_140] : memref<27x1x128xf32, #tpu.memory_space<vmem>>, vector<1x1x128xf32>
      %309 = vector.shape_cast %308 : vector<1x1x128xf32> to vector<1x128xf32>
      %310 = vector.broadcast %309 : vector<1x128xf32> to vector<64x128xf32>
      %311 = arith.mulf %307, %310 : vector<64x128xf32>
      %312 = arith.addf %300, %311 : vector<64x128xf32>
      %c137_i32 = arith.constant 137 : i32
      %313 = arith.addi %c137_i32, %45 : i32
      %314 = arith.index_cast %313 : i32 to index
      %c0_141 = arith.constant 0 : index
      %315 = vector.load %arg13[%314, %c0_141] : memref<672x128xf32, #tpu.memory_space<vmem>>, vector<64x128xf32>
      %c1_i32_142 = arith.constant 1 : i32
      %316 = vector.broadcast %c1_i32_142 : i32 to vector<64x128xi32>
      %317 = arith.cmpi sge, %54, %316 : vector<64x128xi32>
      %c7_i32_143 = arith.constant 7 : i32
      %318 = vector.broadcast %c7_i32_143 : i32 to vector<64x128xi32>
      %319 = arith.cmpi slt, %50, %318 : vector<64x128xi32>
      %320 = arith.andi %317, %319 : vector<64x128xi1>
      %cst_144 = arith.constant 0.000000e+00 : f32
      %321 = vector.broadcast %cst_144 : f32 to vector<64x128xf32>
      %322 = arith.select %320, %315, %321 : vector<64x128xi1>, vector<64x128xf32>
      %c20 = arith.constant 20 : index
      %c0_145 = arith.constant 0 : index
      %c0_146 = arith.constant 0 : index
      %323 = vector.load %arg4[%c20, %c0_145, %c0_146] : memref<27x1x128xf32, #tpu.memory_space<vmem>>, vector<1x1x128xf32>
      %324 = vector.shape_cast %323 : vector<1x1x128xf32> to vector<1x128xf32>
      %325 = vector.broadcast %324 : vector<1x128xf32> to vector<64x128xf32>
      %326 = arith.mulf %322, %325 : vector<64x128xf32>
      %327 = arith.addf %312, %326 : vector<64x128xf32>
      %c143_i32 = arith.constant 143 : i32
      %328 = arith.addi %c143_i32, %45 : i32
      %329 = arith.index_cast %328 : i32 to index
      %c0_147 = arith.constant 0 : index
      %330 = vector.load %arg13[%329, %c0_147] : memref<672x128xf32, #tpu.memory_space<vmem>>, vector<64x128xf32>
      %c1_i32_148 = arith.constant 1 : i32
      %331 = vector.broadcast %c1_i32_148 : i32 to vector<64x128xi32>
      %332 = arith.cmpi sge, %50, %331 : vector<64x128xi32>
      %cst_149 = arith.constant 0.000000e+00 : f32
      %333 = vector.broadcast %cst_149 : f32 to vector<64x128xf32>
      %334 = arith.select %332, %330, %333 : vector<64x128xi1>, vector<64x128xf32>
      %c21 = arith.constant 21 : index
      %c0_150 = arith.constant 0 : index
      %c0_151 = arith.constant 0 : index
      %335 = vector.load %arg4[%c21, %c0_150, %c0_151] : memref<27x1x128xf32, #tpu.memory_space<vmem>>, vector<1x1x128xf32>
      %336 = vector.shape_cast %335 : vector<1x1x128xf32> to vector<1x128xf32>
      %337 = vector.broadcast %336 : vector<1x128xf32> to vector<64x128xf32>
      %338 = arith.mulf %334, %337 : vector<64x128xf32>
      %339 = arith.addf %327, %338 : vector<64x128xf32>
      %c144_i32 = arith.constant 144 : i32
      %340 = arith.addi %c144_i32, %45 : i32
      %341 = arith.index_cast %340 : i32 to index
      %c0_152 = arith.constant 0 : index
      %342 = vector.load %arg13[%341, %c0_152] : memref<672x128xf32, #tpu.memory_space<vmem>>, vector<64x128xf32>
      %c22 = arith.constant 22 : index
      %c0_153 = arith.constant 0 : index
      %c0_154 = arith.constant 0 : index
      %343 = vector.load %arg4[%c22, %c0_153, %c0_154] : memref<27x1x128xf32, #tpu.memory_space<vmem>>, vector<1x1x128xf32>
      %344 = vector.shape_cast %343 : vector<1x1x128xf32> to vector<1x128xf32>
      %345 = vector.broadcast %344 : vector<1x128xf32> to vector<64x128xf32>
      %346 = arith.mulf %342, %345 : vector<64x128xf32>
      %347 = arith.addf %339, %346 : vector<64x128xf32>
      %c145_i32 = arith.constant 145 : i32
      %348 = arith.addi %c145_i32, %45 : i32
      %349 = arith.index_cast %348 : i32 to index
      %c0_155 = arith.constant 0 : index
      %350 = vector.load %arg13[%349, %c0_155] : memref<672x128xf32, #tpu.memory_space<vmem>>, vector<64x128xf32>
      %c7_i32_156 = arith.constant 7 : i32
      %351 = vector.broadcast %c7_i32_156 : i32 to vector<64x128xi32>
      %352 = arith.cmpi slt, %50, %351 : vector<64x128xi32>
      %cst_157 = arith.constant 0.000000e+00 : f32
      %353 = vector.broadcast %cst_157 : f32 to vector<64x128xf32>
      %354 = arith.select %352, %350, %353 : vector<64x128xi1>, vector<64x128xf32>
      %c23 = arith.constant 23 : index
      %c0_158 = arith.constant 0 : index
      %c0_159 = arith.constant 0 : index
      %355 = vector.load %arg4[%c23, %c0_158, %c0_159] : memref<27x1x128xf32, #tpu.memory_space<vmem>>, vector<1x1x128xf32>
      %356 = vector.shape_cast %355 : vector<1x1x128xf32> to vector<1x128xf32>
      %357 = vector.broadcast %356 : vector<1x128xf32> to vector<64x128xf32>
      %358 = arith.mulf %354, %357 : vector<64x128xf32>
      %359 = arith.addf %347, %358 : vector<64x128xf32>
      %c151_i32 = arith.constant 151 : i32
      %360 = arith.addi %c151_i32, %45 : i32
      %361 = arith.index_cast %360 : i32 to index
      %c0_160 = arith.constant 0 : index
      %362 = vector.load %arg13[%361, %c0_160] : memref<672x128xf32, #tpu.memory_space<vmem>>, vector<64x128xf32>
      %c7_i32_161 = arith.constant 7 : i32
      %363 = vector.broadcast %c7_i32_161 : i32 to vector<64x128xi32>
      %364 = arith.cmpi slt, %54, %363 : vector<64x128xi32>
      %c1_i32_162 = arith.constant 1 : i32
      %365 = vector.broadcast %c1_i32_162 : i32 to vector<64x128xi32>
      %366 = arith.cmpi sge, %50, %365 : vector<64x128xi32>
      %367 = arith.andi %364, %366 : vector<64x128xi1>
      %cst_163 = arith.constant 0.000000e+00 : f32
      %368 = vector.broadcast %cst_163 : f32 to vector<64x128xf32>
      %369 = arith.select %367, %362, %368 : vector<64x128xi1>, vector<64x128xf32>
      %c24 = arith.constant 24 : index
      %c0_164 = arith.constant 0 : index
      %c0_165 = arith.constant 0 : index
      %370 = vector.load %arg4[%c24, %c0_164, %c0_165] : memref<27x1x128xf32, #tpu.memory_space<vmem>>, vector<1x1x128xf32>
      %371 = vector.shape_cast %370 : vector<1x1x128xf32> to vector<1x128xf32>
      %372 = vector.broadcast %371 : vector<1x128xf32> to vector<64x128xf32>
      %373 = arith.mulf %369, %372 : vector<64x128xf32>
      %374 = arith.addf %359, %373 : vector<64x128xf32>
      %c152_i32 = arith.constant 152 : i32
      %375 = arith.addi %c152_i32, %45 : i32
      %376 = arith.index_cast %375 : i32 to index
      %c0_166 = arith.constant 0 : index
      %377 = vector.load %arg13[%376, %c0_166] : memref<672x128xf32, #tpu.memory_space<vmem>>, vector<64x128xf32>
      %c7_i32_167 = arith.constant 7 : i32
      %378 = vector.broadcast %c7_i32_167 : i32 to vector<64x128xi32>
      %379 = arith.cmpi slt, %54, %378 : vector<64x128xi32>
      %cst_168 = arith.constant 0.000000e+00 : f32
      %380 = vector.broadcast %cst_168 : f32 to vector<64x128xf32>
      %381 = arith.select %379, %377, %380 : vector<64x128xi1>, vector<64x128xf32>
      %c25 = arith.constant 25 : index
      %c0_169 = arith.constant 0 : index
      %c0_170 = arith.constant 0 : index
      %382 = vector.load %arg4[%c25, %c0_169, %c0_170] : memref<27x1x128xf32, #tpu.memory_space<vmem>>, vector<1x1x128xf32>
      %383 = vector.shape_cast %382 : vector<1x1x128xf32> to vector<1x128xf32>
      %384 = vector.broadcast %383 : vector<1x128xf32> to vector<64x128xf32>
      %385 = arith.mulf %381, %384 : vector<64x128xf32>
      %386 = arith.addf %374, %385 : vector<64x128xf32>
      %c153_i32 = arith.constant 153 : i32
      %387 = arith.addi %c153_i32, %45 : i32
      %388 = arith.index_cast %387 : i32 to index
      %c0_171 = arith.constant 0 : index
      %389 = vector.load %arg13[%388, %c0_171] : memref<672x128xf32, #tpu.memory_space<vmem>>, vector<64x128xf32>
      %c7_i32_172 = arith.constant 7 : i32
      %390 = vector.broadcast %c7_i32_172 : i32 to vector<64x128xi32>
      %391 = arith.cmpi slt, %54, %390 : vector<64x128xi32>
      %c7_i32_173 = arith.constant 7 : i32
      %392 = vector.broadcast %c7_i32_173 : i32 to vector<64x128xi32>
      %393 = arith.cmpi slt, %50, %392 : vector<64x128xi32>
      %394 = arith.andi %391, %393 : vector<64x128xi1>
      %cst_174 = arith.constant 0.000000e+00 : f32
      %395 = vector.broadcast %cst_174 : f32 to vector<64x128xf32>
      %396 = arith.select %394, %389, %395 : vector<64x128xi1>, vector<64x128xf32>
      %c26 = arith.constant 26 : index
      %c0_175 = arith.constant 0 : index
      %c0_176 = arith.constant 0 : index
      %397 = vector.load %arg4[%c26, %c0_175, %c0_176] : memref<27x1x128xf32, #tpu.memory_space<vmem>>, vector<1x1x128xf32>
      %398 = vector.shape_cast %397 : vector<1x1x128xf32> to vector<1x128xf32>
      %399 = vector.broadcast %398 : vector<1x128xf32> to vector<64x128xf32>
      %400 = arith.mulf %396, %399 : vector<64x128xf32>
      %401 = arith.addf %386, %400 : vector<64x128xf32>
      %c0_177 = arith.constant 0 : index
      %c0_178 = arith.constant 0 : index
      %402 = vector.load %arg5[%c0_177, %c0_178] : memref<1x128xf32, #tpu.memory_space<vmem>>, vector<1x128xf32>
      %403 = vector.broadcast %402 : vector<1x128xf32> to vector<64x128xf32>
      %404 = arith.addf %401, %403 : vector<64x128xf32>
      %405 = math.absf %404 : vector<64x128xf32>
      %cst_179 = arith.constant 0.000000e+00 : f32
      %406 = vector.broadcast %cst_179 : f32 to vector<64x128xf32>
      %407 = arith.subf %406, %405 : vector<64x128xf32>
      %408 = math.exp %407 : vector<64x128xf32>
      %cst_180 = arith.constant 1.000000e+00 : f32
      %409 = vector.broadcast %cst_180 : f32 to vector<64x128xf32>
      %410 = arith.addf %409, %408 : vector<64x128xf32>
      %cst_181 = arith.constant 1.000000e+00 : f32
      %411 = vector.broadcast %cst_181 : f32 to vector<64x128xf32>
      %412 = arith.divf %411, %410 : vector<64x128xf32>
      %cst_182 = arith.constant 0.000000e+00 : f32
      %413 = vector.broadcast %cst_182 : f32 to vector<64x128xf32>
      %414 = arith.cmpf oge, %404, %413 : vector<64x128xf32>
      %415 = arith.mulf %408, %412 : vector<64x128xf32>
      %416 = arith.select %414, %412, %415 : vector<64x128xi1>, vector<64x128xf32>
      %417 = arith.mulf %404, %416 : vector<64x128xf32>
      %418 = arith.index_cast %45 : i32 to index
      %c0_183 = arith.constant 0 : index
      %419 = vector.load %arg14[%418, %c0_183] : memref<512x128xf32, #tpu.memory_space<vmem>>, vector<64x128xf32>
      tpu.vector_store %arg14[%418, %c0_183], %417 {strides = array<i32>} : memref<512x128xf32, #tpu.memory_space<vmem>>, vector<64x128xf32>,
      %cst_184 = arith.constant dense<0.000000e+00> : vector<128xf32>
      %420 = vector.multi_reduction <add>, %417, %cst_184 [0] : vector<64x128xf32> to vector<128xf32>
      %421 = vector.shape_cast %420 : vector<128xf32> to vector<1x128xf32>
      %422 = arith.addf %arg16, %421 : vector<1x128xf32>
      scf.yield %422 : vector<1x128xf32>
    }
    %c8_i32_8 = arith.constant 8 : i32
    %cst_9 = arith.constant 0.001953125 : f32
    %8 = vector.broadcast %cst_9 : f32 to vector<1x128xf32>
    %9 = arith.mulf %7, %8 : vector<1x128xf32>
    %c0_10 = arith.constant 0 : index
    %c0_11 = arith.constant 0 : index
    %10 = vector.load %arg6[%c0_10, %c0_11] : memref<128x4xf32, #tpu.memory_space<vmem>>, vector<128x4xf32>
    %cst_12 = arith.constant dense<0.000000e+00> : vector<1x4xf32>
    %11 = tpu.matmul %9, %10, %cst_12 {dimension_numbers = #tpu.dot_dimension_numbers<[1], [0], [0], [1], [0, 0, 1, 1], [], []>} : vector<1x128xf32>, vector<128x4xf32>, vector<1x4xf32> -> vector<1x4xf32>
    %c0_13 = arith.constant 0 : index
    %c0_14 = arith.constant 0 : index
    %12 = vector.load %arg7[%c0_13, %c0_14] : memref<1x4xf32, #tpu.memory_space<vmem>>, vector<1x4xf32>
    %13 = arith.addf %11, %12 : vector<1x4xf32>
    %14 = math.absf %13 : vector<1x4xf32>
    %cst_15 = arith.constant 0.000000e+00 : f32
    %15 = vector.broadcast %cst_15 : f32 to vector<1x4xf32>
    %16 = arith.subf %15, %14 : vector<1x4xf32>
    %17 = math.exp %16 : vector<1x4xf32>
    %cst_16 = arith.constant 1.000000e+00 : f32
    %18 = vector.broadcast %cst_16 : f32 to vector<1x4xf32>
    %19 = arith.addf %18, %17 : vector<1x4xf32>
    %cst_17 = arith.constant 1.000000e+00 : f32
    %20 = vector.broadcast %cst_17 : f32 to vector<1x4xf32>
    %21 = arith.divf %20, %19 : vector<1x4xf32>
    %cst_18 = arith.constant 0.000000e+00 : f32
    %22 = vector.broadcast %cst_18 : f32 to vector<1x4xf32>
    %23 = arith.cmpf oge, %13, %22 : vector<1x4xf32>
    %24 = arith.mulf %17, %21 : vector<1x4xf32>
    %25 = arith.select %23, %21, %24 : vector<1x4xi1>, vector<1x4xf32>
    %26 = arith.mulf %13, %25 : vector<1x4xf32>
    %c0_19 = arith.constant 0 : index
    %c0_20 = arith.constant 0 : index
    %27 = vector.load %arg8[%c0_19, %c0_20] : memref<4x128xf32, #tpu.memory_space<vmem>>, vector<4x128xf32>
    %cst_21 = arith.constant dense<0.000000e+00> : vector<1x128xf32>
    %28 = tpu.matmul %26, %27, %cst_21 {dimension_numbers = #tpu.dot_dimension_numbers<[1], [0], [0], [1], [0, 0, 1, 1], [], []>} : vector<1x4xf32>, vector<4x128xf32>, vector<1x128xf32> -> vector<1x128xf32>
    %c0_22 = arith.constant 0 : index
    %c0_23 = arith.constant 0 : index
    %29 = vector.load %arg9[%c0_22, %c0_23] : memref<1x128xf32, #tpu.memory_space<vmem>>, vector<1x128xf32>
    %30 = arith.addf %28, %29 : vector<1x128xf32>
    %31 = math.absf %30 : vector<1x128xf32>
    %cst_24 = arith.constant 0.000000e+00 : f32
    %32 = vector.broadcast %cst_24 : f32 to vector<1x128xf32>
    %33 = arith.subf %32, %31 : vector<1x128xf32>
    %34 = math.exp %33 : vector<1x128xf32>
    %cst_25 = arith.constant 1.000000e+00 : f32
    %35 = vector.broadcast %cst_25 : f32 to vector<1x128xf32>
    %36 = arith.addf %35, %34 : vector<1x128xf32>
    %cst_26 = arith.constant 1.000000e+00 : f32
    %37 = vector.broadcast %cst_26 : f32 to vector<1x128xf32>
    %38 = arith.divf %37, %36 : vector<1x128xf32>
    %cst_27 = arith.constant 0.000000e+00 : f32
    %39 = vector.broadcast %cst_27 : f32 to vector<1x128xf32>
    %40 = arith.cmpf oge, %30, %39 : vector<1x128xf32>
    %41 = arith.mulf %34, %38 : vector<1x128xf32>
    %42 = arith.select %40, %38, %41 : vector<1x128xi1>, vector<1x128xf32>
    %c0_i32_28 = arith.constant 0 : i32
    %c8_i32_29 = arith.constant 8 : i32
    %43 = arith.addi %c0_i32_28, %c8_i32_29 : i32
    %c1_i32_30 = arith.constant 1 : i32
    scf.for %arg15 = %c0_i32_28 to %43 step %c1_i32_30  : i32 {
      %c64_i32 = arith.constant 64 : i32
      %44 = arith.muli %arg15, %c64_i32 : i32
      %45 = tpu.assume_multiple %44, 64 : i32
      %46 = arith.index_cast %45 : i32 to index
      %c0_32 = arith.constant 0 : index
      %47 = vector.load %arg14[%46, %c0_32] : memref<512x128xf32, #tpu.memory_space<vmem>>, vector<64x128xf32>
      %48 = vector.broadcast %42 : vector<1x128xf32> to vector<64x128xf32>
      %49 = arith.mulf %47, %48 : vector<64x128xf32>
      %c0_33 = arith.constant 0 : index
      %c0_34 = arith.constant 0 : index
      %50 = vector.load %arg10[%c0_33, %c0_34] : memref<128x16xf32, #tpu.memory_space<vmem>>, vector<128x16xf32>
      %cst_35 = arith.constant dense<0.000000e+00> : vector<64x16xf32>
      %51 = tpu.matmul %49, %50, %cst_35 {dimension_numbers = #tpu.dot_dimension_numbers<[1], [0], [0], [1], [0, 0, 1, 1], [], []>} : vector<64x128xf32>, vector<128x16xf32>, vector<64x16xf32> -> vector<64x16xf32>
      %c0_36 = arith.constant 0 : index
      %c0_37 = arith.constant 0 : index
      %52 = vector.load %arg11[%c0_36, %c0_37] : memref<1x16xf32, #tpu.memory_space<vmem>>, vector<1x16xf32>
      %53 = vector.broadcast %52 : vector<1x16xf32> to vector<64x16xf32>
      %54 = arith.addf %51, %53 : vector<64x16xf32>
      %c0_38 = arith.constant 0 : index
      %55 = arith.index_cast %45 : i32 to index
      %c0_39 = arith.constant 0 : index
      %56 = vector.load %arg1[%c0_38, %55, %c0_39] : memref<1x512x16xf32, #tpu.memory_space<vmem>>, vector<1x64x16xf32>
      %57 = vector.shape_cast %56 : vector<1x64x16xf32> to vector<64x16xf32>
      %58 = arith.addf %54, %57 : vector<64x16xf32>
      %c0_40 = arith.constant 0 : index
      %59 = arith.index_cast %45 : i32 to index
      %c0_41 = arith.constant 0 : index
      %60 = vector.load %arg12[%c0_40, %59, %c0_41] : memref<1x512x16xf32, #tpu.memory_space<vmem>>, vector<1x64x16xf32>
      %61 = vector.shape_cast %60 : vector<1x64x16xf32> to vector<64x16xf32>
      %62 = vector.shape_cast %58 : vector<64x16xf32> to vector<1x64x16xf32>
      tpu.vector_store %arg12[%c0_40, %59, %c0_41], %62 {strides = array<i32>} : memref<1x512x16xf32, #tpu.memory_space<vmem>>, vector<1x64x16xf32>,
    }
    %c8_i32_31 = arith.constant 8 : i32
    return
  }
  func.func @transform_0(%arg0: i32) -> (i32, i32, i32) {
    %c0_i32 = arith.constant 0 : i32
    %c0_i32_0 = arith.constant 0 : i32
    %c0_i32_1 = arith.constant 0 : i32
    return %arg0, %c0_i32, %c0_i32_0 : i32, i32, i32
  }
  func.func @transform_1(%arg0: i32) -> (i32, i32) {
    %c0_i32 = arith.constant 0 : i32
    %c0_i32_0 = arith.constant 0 : i32
    %c0_i32_1 = arith.constant 0 : i32
    return %c0_i32, %c0_i32_0 : i32, i32
  }
  func.func @transform_2(%arg0: i32) -> (i32, i32) {
    %c0_i32 = arith.constant 0 : i32
    %c0_i32_0 = arith.constant 0 : i32
    %c0_i32_1 = arith.constant 0 : i32
    return %c0_i32, %c0_i32_0 : i32, i32
  }
  func.func @transform_3(%arg0: i32) -> (i32, i32, i32) {
    %c0_i32 = arith.constant 0 : i32
    %c0_i32_0 = arith.constant 0 : i32
    %c0_i32_1 = arith.constant 0 : i32
    %c0_i32_2 = arith.constant 0 : i32
    return %c0_i32, %c0_i32_0, %c0_i32_1 : i32, i32, i32
  }
  func.func @transform_4(%arg0: i32) -> (i32, i32) {
    %c0_i32 = arith.constant 0 : i32
    %c0_i32_0 = arith.constant 0 : i32
    %c0_i32_1 = arith.constant 0 : i32
    return %c0_i32, %c0_i32_0 : i32, i32
  }
  func.func @transform_5(%arg0: i32) -> (i32, i32) {
    %c0_i32 = arith.constant 0 : i32
    %c0_i32_0 = arith.constant 0 : i32
    %c0_i32_1 = arith.constant 0 : i32
    return %c0_i32, %c0_i32_0 : i32, i32
  }
  func.func @transform_6(%arg0: i32) -> (i32, i32) {
    %c0_i32 = arith.constant 0 : i32
    %c0_i32_0 = arith.constant 0 : i32
    %c0_i32_1 = arith.constant 0 : i32
    return %c0_i32, %c0_i32_0 : i32, i32
  }
  func.func @transform_7(%arg0: i32) -> (i32, i32) {
    %c0_i32 = arith.constant 0 : i32
    %c0_i32_0 = arith.constant 0 : i32
    %c0_i32_1 = arith.constant 0 : i32
    return %c0_i32, %c0_i32_0 : i32, i32
  }
  func.func @transform_8(%arg0: i32) -> (i32, i32) {
    %c0_i32 = arith.constant 0 : i32
    %c0_i32_0 = arith.constant 0 : i32
    %c0_i32_1 = arith.constant 0 : i32
    return %c0_i32, %c0_i32_0 : i32, i32
  }
  func.func @transform_9(%arg0: i32) -> (i32, i32) {
    %c0_i32 = arith.constant 0 : i32
    %c0_i32_0 = arith.constant 0 : i32
    %c0_i32_1 = arith.constant 0 : i32
    return %c0_i32, %c0_i32_0 : i32, i32
  }
  func.func @transform_10(%arg0: i32) -> (i32, i32) {
    %c0_i32 = arith.constant 0 : i32
    %c0_i32_0 = arith.constant 0 : i32
    %c0_i32_1 = arith.constant 0 : i32
    return %c0_i32, %c0_i32_0 : i32, i32
  }
  func.func @transform_11(%arg0: i32) -> (i32, i32, i32) {
    %c0_i32 = arith.constant 0 : i32
    %c0_i32_0 = arith.constant 0 : i32
    %c0_i32_1 = arith.constant 0 : i32
    return %arg0, %c0_i32, %c0_i32_0 : i32, i32, i32
  }
}

</mosaic_0001>

<bundles_post_ra>
// kernel: tpu_custom_call.1
= control target key start
LH: loop header
LB: loop body
LE: loop exit
PB: predicated region body
PF: predicated region fallthrough
CT: control target
= control target key end

     0   :  { %s3323_s17 = smov 0   ;;  %s5013_s0 = inlined_call_operand.vmem [shape: f32[2,512,16], index: 0, kind: input, shape index: {}]   ;;  %s5014_s1 = inlined_call_operand.vmem [shape: f32[16,128], index: 1, kind: input, shape index: {}]   ;;  %s5015_s2 = inlined_call_operand.vmem [shape: f32[1,128], index: 2, kind: input, shape index: {}]   ;;  %s5016_s3 = inlined_call_operand.vmem [shape: f32[27,1,128], index: 3, kind: input, shape index: {}]   ;;  %s5017_s4 = inlined_call_operand.vmem [shape: f32[1,128], index: 4, kind: input, shape index: {}]   ;;  %s5018_s5 = inlined_call_operand.vmem [shape: f32[128,4], index: 5, kind: input, shape index: {}]   ;;  %s5019_s6 = inlined_call_operand.vmem [shape: f32[1,4], index: 6, kind: input, shape index: {}]   ;;  %s5020_s7 = inlined_call_operand.vmem [shape: f32[4,128], index: 7, kind: input, shape index: {}]   ;;  %s5021_s8 = inlined_call_operand.vmem [shape: f32[1,128], index: 8, kind: input, shape index: {}]   ;;  %s5022_s9 = inlined_call_operand.vmem [shape: f32[128,16], index: 9, kind: input, shape index: {}]   ;;  %s5023_s10 = inlined_call_operand.vmem [shape: f32[1,16], index: 10, kind: input, shape index: {}]   ;;  %s5024_s11 = inlined_call_operand.vmem [shape: f32[2,512,16], index: 11, kind: output, shape index: {}]  }
   0x1 LB: > { %s2540_s18 = sadd.s32 4294967295, %s3242_s17   ;;  %p2544_p0 = scmp.ge.s32.totalorder %s3242_s17, 1  ;;  %s3242_s17 = sphi %s3323_s17, %s21_s17  }
   0x2   : > { %p337_p1 = scmp.lt.s32.totalorder %s3242_s17, 3 }
   0x4   : > { %p338_p2 = pnand %p2544_p0, %p337_p1 }
   0x5   : > { %p3331_p3 = scmp.lt.s32.totalorder (!%p338_p2), %s2540_s18, 1  ;;  %v5029_v0 = vmov (!%p338_p2), 0.0   ;;  %s3367_s27 = smov (!%p338_p2), 0  }
   0x6   : > { %341 = sbr.rel (%p338_p2) target bundleno = 1345 (0x541), region = 64  ;;  %387 = vst [vmem:[#allocation2] sm:$0xff] (!%p338_p2), %v5029_v0  ;;  %388 = vst [vmem:[#allocation2 + $0x8] sm:$0xff] (!%p338_p2), %v5029_v0 }
   0x7   : > { %389 = vst [vmem:[#allocation2 + $0x10] sm:$0xff] (!%p338_p2), %v5029_v0  ;;  %390 = vst [vmem:[#allocation2 + $0x18] sm:$0xff] (!%p338_p2), %v5029_v0 }
   0x8   : > { %391 = vst [vmem:[#allocation2 + $0x20] sm:$0xff] (!%p338_p2), %v5029_v0  ;;  %392 = vst [vmem:[#allocation2 + $0x28] sm:$0xff] (!%p338_p2), %v5029_v0 }
   0x9   : > { %393 = vst [vmem:[#allocation2 + $0x30] sm:$0xff] (!%p338_p2), %v5029_v0  ;;  %394 = vst [vmem:[#allocation2 + $0x38] sm:$0xff] (!%p338_p2), %v5029_v0 }
   0xa   : > { %395 = vst [vmem:[#allocation2 + $0x40] sm:$0xff] (!%p338_p2), %v5029_v0  ;;  %396 = vst [vmem:[#allocation2 + $0x48] sm:$0xff] (!%p338_p2), %v5029_v0 }
   0xb   : > { %397 = vst [vmem:[#allocation2 + $0x250] sm:$0xff] (!%p338_p2), %v5029_v0  ;;  %398 = vst [vmem:[#allocation2 + $0x258] sm:$0xff] (!%p338_p2), %v5029_v0 }
   0xc   : > { %399 = vst [vmem:[#allocation2 + $0x260] sm:$0xff] (!%p338_p2), %v5029_v0  ;;  %400 = vst [vmem:[#allocation2 + $0x268] sm:$0xff] (!%p338_p2), %v5029_v0 }
   0xd   : > { %401 = vst [vmem:[#allocation2 + $0x270] sm:$0xff] %v5029_v0  ;;  %402 = vst [vmem:[#allocation2 + $0x278] sm:$0xff] %v5029_v0  ;;  %s5732_s18 = smov (!%p3331_p3, %s2540_s18), 1 }
   0xe   : > { %403 = vst [vmem:[#allocation2 + $0x280] sm:$0xff] %v5029_v0  ;;  %404 = vst [vmem:[#allocation2 + $0x288] sm:$0xff] %v5029_v0  ;;  %s2872_s20 = sshll.u32 %s5732_s18, 9 }
   0xf   : > { %405 = vst [vmem:[#allocation2 + $0x290] sm:$0xff] %v5029_v0  ;;  %406 = vst [vmem:[#allocation2 + $0x298] sm:$0xff] %v5029_v0  ;;  %s3360_s23 = scalar_lea.vmem %s5013_s0, %s2872_s20  ;;  %s3365_s26 = scalar_lea.vmem %s5024_s11, %s2872_s20 }
  0x10 LB: >> { %v423_v1 = vld [vmem:[%s5014_s1] sm:$0xff]  ;;  %v424_v2 = vld [vmem:[%s5014_s1 + $0x8] sm:$0xff]  ;;  %s2549_s13 = sshll.u32 %s3246_s27, 6  ;;  %vm5025_vm0 = vcmask 130048   ;;  %s412_s27 = sadd.s32 1, %s3246_s27   ;;  %s3246_s27 = sphi %s3367_s27, %s412_s27  }
  0x11   : >> { %v3027_v3 = vpack.c.bf16 %v424_v2, %v423_v1  ;;  %s414_s14 = scalar_lea.vmem %s3360_s23, %s2549_s13  ;;  %v2550_v12 = vld [vmem:[%s5015_s2] ss:$0 sm:$0xff]  ;;  %s2407_s18 = scalar_lea.vmem [#allocation2], %s2549_s13 }
  0x12   : >> { %v415_v4 = vld [vmem:[%s414_s14] sm:$0xff]  ;;  %v416_v6 = vld [vmem:[%s414_s14 + $0x8] sm:$0xff]  ;;  %v417_v8 = vld [vmem:[%s414_s14 + $0x10] sm:$0xff]  ;;  %p409_p4 = scmp.ge.s32.totalorder %s412_s27, 8  }
  0x13   : >> { %3028 = vmatprep.subr.bf16.mxu0 %v3027_v3  ;;  %3087 = vmatprep.subr.bf16.mxu1 %v3027_v3  ;;  %v419_v5 = vld [vmem:[%s414_s14 + $0x20] sm:$0xff]  ;;  %v420_v7 = vld [vmem:[%s414_s14 + $0x28] sm:$0xff]  ;;  %v421_v9 = vld [vmem:[%s414_s14 + $0x30] sm:$0xff]  ;;  %s3440_s19 = smov (%p409_p4), 0  }
  0x14   : >> { %3030 = vmatpush3.bf16.msra.mxu0 %v3027_v3  ;;  %3088 = vmatpush3.bf16.msra.mxu1 %v3027_v3  ;;  %v418_v10 = vld [vmem:[%s414_s14 + $0x18] sm:$0xff] }
  0x15   : >> { %2931 = vmatprep.mubr.msk.f32.mxu0 %vm5025_vm0, %v415_v4  ;;  %2937 = vmatprep.mubr.msk.f32.mxu1 %vm5025_vm0, %v419_v5  ;;  %v422_v11 = vld [vmem:[%s414_s14 + $0x38] sm:$0xff] }
  0x17   : >> { %2932 = vmatmul.mubr.msk.f32.vlgmr.msra.gmra.mrb[0].mxu0 %vm5025_vm0, %v416_v6  ;;  %2938 = vmatmul.mubr.msk.f32.vlgmr.msra.gmra.mrb[0].mxu1 %vm5025_vm0, %v420_v7 }
  0x18   : >> { %2934 = vmatprep.mubr.msk.f32.mxu0 %vm5025_vm0, %v417_v8  ;;  %2940 = vmatprep.mubr.msk.f32.mxu1 %vm5025_vm0, %v421_v9 }
  0x1b   : >> { %2935 = vmatmul.mubr.msk.f32.gmra.mrb[2].mxu0 %vm5025_vm0, %v418_v10  ;;  %2941 = vmatmul.mubr.msk.f32.gmra.mrb[2].mxu1 %vm5025_vm0, %v422_v11 }
  0xea   : >> { %v2933_v13 = vpop.f32.mrb[0].mxu0  ;;  %v2939_v14 = vpop.f32.mrb[0].mxu1 }
  0xeb   : >> { %v3393_v15 = vadd.f32 %v2933_v13, %v2550_v12  ;;  %v3395_v16 = vadd.f32 %v2939_v14, %v2550_v12  ;;  %v523_v17 = vpop.f32.mrb[1].mxu0  ;;  %v543_v18 = vpop.f32.mrb[1].mxu1 }
  0xec   : >> { %v3397_v19 = vadd.f32 %v2550_v12, %v523_v17  ;;  %v3399_v20 = vadd.f32 %v2550_v12, %v543_v18 }
  0xed   : >> { %v563_v21 = vand.u32 2147483647, %v3393_v15  ;;  %v567_v22 = vand.u32 2147483647, %v3395_v16  ;;  %vm619_vm1 = vcmp.ge.f32.partialorder %v3393_v15, 0.0  ;;  %vm623_vm2 = vcmp.ge.f32.partialorder %v3395_v16, 0.0 }
  0xee   : >> { %v562_v23 = vand.u32 2147483647, %v3397_v19  ;;  %v566_v24 = vand.u32 2147483647, %v3399_v20  ;;  %v2936_v27 = vpop.f32.mrb[2].mxu0  ;;  %v2942_v28 = vpop.f32.mrb[2].mxu1 }
  0xef   : >> { %v571_v25 = vsub.f32 0.0, %v563_v21  ;;  %v575_v26 = vsub.f32 0.0, %v567_v22  ;;  %v3405_v31 = vadd.f32 %v2936_v27, %v2550_v12  ;;  %v3407_v32 = vadd.f32 %v2942_v28, %v2550_v12  ;;  %v533_v33 = vpop.f32.mrb[3].mxu0  ;;  %v553_v34 = vpop.f32.mrb[3].mxu1 }
  0xf0   : >> { %v570_v29 = vsub.f32 0.0, %v562_v23  ;;  %v574_v30 = vsub.f32 0.0, %v566_v24  ;;  %v3409_v37 = vadd.f32 %v2550_v12, %v533_v33  ;;  %v3411_v38 = vadd.f32 %v2550_v12, %v553_v34 }
  0xf1   : >> { %v580_v35 = vmul.f32 1.442695, %v571_v25  ;;  %v588_v36 = vmul.f32 1.442695, %v575_v26  ;;  %v565_v41 = vand.u32 2147483647, %v3405_v31 }
  0xf2   : >> { %v578_v39 = vmul.f32 1.442695, %v570_v29  ;;  %v586_v40 = vmul.f32 1.442695, %v574_v30  ;;  %v569_v42 = vand.u32 2147483647, %v3407_v32 }
  0xf3   : >> { %3148 = vpow2.f32 %v580_v35  ;;  %v573_v43 = vsub.f32 0.0, %v565_v41  ;;  %v564_v44 = vand.u32 2147483647, %v3409_v37  ;;  %v568_v46 = vand.u32 2147483647, %v3411_v38 }
  0xf4   : >> { %3150 = vpow2.f32 %v588_v36  ;;  %v577_v45 = vsub.f32 0.0, %v569_v42  ;;  %vm618_vm3 = vcmp.ge.f32.partialorder %v3397_v19, 0.0  ;;  %vm622_vm4 = vcmp.ge.f32.partialorder %v3399_v20, 0.0 }
  0xf5   : >> { %3152 = vpow2.f32 %v578_v39  ;;  %v584_v47 = vmul.f32 1.442695, %v573_v43  ;;  %v572_v48 = vsub.f32 0.0, %v564_v44  ;;  %v576_v50 = vsub.f32 0.0, %v568_v46 }
  0xf6   : >> { %3154 = vpow2.f32 %v586_v40  ;;  %v592_v49 = vmul.f32 1.442695, %v577_v45  ;;  %vm621_vm5 = vcmp.ge.f32.partialorder %v3405_v31, 0.0  ;;  %vm625_vm6 = vcmp.ge.f32.partialorder %v3407_v32, 0.0 }
  0xf7   : >> { %3156 = vpow2.f32 %v584_v47  ;;  %v582_v51 = vmul.f32 1.442695, %v572_v48  ;;  %v590_v52 = vmul.f32 1.442695, %v576_v50  ;;  %vm620_vm7 = vcmp.ge.f32.partialorder %v3409_v37, 0.0 }
  0xf8   : >> { %3158 = vpow2.f32 %v592_v49  ;;  %vm624_vm8 = vcmp.ge.f32.partialorder %v3411_v38, 0.0 }
  0xf9   : >> { %3160 = vpow2.f32 %v582_v51 }
  0xfa   : >> { %3162 = vpow2.f32 %v590_v52 }
  0xfd   : >> { %v3149_v53 = vpop.eup %3148 }
  0xfe   : >> { %v3151_v54 = vpop.eup %3150  ;;  %v595_v55 = vadd.f32 1.0, %v3149_v53 }
  0xff   : >> { %v3153_v56 = vpop.eup %3152  ;;  %v599_v57 = vadd.f32 1.0, %v3151_v54 }
 0x100   : >> { %v3155_v58 = vpop.eup %3154  ;;  %3164 = vrcp.f32 %v595_v55  ;;  %v594_v59 = vadd.f32 1.0, %v3153_v56 }
 0x101   : >> { %3166 = vrcp.f32 %v599_v57  ;;  %v598_v60 = vadd.f32 1.0, %v3155_v58  ;;  %v3157_v61 = vpop.eup %3156 }
 0x102   : >> { %3168 = vrcp.f32 %v594_v59  ;;  %v3159_v62 = vpop.eup %3158  ;;  %v597_v63 = vadd.f32 1.0, %v3157_v61 }
 0x103   : >> { %3170 = vrcp.f32 %v598_v60  ;;  %v3161_v1 = vpop.eup %3160  ;;  %v601_v2 = vadd.f32 1.0, %v3159_v62 }
 0x104   : >> { %v3163_v3 = vpop.eup %3162  ;;  %3172 = vrcp.f32 %v597_v63  ;;  %v596_v4 = vadd.f32 1.0, %v3161_v1 }
 0x105   : >> { %3174 = vrcp.f32 %v601_v2  ;;  %v600_v5 = vadd.f32 1.0, %v3163_v3 }
 0x106   : >> { %3176 = vrcp.f32 %v596_v4 }
 0x107   : >> { %3178 = vrcp.f32 %v600_v5 }
 0x10a   : >> { %v3165_v6 = vpop.eup %3164 }
 0x10b   : >> { %v3167_v7 = vpop.eup %3166  ;;  %v627_v8 = vmul.f32 %v3165_v6, %v3149_v53 }
 0x10c   : >> { %v3169_v9 = vpop.eup %3168  ;;  %v631_v10 = vmul.f32 %v3167_v7, %v3151_v54 }
 0x10d   : >> { %v3171_v11 = vpop.eup %3170  ;;  %v635_v12 = vsel %vm619_vm1, %v3165_v6, %v627_v8  ;;  %v626_v13 = vmul.f32 %v3169_v9, %v3153_v56 }
 0x10e   : >> { %v643_v14 = vmul.f32 %v635_v12, %v3393_v15  ;;  %v639_v17 = vsel %vm623_vm2, %v3167_v7, %v631_v10  ;;  %v630_v18 = vmul.f32 %v3171_v11, %v3155_v58  ;;  %v3173_v21 = vpop.eup %3172 }
 0x10f   : >> { %v647_v22 = vmul.f32 %v639_v17, %v3395_v16  ;;  %v634_v23 = vsel %vm618_vm3, %v3169_v9, %v626_v13  ;;  %v3175_v24 = vpop.eup %3174  ;;  %v629_v27 = vmul.f32 %v3173_v21, %v3157_v61 }
 0x110   : >> { %2561 = vst [vmem:[%s2407_s18 + $0x58] sm:$0xff] %v643_v14  ;;  %v642_v25 = vmul.f32 %v634_v23, %v3397_v19  ;;  %v638_v26 = vsel %vm622_vm4, %v3171_v11, %v630_v18  ;;  %v3177_v28 = vpop.eup %3176  ;;  %v633_v29 = vmul.f32 %v3175_v24, %v3159_v62 }
 0x111   : >> { %2565 = vst [vmem:[%s2407_s18 + $0x78] sm:$0xff] %v647_v22  ;;  %v646_v15 = vmul.f32 %v638_v26, %v3399_v20  ;;  %v3179_v30 = vpop.eup %3178  ;;  %v637_v16 = vsel %vm621_vm5, %v3173_v21, %v629_v27  ;;  %v628_v33 = vmul.f32 %v3177_v28, %v3161_v1  ;;  %411 = sbr.rel (!%p409_p4) target bundleno = 16 (0x10), region = 174 }
 0x112   : >> { %2560 = vst [vmem:[%s2407_s18 + $0x50] sm:$0xff] %v642_v25  ;;  %v645_v34 = vmul.f32 %v637_v16, %v3405_v31  ;;  %v641_v35 = vsel %vm625_vm6, %v3175_v24, %v633_v29  ;;  %v632_v19 = vmul.f32 %v3179_v30, %v3163_v3  ;;  %v3438_v31 = vmov (%p409_p4), 0.0  }
 0x113   : >> { %2564 = vst [vmem:[%s2407_s18 + $0x70] sm:$0xff] %v646_v15  ;;  %v649_v36 = vmul.f32 %v641_v35, %v3407_v32  ;;  %v636_v39 = vsel %vm620_vm7, %v3177_v28, %v628_v33 }
 0x114   : >> { %2563 = vst [vmem:[%s2407_s18 + $0x68] sm:$0xff] %v645_v34  ;;  %v644_v20 = vmul.f32 %v636_v39, %v3409_v37  ;;  %v640_v40 = vsel %vm624_vm8, %v3179_v30, %v632_v19 }
 0x115   : >> { %2567 = vst [vmem:[%s2407_s18 + $0x88] sm:$0xff] %v649_v36  ;;  %v648_v41 = vmul.f32 %v640_v40, %v3411_v38 }
 0x116   : >> { %2562 = vst [vmem:[%s2407_s18 + $0x60] sm:$0xff] %v644_v20 }
 0x117   : >> { %2566 = vst [vmem:[%s2407_s18 + $0x80] sm:$0xff] %v648_v41 }
 0x118 LB: >> { %5274 = vst [vmem:[#allocation4_spill] sm:$0xff] %v3250_v31  ;;  %v668_v32 = vlaneseq  ;;  %s3449_s20 = sshll.u32 %s3254_s19, 6  ;;  %v3518_v23 = vld [vmem:[%s5016_s3] ss:$0 sm:$0xff]  ;;  %v5285_v27 = vmov 0  ;;  %v5289_v30 = vmov 0  ;;  %s3254_s19 = sphi %s3440_s19, %s665_s19   ;;  %v3250_v31 = vphi %v3438_v31, %v5720_v31  }
 0x119   : >> { %v677_v38 = vstv %s3449_s20  ;;  %s3511_s21 = scalar_lea.vmem [#allocation2], %s3449_s20  ;;  %v5293_v33 = vmov 0  ;;  %v5296_v34 = vmov 0  ;;  %v5299_v35 = vmov 0  ;;  %s1978_s27 = scalar_lea.vmem [#allocation3], %s3449_s20 }
 0x11a   : >> { %v3451_v37 = vshrl.u32 %v668_v32, 7  ;;  %v5304_v39 = vmov 0  ;;  %v5307_v20 = vmov 0  ;;  %v5310_v40 = vmov 0  ;;  %s665_s19 = sadd.s32 1, %s3254_s19  }
 0x11b   : >> { %v5313_v41 = vmov 0  ;;  %p662_p5 = scmp.ge.s32.totalorder %s665_s19, 8  }
 0x11c   : >> { %5275 = vst [vmem:[#allocation5_spill] sm:$0xff] %v3451_v37  ;;  %v670_v42 = vadd.s32 8, %v3451_v37  ;;  %v671_v43 = vadd.s32 16, %v3451_v37  ;;  %v672_v44 = vadd.s32 24, %v3451_v37  ;;  %v673_v45 = vadd.s32 32, %v3451_v37  ;;  %s4913_s14 = smov (%p662_p5), 0  }
 0x11d   : >> { %v674_v46 = vadd.s32 40, %v3451_v37  ;;  %v675_v47 = vadd.s32 48, %v3451_v37  ;;  %v676_v48 = vadd.s32 56, %v3451_v37  ;;  %v3462_v49 = vadd.s32 %v677_v38, %v3451_v37 }
 0x11e   : >> { %v3464_v50 = vadd.s32 %v677_v38, %v670_v42  ;;  %v3466_v51 = vadd.s32 %v677_v38, %v671_v43  ;;  %v3468_v52 = vadd.s32 %v677_v38, %v672_v44  ;;  %v3470_v53 = vadd.s32 %v677_v38, %v673_v45  ;;  %v2570_v22 = vld [vmem:[%s3511_s21 + $0x7] sm:$0xff]  ;;  %v3521_v24 = vld [vmem:[%s3511_s21 + $0xf] sm:$0xff]  ;;  %v3524_v25 = vld [vmem:[%s3511_s21 + $0x17] sm:$0xff] }
 0x11f   : >> { %v3472_v54 = vadd.s32 %v677_v38, %v674_v46  ;;  %v3474_v55 = vadd.s32 %v677_v38, %v675_v47  ;;  %v3476_v56 = vadd.s32 %v677_v38, %v676_v48  ;;  %v5043_v57 = vand.u32 7, %v3462_v49  ;;  %v3531_v26 = vld [vmem:[%s3511_s21 + $0x1f] sm:$0xff]  ;;  %v2580_v28 = vld [vmem:[%s3511_s21 + $0x8] sm:$0xff]  ;;  %v3544_v15 = vld [vmem:[%s3511_s21 + $0x10] sm:$0xff] }
 0x120   : >> { %v5042_v58 = vand.u32 7, %v3464_v50  ;;  %v5039_v59 = vand.u32 7, %v3466_v51  ;;  %v5038_v60 = vand.u32 7, %v3468_v52  ;;  %v5037_v61 = vand.u32 7, %v3470_v53  ;;  %5284 = vst [vmem:[#allocation14_spill] sm:$0xff] %v3531_v26  ;;  %5287 = vst [vmem:[#allocation15_spill] sm:$0xff] %v3544_v15 }
 0x121   : >> { %v5036_v62 = vand.u32 7, %v3472_v54  ;;  %v5033_v63 = vand.u32 7, %v3474_v55  ;;  %v5032_v1 = vand.u32 7, %v3476_v56  ;;  %v694_v2 = vshra.s32 %v3462_v49, 3  ;;  %v3547_v29 = vld [vmem:[%s3511_s21 + $0x27] sm:$0xff]  ;;  %v3582_v19 = vld [vmem:[%s3511_s21 + $0x18] sm:$0xff] }
 0x122   : >> { %v695_v3 = vshra.s32 %v3464_v50, 3  ;;  %v696_v4 = vshra.s32 %v3466_v51, 3  ;;  %v697_v5 = vshra.s32 %v3468_v52, 3  ;;  %v698_v6 = vshra.s32 %v3470_v53, 3  ;;  %5288 = vst [vmem:[#allocation16_spill] sm:$0xff] %v3547_v29  ;;  %5302 = vst [vmem:[#allocation20_spill] sm:$0xff] %v3582_v19 }
 0x123   : >> { %v699_v7 = vshra.s32 %v3472_v54, 3  ;;  %v700_v8 = vshra.s32 %v3474_v55, 3  ;;  %v701_v9 = vshra.s32 %v3476_v56, 3  ;;  %v3494_v10 = vand.u32 7, %v694_v2  ;;  %v3585_v36 = vld [vmem:[%s3511_s21 + $0x20] sm:$0xff]  ;;  %v3616_v38 = vld [vmem:[%s3511_s21 + $0x28] sm:$0xff] }
 0x124   : >> { %v3496_v11 = vand.u32 7, %v695_v3  ;;  %v3498_v12 = vand.u32 7, %v696_v4  ;;  %v3500_v13 = vand.u32 7, %v697_v5  ;;  %v3502_v14 = vand.u32 7, %v698_v6  ;;  %5303 = vst [vmem:[#allocation21_spill] sm:$0xff] %v3585_v36  ;;  %5316 = vst [vmem:[#allocation26_spill] sm:$0xff] %v3616_v38 }
 0x125   : >> { %5276 = vst [vmem:[#allocation6_spill] sm:$0xff] %v3494_v10  ;;  %v3504_v17 = vand.u32 7, %v699_v7  ;;  %v3506_v18 = vand.u32 7, %v700_v8  ;;  %v3508_v21 = vand.u32 7, %v701_v9  ;;  %vm5027_vm9 = vcmp.ge.s32.totalorder %v3494_v10, 1  ;;  %v3619_v42 = vld [vmem:[%s3511_s21 + $0x30] sm:$0xff] }
 0x126   : >> { %5277 = vst [vmem:[#allocation7_spill] sm:$0xff] %v3496_v11  ;;  %5278 = vst [vmem:[#allocation8_spill] sm:$0xff] %v3498_v12  ;;  %vm5026_vm10 = vcmp.ge.s32.totalorder %v3496_v11, 1  ;;  %vm5031_vm11 = vcmp.ge.s32.totalorder %v3498_v12, 1  ;;  %vm5028_vm12 = vcmp.ge.s32.totalorder %v3500_v13, 1  ;;  %vm3538_vm2 = vcmp.ge.s32.totalorder %v5043_v57, 1 }
 0x127   : >> { %5279 = vst [vmem:[#allocation9_spill] sm:$0xff] %v3500_v13  ;;  %5280 = vst [vmem:[#allocation10_spill] sm:$0xff] %v3502_v14  ;;  %v5286_v27 = vsel %vm3538_vm2, 4294967295, %v5285_v27  ;;  %vm3551_vm3 = vcmp.ge.s32.totalorder %v5042_v58, 1  ;;  %vm3557_vm4 = vcmp.ge.s32.totalorder %v5039_v59, 1  ;;  %vm3563_vm5 = vcmp.ge.s32.totalorder %v5038_v60, 1 }
 0x128   : >> { %5281 = vst [vmem:[#allocation11_spill] sm:$0xff] %v3504_v17  ;;  %5282 = vst [vmem:[#allocation12_spill] sm:$0xff] %v3506_v18  ;;  %v5290_v30 = vsel %vm3551_vm3, 4294967295, %v5289_v30  ;;  %v5294_v33 = vsel %vm3563_vm5, 4294967295, %v5293_v33  ;;  %vm3569_vm6 = vcmp.ge.s32.totalorder %v5037_v61, 1  ;;  %vm3589_vm8 = vcmp.ge.s32.totalorder %v5036_v62, 1 }
 0x129   : >> { %5283 = vst [vmem:[#allocation13_spill] sm:$0xff] %v3508_v21  ;;  %5295 = vst [vmem:[#allocation17_spill] sm:$0xff] %v5294_v33  ;;  %v5297_v34 = vsel %vm3569_vm6, 4294967295, %v5296_v34  ;;  %v5305_v39 = vsel %vm3589_vm8, 4294967295, %v5304_v39  ;;  %vm3595_vm0 = vcmp.ge.s32.totalorder %v5033_v63, 1  ;;  %vm3601_vm1 = vcmp.ge.s32.totalorder %v5032_v1, 1 }
 0x12a   : >> { %5298 = vst [vmem:[#allocation18_spill] sm:$0xff] %v5297_v34  ;;  %vm3577_vm7 = vmand %vm5027_vm9, %vm3538_vm2  ;;  %v5308_v20 = vsel %vm3595_vm0, 4294967295, %v5307_v20  ;;  %v5311_v40 = vsel %vm3601_vm1, 4294967295, %v5310_v40  ;;  %v5318_v43 = vmov 0  ;;  %v3634_v46 = vld [vmem:[%s3511_s21 + $0x38] sm:$0xff]  ;;  %v3637_v47 = vld [vmem:[%s3511_s21 + $0x40] sm:$0xff] }
 0x12b   : >> { %v5300_v35 = vsel %vm3577_vm7, 4294967295, %v5299_v35  ;;  %5306 = vst [vmem:[#allocation22_spill] sm:$0xff] %v5305_v39  ;;  %5309 = vst [vmem:[#allocation23_spill] sm:$0xff] %v5308_v20  ;;  %v744_v32 = vsel %vm3577_vm7, %v2570_v22, 0.0  ;;  %v777_v48 = vsel %vm5027_vm9, %v2580_v28, 0.0  ;;  %v778_v2 = vsel %vm5026_vm10, %v3544_v15, 0.0 }
 0x12c   : >> { %5301 = vst [vmem:[#allocation19_spill] sm:$0xff] %v5300_v35  ;;  %5312 = vst [vmem:[#allocation24_spill] sm:$0xff] %v5311_v40  ;;  %v759_v45 = vmul.f32 %v3518_v23, %v744_v32  ;;  %v3645_v3 = vld [vmem:[%s3511_s21 + $0x2f] sm:$0xff]  ;;  %v5324_v4 = vmov 0  ;;  %v779_v7 = vsel %vm5031_vm11, %v3582_v19, 0.0  ;;  %v780_v8 = vsel %vm5028_vm12, %v3585_v36, 0.0 }
 0x12d   : >> { %vm3609_vm15 = vmand %vm5026_vm10, %vm3551_vm3  ;;  %5317 = vst [vmem:[#allocation27_spill] sm:$0xff] %v3619_v42  ;;  %v2589_v9 = vld [vmem:[%s5016_s3 + $0x1] ss:$0 sm:$0xff]  ;;  %v3669_v22 = vld [vmem:[%s3511_s21 + $0x37] sm:$0xff]  ;;  %vm5328_vm10 = vcmp.ge.s32.totalorder %v3502_v14, 1  ;;  %v5329_v28 = vmov 0 }
 0x12e   : >> { %v5314_v41 = vsel %vm3609_vm15, 4294967295, %v5313_v41  ;;  %vm3625_vm14 = vmand %vm5031_vm11, %vm3557_vm4  ;;  %v745_v44 = vsel %vm3609_vm15, %v3521_v24, 0.0  ;;  %5321 = vst [vmem:[#allocation29_spill] sm:$0xff] %v3634_v46  ;;  %vm5333_vm11 = vcmp.ge.s32.totalorder %v3504_v17, 1  ;;  %v3690_v63 = vld [vmem:[%s3511_s21 + $0x3f] sm:$0xff]  ;;  %v5336_v62 = vmov 0 }
 0x12f   : >> { %5315 = vst [vmem:[#allocation25_spill] sm:$0xff] %v5314_v41  ;;  %v5319_v43 = vsel %vm3625_vm14, 4294967295, %v5318_v43  ;;  %5322 = vst [vmem:[#allocation30_spill] sm:$0xff] %v3637_v47  ;;  %v746_v5 = vsel %vm3625_vm14, %v3524_v25, 0.0  ;;  %v760_v6 = vmul.f32 %v3518_v23, %v745_v44  ;;  %v782_v1 = vsel %vm5333_vm11, %v3619_v42, 0.0 }
 0x130   : >> { %5320 = vst [vmem:[#allocation28_spill] sm:$0xff] %v5319_v43  ;;  %5323 = vst [vmem:[#allocation31_spill] sm:$0xff] %v3645_v3  ;;  %v761_v44 = vmul.f32 %v3518_v23, %v746_v5  ;;  %v5342_v58 = vmov 0  ;;  %v793_v37 = vmul.f32 %v2589_v9, %v777_v48  ;;  %v794_v31 = vmul.f32 %v2589_v9, %v778_v2 }
 0x131   : >> { %vm3651_vm13 = vmand %vm5028_vm12, %vm3563_vm5  ;;  %5327 = vst [vmem:[#allocation33_spill] sm:$0xff] %v3669_v22  ;;  %v795_v43 = vmul.f32 %v2589_v9, %v779_v7  ;;  %v796_v41 = vmul.f32 %v2589_v9, %v780_v8  ;;  %v798_v35 = vmul.f32 %v2589_v9, %v782_v1  ;;  %v5350_v1 = vmov 0 }
 0x132   : >> { %v5325_v4 = vsel %vm3651_vm13, 4294967295, %v5324_v4  ;;  %vm3675_vm9 = vmand %vm5328_vm10, %vm3569_vm6  ;;  %v747_v32 = vsel %vm3651_vm13, %v3531_v26, 0.0  ;;  %5334 = vst [vmem:[#allocation35_spill] sm:$0xff] %v3690_v63  ;;  %v801_v42 = vadd.f32 %v793_v37, %v759_v45  ;;  %v3755_v37 = vld [vmem:[%s3511_s21 + $0x19] sm:$0xff]  ;;  %v5380_v45 = vmov 0 }
 0x133   : >> { %5326 = vst [vmem:[#allocation32_spill] sm:$0xff] %v5325_v4  ;;  %v5330_v28 = vsel %vm3675_vm9, 4294967295, %v5329_v28  ;;  %vm5332_vm12 = vmmov %vm5328_vm10  ;;  %v748_v5 = vsel %vm3675_vm9, %v3547_v29, 0.0  ;;  %v762_v61 = vmul.f32 %v3518_v23, %v747_v32  ;;  %v803_v36 = vadd.f32 %v795_v43, %v761_v44 }
 0x134   : >> { %5331 = vst [vmem:[#allocation34_spill] sm:$0xff] %v5330_v28  ;;  %v781_v0 = vsel %vm5332_vm12, %v3616_v38, 0.0  ;;  %vm5335_vm10 = vmmov %vm5333_vm11  ;;  %vm5339_vm12 = vcmp.ge.s32.totalorder %v3506_v18, 1  ;;  %vm5340_vm11 = vcmp.ge.s32.totalorder %v3508_v21, 1  ;;  %v763_v57 = vmul.f32 %v3518_v23, %v748_v5 }
 0x135   : >> { %vm3696_vm14 = vmand %vm5335_vm10, %vm3589_vm8  ;;  %v783_v60 = vsel %vm5339_vm12, %v3634_v46, 0.0  ;;  %v784_v59 = vsel %vm5340_vm11, %v3637_v47, 0.0  ;;  %v5346_v28 = vmov 0  ;;  %v797_v5 = vmul.f32 %v2589_v9, %v781_v0 }
 0x136   : >> { %v5337_v62 = vsel %vm3696_vm14, 4294967295, %v5336_v62  ;;  %vm5341_vm10 = vmmov %vm5339_vm12  ;;  %v749_v32 = vsel %vm3696_vm14, %v3645_v3, 0.0  ;;  %v799_v46 = vmul.f32 %v2589_v9, %v783_v60  ;;  %v802_v38 = vadd.f32 %v794_v31, %v760_v6  ;;  %v2600_v31 = vld [vmem:[%s5016_s3 + $0x2] ss:$0 sm:$0xff] }
 0x137   : >> { %5338 = vst [vmem:[#allocation36_spill] sm:$0xff] %v5337_v62  ;;  %vm3714_vm13 = vmand %vm5341_vm10, %vm3595_vm0  ;;  %v764_v62 = vmul.f32 %v3518_v23, %v749_v32  ;;  %v804_v7 = vadd.f32 %v796_v41, %v762_v61  ;;  %v805_v8 = vadd.f32 %v797_v5, %v763_v57  ;;  %v2591_v32 = vld [vmem:[%s3511_s21 + $0x9] sm:$0xff]  ;;  %v5349_v0 = vand.u32 7, %v3462_v49 }
 0x138   : >> { %v5343_v58 = vsel %vm3714_vm13, 4294967295, %v5342_v58  ;;  %vm5345_vm12 = vmmov %vm5340_vm11  ;;  %v750_v4 = vsel %vm3714_vm13, %v3669_v22, 0.0  ;;  %v5352_v57 = vand.u32 7, %v3464_v50  ;;  %v5356_v49 = vmov 0 }
 0x139   : >> { %5344 = vst [vmem:[#allocation37_spill] sm:$0xff] %v5343_v58  ;;  %vm3726_vm11 = vmand %vm5345_vm12, %vm3601_vm1  ;;  %v765_v2 = vmul.f32 %v3518_v23, %v750_v4  ;;  %v800_v58 = vmul.f32 %v2589_v9, %v784_v59  ;;  %v806_v19 = vadd.f32 %v798_v35, %v764_v62  ;;  %v3743_v4 = vld [vmem:[%s3511_s21 + $0x11] sm:$0xff]  ;;  %vm3747_vm10 = vcmp.lt.s32.totalorder %v5349_v0, 7 }
 0x13a   : >> { %v5347_v28 = vsel %vm3726_vm11, 4294967295, %v5346_v28  ;;  %v751_v48 = vsel %vm3726_vm11, %v3690_v63, 0.0  ;;  %v5351_v1 = vsel %vm3747_vm10, 4294967295, %v5350_v1  ;;  %vm3759_vm12 = vcmp.lt.s32.totalorder %v5352_v57, 7  ;;  %v3861_v57 = vld [vmem:[%s3511_s21 + $0x39] sm:$0xff] }
 0x13b   : >> { %5348 = vst [vmem:[#allocation38_spill] sm:$0xff] %v5347_v28  ;;  %v766_v47 = vmul.f32 %v3518_v23, %v751_v48  ;;  %v807_v28 = vadd.f32 %v799_v46, %v765_v2  ;;  %v5355_v59 = vand.u32 7, %v3466_v51  ;;  %v5359_v60 = vand.u32 7, %v3468_v52  ;;  %v3790_v52 = vld [vmem:[%s3511_s21 + $0x21] sm:$0xff]  ;;  %v3821_v46 = vld [vmem:[%s3511_s21 + $0x29] sm:$0xff]  ;;  %v3841_v48 = vld [vmem:[%s3511_s21 + $0x31] sm:$0xff] }
 0x13c   : >> { %v5360_v61 = vmov 0  ;;  %v5363_v62 = vand.u32 7, %v3470_v53  ;;  %v5364_v50 = vmov 0  ;;  %vm5367_vm9 = vcmp.ge.s32.totalorder %v3494_v10, 1  ;;  %5391 = vst [vmem:[#allocation48_spill] sm:$0xff] %v3841_v48  ;;  %5396 = vst [vmem:[#allocation50_spill] sm:$0xff] %v3861_v57 }
 0x13d   : >> { %v3740_v15 = vadd.f32 %v800_v58, %v766_v47  ;;  %v5353_v58 = vmov 0  ;;  %vm3765_vm11 = vcmp.lt.s32.totalorder %v5355_v59, 7  ;;  %vm3771_vm13 = vcmp.lt.s32.totalorder %v5359_v60, 7  ;;  %vm3785_vm15 = vmand %vm5367_vm9, %vm3747_vm10 }
 0x13e   : >> { %v5354_v58 = vsel %vm3759_vm12, 4294967295, %v5353_v58  ;;  %v5357_v49 = vsel %vm3765_vm11, 4294967295, %v5356_v49  ;;  %v5361_v61 = vsel %vm3771_vm13, 4294967295, %v5360_v61  ;;  %vm3777_vm14 = vcmp.lt.s32.totalorder %v5363_v62, 7 }
 0x13f   : >> { %5358 = vst [vmem:[#allocation39_spill] sm:$0xff] %v5357_v49  ;;  %5362 = vst [vmem:[#allocation40_spill] sm:$0xff] %v5361_v61  ;;  %v5365_v50 = vsel %vm3777_vm14, 4294967295, %v5364_v50  ;;  %v5368_v51 = vmov 0  ;;  %v5371_v23 = vand.u32 7, %v3472_v54  ;;  %v5372_v35 = vmov 0 }
 0x140   : >> { %5366 = vst [vmem:[#allocation41_spill] sm:$0xff] %v5365_v50  ;;  %v5369_v51 = vsel %vm3785_vm15, 4294967295, %v5368_v51  ;;  %v5375_v53 = vand.u32 7, %v3474_v55  ;;  %v5376_v41 = vmov 0  ;;  %v5379_v43 = vand.u32 7, %v3476_v56 }
 0x141   : >> { %5370 = vst [vmem:[#allocation42_spill] sm:$0xff] %v5369_v51  ;;  %vm3794_vm7 = vcmp.lt.s32.totalorder %v5371_v23, 7  ;;  %vm5383_vm10 = vcmp.ge.s32.totalorder %v3496_v11, 1  ;;  %v5384_v54 = vmov 0  ;;  %v835_v55 = vsel %vm3785_vm15, %v2591_v32, 0.0 }
 0x142   : >> { %v5373_v35 = vsel %vm3794_vm7, 4294967295, %v5372_v35  ;;  %vm3800_vm1 = vcmp.lt.s32.totalorder %v5375_v53, 7  ;;  %vm3806_vm9 = vcmp.lt.s32.totalorder %v5379_v43, 7  ;;  %vm3814_vm0 = vmand %vm5383_vm10, %vm3759_vm12  ;;  %v5388_v56 = vmov 0  ;;  %v3875_v53 = vld [vmem:[%s3511_s21 + $0x47] sm:$0xff] }
 0x143   : >> { %5374 = vst [vmem:[#allocation43_spill] sm:$0xff] %v5373_v35  ;;  %v5377_v41 = vsel %vm3800_vm1, 4294967295, %v5376_v41  ;;  %v5381_v45 = vsel %vm3806_vm9, 4294967295, %v5380_v45  ;;  %v5385_v54 = vsel %vm3814_vm0, 4294967295, %v5384_v54  ;;  %vm5387_vm1 = vcmp.ge.s32.totalorder %v3498_v12, 1  ;;  %5401 = vst [vmem:[#allocation52_spill] sm:$0xff] %v3875_v53 }
 0x144   : >> { %5378 = vst [vmem:[#allocation44_spill] sm:$0xff] %v5377_v41  ;;  %5382 = vst [vmem:[#allocation45_spill] sm:$0xff] %v5381_v45  ;;  %v836_v47 = vsel %vm3814_vm0, %v3743_v4, 0.0  ;;  %v851_v6 = vmul.f32 %v2600_v31, %v835_v55  ;;  %v877_v9 = vsel %vm3538_vm2, %v3521_v24, 0.0  ;;  %v878_v44 = vsel %vm3551_vm3, %v3524_v25, 0.0  ;;  %v3881_v55 = vld [vmem:[%s3511_s21 + $0x41] sm:$0xff] }
 0x145   : >> { %5386 = vst [vmem:[#allocation46_spill] sm:$0xff] %v5385_v54  ;;  %vm3827_vm8 = vmand %vm5387_vm1, %vm3765_vm11  ;;  %vm5392_vm1 = vcmp.ge.s32.totalorder %v3500_v13, 1  ;;  %v5393_v2 = vmov 0  ;;  %v852_v32 = vmul.f32 %v2600_v31, %v836_v47  ;;  %v879_v24 = vsel %vm3557_vm4, %v3531_v26, 0.0 }
 0x146   : >> { %v5389_v56 = vsel %vm3827_vm8, 4294967295, %v5388_v56  ;;  %vm3847_vm10 = vmand %vm5392_vm1, %vm3771_vm13  ;;  %v837_v5 = vsel %vm3827_vm8, %v3755_v37, 0.0  ;;  %v880_v0 = vsel %vm3563_vm5, %v3547_v29, 0.0  ;;  %vm5397_vm1 = vcmp.ge.s32.totalorder %v3502_v14, 1  ;;  %5402 = vst [vmem:[#allocation53_spill] sm:$0xff] %v3881_v55 }
 0x147   : >> { %5390 = vst [vmem:[#allocation47_spill] sm:$0xff] %v5389_v56  ;;  %v5394_v2 = vsel %vm3847_vm10, 4294967295, %v5393_v2  ;;  %vm3867_vm0 = vmand %vm5397_vm1, %vm3777_vm14  ;;  %v5398_v59 = vmov 0  ;;  %v838_v60 = vsel %vm3847_vm10, %v3790_v52, 0.0  ;;  %v853_v62 = vmul.f32 %v2600_v31, %v837_v5  ;;  %v2611_v56 = vld [vmem:[%s5016_s3 + $0x3] ss:$0 sm:$0xff] }
 0x148   : >> { %5395 = vst [vmem:[#allocation49_spill] sm:$0xff] %v5394_v2  ;;  %v5399_v59 = vsel %vm3867_vm0, 4294967295, %v5398_v59  ;;  %v859_v23 = vadd.f32 %v851_v6, %v801_v42  ;;  %v881_v43 = vsel %vm3569_vm6, %v3645_v3, 0.0  ;;  %vm5403_vm1 = vcmp.ge.s32.totalorder %v3504_v17, 1 }
 0x149   : >> { %5400 = vst [vmem:[#allocation51_spill] sm:$0xff] %v5399_v59  ;;  %vm3887_vm8 = vmand %vm5403_vm1, %vm3794_vm7  ;;  %v5404_v47 = vmov 0  ;;  %v839_v42 = vsel %vm3867_vm0, %v3821_v46, 0.0  ;;  %v854_v6 = vmul.f32 %v2600_v31, %v838_v60  ;;  %v860_v5 = vadd.f32 %v852_v32, %v802_v38 }
 0x14a   : >> { %v5405_v47 = vsel %vm3887_vm8, 4294967295, %v5404_v47  ;;  %vm5407_vm10 = vnez %v5305_v39  ;;  %vm5408_vm15 = vnez %v5377_v41  ;;  %vm5409_vm1 = vcmp.ge.s32.totalorder %v3506_v18, 1 }
 0x14b   : >> { %5406 = vst [vmem:[#allocation54_spill] sm:$0xff] %v5405_v47  ;;  %v882_v2 = vsel %vm5407_vm10, %v3669_v22, 0.0  ;;  %vm3904_vm6 = vmand %vm5409_vm1, %vm5408_vm15  ;;  %v5410_v54 = vmov 0  ;;  %v840_v38 = vsel %vm3887_vm8, %v3841_v48, 0.0  ;;  %v855_v32 = vmul.f32 %v2600_v31, %v839_v42 }
 0x14c   : >> { %v5411_v54 = vsel %vm3904_vm6, 4294967295, %v5410_v54  ;;  %v861_v60 = vadd.f32 %v853_v62, %v803_v36  ;;  %vm5413_vm0 = vnez %v5308_v20  ;;  %vm5414_vm10 = vcmp.ge.s32.totalorder %v3508_v21, 1 }
 0x14d   : >> { %5412 = vst [vmem:[#allocation55_spill] sm:$0xff] %v5411_v54  ;;  %v883_v59 = vsel %vm5413_vm0, %v3690_v63, 0.0  ;;  %vm3918_vm5 = vmand %vm5414_vm10, %vm3806_vm9  ;;  %v5415_v51 = vmov 0  ;;  %v841_v22 = vsel %vm3904_vm6, %v3861_v57, 0.0  ;;  %v856_v47 = vmul.f32 %v2600_v31, %v840_v38 }
 0x14e   : >> { %v5416_v51 = vsel %vm3918_vm5, 4294967295, %v5415_v51  ;;  %v862_v39 = vadd.f32 %v854_v6, %v804_v7  ;;  %vm5418_vm1 = vnez %v5311_v40  ;;  %v842_v62 = vsel %vm3918_vm5, %v3881_v55, 0.0  ;;  %v2622_v6 = vld [vmem:[%s5016_s3 + $0x4] ss:$0 sm:$0xff] }
 0x14f   : >> { %5417 = vst [vmem:[#allocation56_spill] sm:$0xff] %v5416_v51  ;;  %v884_v36 = vsel %vm5418_vm1, %v3875_v53, 0.0  ;;  %v857_v42 = vmul.f32 %v2600_v31, %v841_v22  ;;  %v863_v63 = vadd.f32 %v855_v32, %v805_v8  ;;  %v893_v20 = vmul.f32 %v2611_v56, %v877_v9 }
 0x150   : >> { %v858_v3 = vmul.f32 %v2600_v31, %v842_v62  ;;  %v864_v34 = vadd.f32 %v856_v47, %v806_v19  ;;  %v894_v29 = vmul.f32 %v2611_v56, %v878_v44  ;;  %v895_v33 = vmul.f32 %v2611_v56, %v879_v24  ;;  %v3936_v47 = vld [vmem:[%s3511_s21 + $0x48] sm:$0xff] }
 0x151   : >> { %v865_v54 = vadd.f32 %v857_v42, %v807_v28  ;;  %v896_v26 = vmul.f32 %v2611_v56, %v880_v0  ;;  %v897_v38 = vmul.f32 %v2611_v56, %v881_v43  ;;  %v898_v7 = vmul.f32 %v2611_v56, %v882_v2  ;;  %v5419_v2 = vld [vmem:[#allocation15_spill] sm:$0xff]  ;;  %v5420_v43 = vld [vmem:[#allocation20_spill] sm:$0xff]  ;;  %v5421_v62 = vld [vmem:[#allocation21_spill] sm:$0xff] }
 0x152   : >> { %v866_v53 = vadd.f32 %v858_v3, %v3740_v15  ;;  %v899_v51 = vmul.f32 %v2611_v56, %v883_v59  ;;  %v900_v40 = vmul.f32 %v2611_v56, %v884_v36  ;;  %v901_v22 = vadd.f32 %v893_v20, %v859_v23  ;;  %v5422_v15 = vld [vmem:[#allocation26_spill] sm:$0xff]  ;;  %v5423_v56 = vld [vmem:[#allocation27_spill] sm:$0xff] }
 0x153   : >> { %v902_v8 = vadd.f32 %v894_v29, %v860_v5  ;;  %v903_v9 = vadd.f32 %v895_v33, %v861_v60  ;;  %v904_v31 = vadd.f32 %v896_v26, %v862_v39  ;;  %v905_v19 = vadd.f32 %v897_v38, %v863_v63  ;;  %v5424_v29 = vld [vmem:[#allocation29_spill] sm:$0xff]  ;;  %v5425_v26 = vld [vmem:[#allocation30_spill] sm:$0xff] }
 0x154   : >> { %v906_v44 = vadd.f32 %v898_v7, %v864_v34  ;;  %v907_v28 = vadd.f32 %v899_v51, %v865_v54  ;;  %v908_v24 = vadd.f32 %v900_v40, %v866_v53  ;;  %v927_v0 = vmul.f32 %v2622_v6, %v5419_v2  ;;  %v3947_v23 = vld [vmem:[%s3511_s21 + $0x49] sm:$0xff]  ;;  %v2633_v53 = vld [vmem:[%s5016_s3 + $0x5] ss:$0 sm:$0xff] }
 0x155   : >> { %v928_v32 = vmul.f32 %v2622_v6, %v5420_v43  ;;  %v929_v42 = vmul.f32 %v2622_v6, %v5421_v62  ;;  %v930_v3 = vmul.f32 %v2622_v6, %v5422_v15  ;;  %v931_v20 = vmul.f32 %v2622_v6, %v5423_v56 }
 0x156   : >> { %v932_v33 = vmul.f32 %v2622_v6, %v5424_v29  ;;  %v933_v63 = vmul.f32 %v2622_v6, %v5425_v26  ;;  %v934_v39 = vmul.f32 %v2622_v6, %v3936_v47  ;;  %v935_v34 = vadd.f32 %v927_v0, %v901_v22 }
 0x157   : >> { %v936_v59 = vadd.f32 %v928_v32, %v902_v8  ;;  %v937_v51 = vadd.f32 %v929_v42, %v903_v9  ;;  %v938_v40 = vadd.f32 %v930_v3, %v904_v31  ;;  %v939_v54 = vadd.f32 %v931_v20, %v905_v19 }
 0x158   : >> { %v940_v5 = vadd.f32 %v932_v33, %v906_v44  ;;  %v941_v60 = vadd.f32 %v933_v63, %v907_v28  ;;  %v942_v36 = vadd.f32 %v934_v39, %v908_v24  ;;  %vm5426_vm10 = vnez %v5351_v1 }
 0x159   : >> { %v953_v38 = vsel %vm5426_vm10, %v3743_v4, 0.0  ;;  %v954_v7 = vsel %vm3759_vm12, %v3755_v37, 0.0  ;;  %v955_v6 = vsel %vm3765_vm11, %v3790_v52, 0.0  ;;  %v956_v22 = vsel %vm3771_vm13, %v3821_v46, 0.0 }
 0x15a   : >> { %v957_v8 = vsel %vm3777_vm14, %v3841_v48, 0.0  ;;  %v958_v4 = vsel %vm3794_vm7, %v3861_v57, 0.0  ;;  %v959_v9 = vsel %vm5408_vm15, %v3881_v55, 0.0  ;;  %v960_v31 = vsel %vm3806_vm9, %v3947_v23, 0.0 }
 0x15b   : >> { %v969_v19 = vmul.f32 %v2633_v53, %v953_v38  ;;  %v970_v44 = vmul.f32 %v2633_v53, %v954_v7  ;;  %v971_v28 = vmul.f32 %v2633_v53, %v955_v6  ;;  %v972_v24 = vmul.f32 %v2633_v53, %v956_v22  ;;  %v2644_v38 = vld [vmem:[%s5016_s3 + $0x6] ss:$0 sm:$0xff] }
 0x15c   : >> { %v973_v2 = vmul.f32 %v2633_v53, %v957_v8  ;;  %v974_v0 = vmul.f32 %v2633_v53, %v958_v4  ;;  %v975_v32 = vmul.f32 %v2633_v53, %v959_v9  ;;  %v976_v42 = vmul.f32 %v2633_v53, %v960_v31  ;;  %v5445_v6 = vld [vmem:[#allocation16_spill] sm:$0xff]  ;;  %v5448_v4 = vld [vmem:[#allocation18_spill] sm:$0xff]  ;;  %v5454_v31 = vld [vmem:[#allocation31_spill] sm:$0xff] }
 0x15d   : >> { %v977_v3 = vadd.f32 %v969_v19, %v935_v34  ;;  %v978_v20 = vadd.f32 %v970_v44, %v936_v59  ;;  %v979_v33 = vadd.f32 %v971_v28, %v937_v51  ;;  %v980_v63 = vadd.f32 %v972_v24, %v938_v40  ;;  %v5456_v28 = vld [vmem:[#allocation22_spill] sm:$0xff] }
 0x15e   : >> { %v981_v39 = vadd.f32 %v973_v2, %v939_v54  ;;  %v982_v57 = vadd.f32 %v974_v0, %v940_v5  ;;  %v983_v48 = vadd.f32 %v975_v32, %v941_v60  ;;  %v984_v55 = vadd.f32 %v976_v42, %v942_v36  ;;  %v5438_v54 = vld [vmem:[#allocation14_spill] sm:$0xff]  ;;  %v5439_v36 = vld [vmem:[#allocation17_spill] sm:$0xff] }
 0x15f   : >> { %vm5160_vm5 = vcmp.lt.s32.totalorder %v3494_v10, 7  ;;  %v5427_v34 = vmov 0  ;;  %vm5430_vm9 = vcmp.lt.s32.totalorder %v3496_v11, 7  ;;  %v5431_v59 = vmov 0  ;;  %v5462_v2 = vld [vmem:[#allocation33_spill] sm:$0xff] }
 0x160   : >> { %vm3988_vm7 = vmand %vm5160_vm5, %vm3538_vm2  ;;  %vm5434_vm14 = vcmp.lt.s32.totalorder %v3498_v12, 7  ;;  %v5435_v40 = vmov 0  ;;  %v1053_v60 = vsel %vm5160_vm5, %v5420_v43, 0.0  ;;  %vm5440_vm6 = vnez %v5439_v36 }
 0x161   : >> { %v5428_v34 = vsel %vm3988_vm7, 4294967295, %v5427_v34  ;;  %vm3999_vm8 = vmand %vm5430_vm9, %vm3551_vm3  ;;  %v1011_v51 = vsel %vm3988_vm7, %v3524_v25, 0.0  ;;  %v1054_v25 = vsel %vm5430_vm9, %v5421_v62, 0.0  ;;  %v5442_v7 = vmov 0 }
 0x162   : >> { %5429 = vst [vmem:[#allocation15_spill] sm:$0xff] %v5428_v34  ;;  %v5432_v59 = vsel %vm3999_vm8, 4294967295, %v5431_v59  ;;  %vm4010_vm15 = vmand %vm5434_vm14, %vm3557_vm4  ;;  %v1012_v53 = vsel %vm3999_vm8, %v5438_v54, 0.0  ;;  %v1027_v5 = vmul.f32 %v2644_v38, %v1011_v51  ;;  %vm5441_vm14 = vcmp.lt.s32.totalorder %v3500_v13, 7  ;;  %v5464_v51 = vld [vmem:[#allocation23_spill] sm:$0xff] }
 0x163   : >> { %5433 = vst [vmem:[#allocation20_spill] sm:$0xff] %v5432_v59  ;;  %v5436_v40 = vsel %vm4010_vm15, 4294967295, %v5435_v40  ;;  %vm4027_vm13 = vmand %vm5441_vm14, %vm5440_vm6  ;;  %v1013_v22 = vsel %vm4010_vm15, %v5445_v6, 0.0  ;;  %v1028_v8 = vmul.f32 %v2644_v38, %v1012_v53  ;;  %vm5446_vm5 = vcmp.lt.s32.totalorder %v3498_v12, 7  ;;  %v5469_v53 = vld [vmem:[#allocation35_spill] sm:$0xff] }
 0x164   : >> { %5437 = vst [vmem:[#allocation21_spill] sm:$0xff] %v5436_v40  ;;  %v5443_v7 = vsel %vm4027_vm13, 4294967295, %v5442_v7  ;;  %v1055_v43 = vsel %vm5446_vm5, %v5422_v15, 0.0  ;;  %vm5447_vm9 = vmmov %vm5441_vm14  ;;  %vm5449_vm8 = vnez %v5448_v4  ;;  %vm5450_vm14 = vcmp.lt.s32.totalorder %v3502_v14, 7 }
 0x165   : >> { %5444 = vst [vmem:[#allocation26_spill] sm:$0xff] %v5443_v7  ;;  %v1056_v62 = vsel %vm5447_vm9, %v5423_v56, 0.0  ;;  %vm4044_vm7 = vmand %vm5450_vm14, %vm5449_vm8  ;;  %v5451_v9 = vmov 0  ;;  %v1014_v19 = vsel %vm4027_vm13, %v5454_v31, 0.0  ;;  %v1029_v44 = vmul.f32 %v2644_v38, %v1013_v22  ;;  %v4083_v22 = vld [vmem:[%s3511_s21 + $0x50] sm:$0xff]  ;;  %v5471_v31 = vld [vmem:[#allocation24_spill] sm:$0xff] }
 0x166   : >> { %v5452_v9 = vsel %vm4044_vm7, 4294967295, %v5451_v9  ;;  %v1035_v15 = vadd.f32 %v1027_v5, %v977_v3  ;;  %vm5455_vm5 = vmmov %vm5450_vm14  ;;  %vm5457_vm9 = vnez %v5456_v28  ;;  %vm5458_vm15 = vcmp.lt.s32.totalorder %v3504_v17, 7 }
 0x167   : >> { %5453 = vst [vmem:[#allocation27_spill] sm:$0xff] %v5452_v9  ;;  %v1057_v56 = vsel %vm5455_vm5, %v5424_v29, 0.0  ;;  %vm4058_vm6 = vmand %vm5458_vm15, %vm5457_vm9  ;;  %v5459_v24 = vmov 0  ;;  %v1015_v0 = vsel %vm4044_vm7, %v5462_v2, 0.0  ;;  %v1030_v32 = vmul.f32 %v2644_v38, %v1014_v19  ;;  %v2655_v29 = vld [vmem:[%s5016_s3 + $0x7] ss:$0 sm:$0xff] }
 0x168   : >> { %v5460_v24 = vsel %vm4058_vm6, 4294967295, %v5459_v24  ;;  %v1036_v42 = vadd.f32 %v1028_v8, %v978_v20  ;;  %vm5463_vm14 = vmmov %vm5458_vm15  ;;  %vm5465_vm15 = vcmp.lt.s32.totalorder %v3506_v18, 7  ;;  %v5466_v54 = vmov 0  ;;  %v4089_v8 = vld [vmem:[%s3511_s21 + $0x4f] sm:$0xff]  ;;  %v5476_v2 = vld [vmem:[#allocation52_spill] sm:$0xff] }
 0x169   : >> { %5461 = vst [vmem:[#allocation29_spill] sm:$0xff] %v5460_v24  ;;  %v1058_v3 = vsel %vm5463_vm14, %v5425_v26, 0.0  ;;  %vm4075_vm5 = vmand %vm5465_vm15, %vm5413_vm0  ;;  %v1016_v20 = vsel %vm4058_vm6, %v5469_v53, 0.0  ;;  %v1031_v5 = vmul.f32 %v2644_v38, %v1015_v0  ;;  %v1037_v6 = vadd.f32 %v1029_v44, %v979_v33 }
 0x16a   : >> { %v5467_v54 = vsel %vm4075_vm5, 4294967295, %v5466_v54  ;;  %vm5470_vm14 = vmmov %vm5465_vm15  ;;  %vm5472_vm15 = vcmp.lt.s32.totalorder %v3508_v21, 7  ;;  %v5473_v19 = vmov 0  ;;  %v1017_v33 = vsel %vm4075_vm5, %v5476_v2, 0.0 }
 0x16b   : >> { %5468 = vst [vmem:[#allocation30_spill] sm:$0xff] %v5467_v54  ;;  %v1059_v26 = vsel %vm5470_vm14, %v3936_v47, 0.0  ;;  %vm4095_vm7 = vmand %vm5472_vm15, %vm5418_vm1  ;;  %v1032_v44 = vmul.f32 %v2644_v38, %v1016_v20  ;;  %v1038_v0 = vadd.f32 %v1030_v32, %v980_v63  ;;  %v1033_v9 = vmul.f32 %v2644_v38, %v1017_v33 }
 0x16c   : >> { %v5474_v19 = vsel %vm4095_vm7, 4294967295, %v5473_v19  ;;  %vm5477_vm6 = vmmov %vm5472_vm15  ;;  %v1018_v24 = vsel %vm4095_vm7, %v4089_v8, 0.0  ;;  %v1039_v7 = vadd.f32 %v1031_v5, %v981_v39  ;;  %v1069_v40 = vmul.f32 %v2655_v29, %v1053_v60 }
 0x16d   : >> { %5475 = vst [vmem:[#allocation14_spill] sm:$0xff] %v5474_v19  ;;  %v1060_v53 = vsel %vm5477_vm6, %v4083_v22, 0.0  ;;  %vm5478_vm14 = vcmp.lt.s32.totalorder %v3494_v10, 7  ;;  %v5479_v54 = vmov 0  ;;  %v1034_v63 = vmul.f32 %v2644_v38, %v1018_v24 }
 0x16e   : >> { %vm4112_vm15 = vmand %vm5478_vm14, %vm5426_vm10  ;;  %v1040_v32 = vadd.f32 %v1032_v44, %v982_v57  ;;  %v1070_v20 = vmul.f32 %v2655_v29, %v1054_v25  ;;  %v1071_v59 = vmul.f32 %v2655_v29, %v1055_v43  ;;  %vm5482_vm6 = vcmp.lt.s32.totalorder %v3496_v11, 7  ;;  %v5510_v44 = vld [vmem:[#allocation48_spill] sm:$0xff] }
 0x16f   : >> { %v5480_v54 = vsel %vm4112_vm15, 4294967295, %v5479_v54  ;;  %vm4120_vm7 = vmand %vm5482_vm6, %vm3759_vm12  ;;  %v5483_v33 = vmov 0  ;;  %v1041_v39 = vadd.f32 %v1033_v9, %v983_v48  ;;  %v1072_v60 = vmul.f32 %v2655_v29, %v1056_v62 }
 0x170   : >> { %5481 = vst [vmem:[#allocation17_spill] sm:$0xff] %v5480_v54  ;;  %v5484_v33 = vsel %vm4120_vm7, 4294967295, %v5483_v33  ;;  %v1073_v5 = vmul.f32 %v2655_v29, %v1057_v56  ;;  %v1074_v19 = vmul.f32 %v2655_v29, %v1058_v3  ;;  %vm5486_vm14 = vcmp.lt.s32.totalorder %v3498_v12, 7 }
 0x171   : >> { %5485 = vst [vmem:[#allocation16_spill] sm:$0xff] %v5484_v33  ;;  %vm4128_vm5 = vmand %vm5486_vm14, %vm3765_vm11  ;;  %v5487_v57 = vmov 0  ;;  %v1042_v38 = vadd.f32 %v1034_v63, %v984_v55  ;;  %v1075_v25 = vmul.f32 %v2655_v29, %v1059_v26  ;;  %v1076_v43 = vmul.f32 %v2655_v29, %v1060_v53  ;;  %v4183_v63 = vld [vmem:[%s3511_s21 + $0x51] sm:$0xff]  ;;  %v4221_v33 = vld [vmem:[%s3511_s21 + $0x7f] sm:$0xff] }
 0x172   : >> { %v5488_v57 = vsel %vm4128_vm5, 4294967295, %v5487_v57  ;;  %v1077_v24 = vadd.f32 %v1069_v40, %v1035_v15  ;;  %vm5490_vm6 = vnez %v5361_v61  ;;  %vm5491_vm13 = vcmp.lt.s32.totalorder %v3500_v13, 7  ;;  %v2666_v40 = vld [vmem:[%s5016_s3 + $0x8] ss:$0 sm:$0xff] }
 0x173   : >> { %5489 = vst [vmem:[#allocation18_spill] sm:$0xff] %v5488_v57  ;;  %vm4136_vm12 = vmand %vm5491_vm13, %vm5490_vm6  ;;  %v5492_v48 = vmov 0  ;;  %v1078_v62 = vadd.f32 %v1070_v20, %v1036_v42  ;;  %v1079_v9 = vadd.f32 %v1071_v59, %v1037_v6  ;;  %v1080_v56 = vadd.f32 %v1072_v60, %v1038_v0  ;;  %v5511_v0 = vld [vmem:[#allocation50_spill] sm:$0xff] }
 0x174   : >> { %v5493_v48 = vsel %vm4136_vm12, 4294967295, %v5492_v48  ;;  %v1081_v3 = vadd.f32 %v1073_v5, %v1039_v7  ;;  %vm5495_vm14 = vnez %v5365_v50  ;;  %vm5496_vm11 = vcmp.lt.s32.totalorder %v3502_v14, 7  ;;  %v4215_v57 = vld [vmem:[%s3511_s21 + $0x6f] sm:$0xff] }
 0x175   : >> { %5494 = vst [vmem:[#allocation31_spill] sm:$0xff] %v5493_v48  ;;  %vm4144_vm10 = vmand %vm5496_vm11, %vm5495_vm14  ;;  %v5497_v55 = vmov 0  ;;  %v1082_v15 = vadd.f32 %v1074_v19, %v1040_v32  ;;  %v1083_v29 = vadd.f32 %v1075_v25, %v1041_v39  ;;  %v1084_v26 = vadd.f32 %v1076_v43, %v1042_v38 }
 0x176   : >> { %v5498_v55 = vsel %vm4144_vm10, 4294967295, %v5497_v55  ;;  %vm5500_vm13 = vnez %v5373_v35  ;;  %vm5501_vm6 = vcmp.lt.s32.totalorder %v3504_v17, 7  ;;  %v5502_v59 = vmov 0 }
 0x177   : >> { %5499 = vst [vmem:[#allocation22_spill] sm:$0xff] %v5498_v55  ;;  %vm4155_vm1 = vmand %vm5501_vm6, %vm5500_vm13  ;;  %v1103_v7 = vsel %vm4112_vm15, %v3755_v37, 0.0  ;;  %vm5505_vm11 = vnez %v5377_v41  ;;  %vm5506_vm14 = vcmp.lt.s32.totalorder %v3506_v18, 7  ;;  %v5507_v42 = vmov 0  ;;  %v4257_v41 = vld [vmem:[%s3511_s21 + $0x70] sm:$0xff] }
 0x178   : >> { %v5503_v59 = vsel %vm4155_vm1, 4294967295, %v5502_v59  ;;  %vm4166_vm0 = vmand %vm5506_vm14, %vm5505_vm11  ;;  %v1104_v6 = vsel %vm4120_vm7, %v3790_v52, 0.0  ;;  %v1105_v19 = vsel %vm4128_vm5, %v3821_v46, 0.0  ;;  %v1106_v37 = vsel %vm4136_vm12, %v5510_v44, 0.0  ;;  %v5517_v46 = vld [vmem:[#allocation53_spill] sm:$0xff] }
 0x179   : >> { %5504 = vst [vmem:[#allocation33_spill] sm:$0xff] %v5503_v59  ;;  %v5508_v42 = vsel %vm4166_vm0, 4294967295, %v5507_v42  ;;  %v1107_v53 = vsel %vm4144_vm10, %v5511_v0, 0.0  ;;  %vm5512_vm6 = vnez %v5381_v45  ;;  %vm5513_vm14 = vcmp.lt.s32.totalorder %v3508_v21, 7  ;;  %v2677_v44 = vld [vmem:[%s5016_s3 + $0x9] ss:$0 sm:$0xff] }
 0x17a   : >> { %5509 = vst [vmem:[#allocation23_spill] sm:$0xff] %v5508_v42  ;;  %vm4189_vm7 = vmand %vm5513_vm14, %vm5512_vm6  ;;  %v5514_v52 = vmov 0  ;;  %v1108_v32 = vsel %vm4155_vm1, %v5517_v46, 0.0  ;;  %v1109_v20 = vsel %vm4166_vm0, %v3947_v23, 0.0  ;;  %v1119_v39 = vmul.f32 %v2666_v40, %v1103_v7  ;;  %v4206_v7 = vld [vmem:[%s3511_s21 + $0x57] sm:$0xff]  ;;  %v4251_v45 = vld [vmem:[%s3511_s21 + $0x60] sm:$0xff] }
 0x17b   : >> { %v5515_v52 = vsel %vm4189_vm7, 4294967295, %v5514_v52  ;;  %v1120_v60 = vmul.f32 %v2666_v40, %v1104_v6  ;;  %v1110_v5 = vsel %vm4189_vm7, %v4183_v63, 0.0  ;;  %v1121_v38 = vmul.f32 %v2666_v40, %v1105_v19  ;;  %v4209_v6 = vld [vmem:[%s3511_s21 + $0x5f] sm:$0xff] }
 0x17c   : >> { %5516 = vst [vmem:[#allocation35_spill] sm:$0xff] %v5515_v52  ;;  %v1122_v25 = vmul.f32 %v2666_v40, %v1106_v37  ;;  %v1123_v43 = vmul.f32 %v2666_v40, %v1107_v53  ;;  %v1124_v0 = vmul.f32 %v2666_v40, %v1108_v32  ;;  %v1125_v46 = vmul.f32 %v2666_v40, %v1109_v20  ;;  %v4212_v52 = vld [vmem:[%s3511_s21 + $0x67] sm:$0xff]  ;;  %v4218_v53 = vld [vmem:[%s3511_s21 + $0x77] sm:$0xff] }
 0x17d   : >> { %v1126_v42 = vmul.f32 %v2666_v40, %v1110_v5  ;;  %v1127_v59 = vadd.f32 %v1119_v39, %v1077_v24  ;;  %v1128_v55 = vadd.f32 %v1120_v60, %v1078_v62  ;;  %v1129_v19 = vadd.f32 %v1121_v38, %v1079_v9  ;;  %v5518_v20 = vld [vmem:[#allocation19_spill] sm:$0xff]  ;;  %v5520_v5 = vld [vmem:[#allocation25_spill] sm:$0xff]  ;;  %v5522_v9 = vld [vmem:[#allocation28_spill] sm:$0xff] }
 0x17e   : >> { %v1130_v48 = vadd.f32 %v1122_v25, %v1080_v56  ;;  %v1131_v37 = vadd.f32 %v1123_v43, %v1081_v3  ;;  %v1132_v32 = vadd.f32 %v1124_v0, %v1082_v15  ;;  %v1133_v40 = vadd.f32 %v1125_v46, %v1083_v29  ;;  %v5524_v3 = vld [vmem:[#allocation32_spill] sm:$0xff]  ;;  %v5526_v29 = vld [vmem:[#allocation34_spill] sm:$0xff]  ;;  %v5530_v60 = vld [vmem:[#allocation37_spill] sm:$0xff] }
 0x17f   : >> { %v1134_v24 = vadd.f32 %v1126_v42, %v1084_v26  ;;  %vm5519_vm14 = vnez %v5518_v20  ;;  %vm5521_vm7 = vnez %v5520_v5  ;;  %vm5523_vm0 = vnez %v5522_v9  ;;  %v5532_v25 = vld [vmem:[#allocation38_spill] sm:$0xff]  ;;  %v4248_v5 = vld [vmem:[%s3511_s21 + $0x58] sm:$0xff] }
 0x180   : >> { %v1145_v39 = vsel %vm5519_vm14, %v5476_v2, 0.0  ;;  %v1146_v62 = vsel %vm5521_vm7, %v4089_v8, 0.0  ;;  %v1147_v56 = vsel %vm5523_vm0, %v4206_v7, 0.0  ;;  %vm5525_vm1 = vnez %v5524_v3  ;;  %v5528_v2 = vld [vmem:[#allocation36_spill] sm:$0xff] }
 0x181   : >> { %v1148_v15 = vsel %vm5525_vm1, %v4209_v6, 0.0  ;;  %vm5527_vm10 = vnez %v5526_v29  ;;  %vm5529_vm14 = vnez %v5528_v2  ;;  %vm5531_vm7 = vnez %v5530_v60  ;;  %v4254_v60 = vld [vmem:[%s3511_s21 + $0x68] sm:$0xff] }
 0x182   : >> { %v1149_v26 = vsel %vm5527_vm10, %v4212_v52, 0.0  ;;  %v1150_v42 = vsel %vm5529_vm14, %v4215_v57, 0.0  ;;  %v1151_v38 = vsel %vm5531_vm7, %v4218_v53, 0.0  ;;  %vm5533_vm0 = vnez %v5532_v25 }
 0x183   : >> { %v1152_v43 = vsel %vm5533_vm0, %v4221_v33, 0.0  ;;  %v1161_v0 = vmul.f32 %v2677_v44, %v1145_v39  ;;  %v1162_v46 = vmul.f32 %v2677_v44, %v1146_v62  ;;  %v1163_v3 = vmul.f32 %v2677_v44, %v1147_v56  ;;  %v4260_v56 = vld [vmem:[%s3511_s21 + $0x78] sm:$0xff] }
 0x184   : >> { %v1164_v29 = vmul.f32 %v2677_v44, %v1148_v15  ;;  %v1165_v9 = vmul.f32 %v2677_v44, %v1149_v26  ;;  %v1166_v2 = vmul.f32 %v2677_v44, %v1150_v42  ;;  %v1167_v20 = vmul.f32 %v2677_v44, %v1151_v38  ;;  %v4263_v15 = vld [vmem:[%s3511_s21 + $0x80] sm:$0xff]  ;;  %v2688_v26 = vld [vmem:[%s5016_s3 + $0xa] ss:$0 sm:$0xff] }
 0x185   : >> { %v1168_v54 = vmul.f32 %v2677_v44, %v1152_v43  ;;  %v1169_v34 = vadd.f32 %v1161_v0, %v1127_v59  ;;  %v1170_v25 = vadd.f32 %v1162_v46, %v1128_v55  ;;  %v1171_v39 = vadd.f32 %v1163_v3, %v1129_v19 }
 0x186   : >> { %v1172_v62 = vadd.f32 %v1164_v29, %v1130_v48  ;;  %v1173_v35 = vadd.f32 %v1165_v9, %v1131_v37  ;;  %v1174_v44 = vadd.f32 %v1166_v2, %v1132_v32  ;;  %v1175_v59 = vadd.f32 %v1167_v20, %v1133_v40  ;;  %v4293_v29 = vld [vmem:[%s3511_s21 + $0x59] sm:$0xff] }
 0x187   : >> { %v1176_v42 = vadd.f32 %v1168_v54, %v1134_v24  ;;  %vm5534_vm0 = vcmp.ge.s32.totalorder %v3494_v10, 1  ;;  %vm5535_vm7 = vcmp.ge.s32.totalorder %v3496_v11, 1  ;;  %vm5536_vm14 = vcmp.ge.s32.totalorder %v3498_v12, 1 }
 0x188   : >> { %v1187_v38 = vsel %vm5534_vm0, %v3936_v47, 0.0  ;;  %v1188_v48 = vsel %vm5535_vm7, %v4083_v22, 0.0  ;;  %v1189_v55 = vsel %vm5536_vm14, %v4248_v5, 0.0  ;;  %vm5537_vm10 = vcmp.ge.s32.totalorder %v3500_v13, 1 }
 0x189   : >> { %v1190_v19 = vsel %vm5537_vm10, %v4251_v45, 0.0  ;;  %vm5538_vm1 = vcmp.ge.s32.totalorder %v3502_v14, 1  ;;  %vm5539_vm0 = vcmp.ge.s32.totalorder %v3504_v17, 1  ;;  %vm5540_vm7 = vcmp.ge.s32.totalorder %v3506_v18, 1  ;;  %v4296_v17 = vld [vmem:[%s3511_s21 + $0x61] sm:$0xff]  ;;  %v4299_v18 = vld [vmem:[%s3511_s21 + $0x69] sm:$0xff] }
 0x18a   : >> { %v1191_v54 = vsel %vm5538_vm1, %v4254_v60, 0.0  ;;  %v1192_v47 = vsel %vm5539_vm0, %v4257_v41, 0.0  ;;  %v1193_v37 = vsel %vm5540_vm7, %v4260_v56, 0.0  ;;  %vm5541_vm14 = vcmp.ge.s32.totalorder %v3508_v21, 1  ;;  %v4302_v14 = vld [vmem:[%s3511_s21 + $0x71] sm:$0xff] }
 0x18b   : >> { %v1194_v32 = vsel %vm5541_vm14, %v4263_v15, 0.0  ;;  %v1203_v40 = vmul.f32 %v2688_v26, %v1187_v38  ;;  %v1204_v24 = vmul.f32 %v2688_v26, %v1188_v48  ;;  %v1205_v20 = vmul.f32 %v2688_v26, %v1189_v55  ;;  %5542 = vst [vmem:[#allocation24_spill] sm:$0xff] %v4302_v14  ;;  %v4305_v55 = vld [vmem:[%s3511_s21 + $0x79] sm:$0xff] }
 0x18c   : >> { %v1206_v9 = vmul.f32 %v2688_v26, %v1190_v19  ;;  %v1207_v3 = vmul.f32 %v2688_v26, %v1191_v54  ;;  %v1208_v2 = vmul.f32 %v2688_v26, %v1192_v47  ;;  %v1209_v43 = vmul.f32 %v2688_v26, %v1193_v37  ;;  %v4308_v19 = vld [vmem:[%s3511_s21 + $0x81] sm:$0xff]  ;;  %v2699_v54 = vld [vmem:[%s5016_s3 + $0xb] ss:$0 sm:$0xff]  ;;  %v5544_v37 = vld [vmem:[#allocation42_spill] sm:$0xff] }
 0x18d   : >> { %v1210_v0 = vmul.f32 %v2688_v26, %v1194_v32  ;;  %v1211_v46 = vadd.f32 %v1203_v40, %v1169_v34  ;;  %v1212_v21 = vadd.f32 %v1204_v24, %v1170_v25  ;;  %v1213_v38 = vadd.f32 %v1205_v20, %v1171_v39  ;;  %5543 = vst [vmem:[#allocation52_spill] sm:$0xff] %v4308_v19  ;;  %v5546_v25 = vld [vmem:[#allocation46_spill] sm:$0xff]  ;;  %v5550_v40 = vld [vmem:[#allocation49_spill] sm:$0xff]  ;;  %v5556_v20 = vld [vmem:[#allocation55_spill] sm:$0xff] }
 0x18e   : >> { %v1214_v48 = vadd.f32 %v1206_v9, %v1172_v62  ;;  %v1215_v13 = vadd.f32 %v1207_v3, %v1173_v35  ;;  %v1216_v26 = vadd.f32 %v1208_v2, %v1174_v44  ;;  %v1217_v34 = vadd.f32 %v1209_v43, %v1175_v59  ;;  %v5548_v35 = vld [vmem:[#allocation47_spill] sm:$0xff]  ;;  %v5558_v3 = vld [vmem:[#allocation56_spill] sm:$0xff] }
 0x18f   : >> { %v1218_v47 = vadd.f32 %v1210_v0, %v1176_v42  ;;  %vm5545_vm1 = vnez %v5544_v37  ;;  %vm5547_vm10 = vnez %v5546_v25  ;;  %vm5549_vm0 = vnez %v5548_v35  ;;  %v5552_v44 = vld [vmem:[#allocation51_spill] sm:$0xff]  ;;  %v5554_v42 = vld [vmem:[#allocation54_spill] sm:$0xff] }
 0x190   : >> { %v1229_v32 = vsel %vm5545_vm1, %v3947_v23, 0.0  ;;  %v1230_v39 = vsel %vm5547_vm10, %v4183_v63, 0.0  ;;  %v1231_v62 = vsel %vm5549_vm0, %v4293_v29, 0.0  ;;  %vm5551_vm7 = vnez %v5550_v40 }
 0x191   : >> { %v1232_v24 = vsel %vm5551_vm7, %v4296_v17, 0.0  ;;  %vm5553_vm14 = vnez %v5552_v44  ;;  %vm5555_vm12 = vnez %v5554_v42  ;;  %vm5557_vm1 = vnez %v5556_v20  ;;  %v4338_v20 = vld [vmem:[%s3511_s21 + $0x87] sm:$0xff] }
 0x192   : >> { %v1233_v59 = vsel %vm5553_vm14, %v4299_v18, 0.0  ;;  %v1234_v23 = vsel %vm5555_vm12, %v4302_v14, 0.0  ;;  %v1235_v9 = vsel %vm5557_vm1, %v4305_v55, 0.0  ;;  %vm5559_vm0 = vnez %v5558_v3  ;;  %v2710_v3 = vld [vmem:[%s5016_s3 + $0xc] ss:$0 sm:$0xff] }
 0x193   : >> { %v1236_v2 = vsel %vm5559_vm0, %v4308_v19, 0.0  ;;  %v1245_v43 = vmul.f32 %v2699_v54, %v1229_v32  ;;  %v1246_v0 = vmul.f32 %v2699_v54, %v1230_v39  ;;  %v1247_v40 = vmul.f32 %v2699_v54, %v1231_v62 }
 0x194   : >> { %v1248_v35 = vmul.f32 %v2699_v54, %v1232_v24  ;;  %v1249_v25 = vmul.f32 %v2699_v54, %v1233_v59  ;;  %v1250_v44 = vmul.f32 %v2699_v54, %v1234_v23  ;;  %v1251_v37 = vmul.f32 %v2699_v54, %v1235_v9 }
 0x195   : >> { %v1252_v12 = vmul.f32 %v2699_v54, %v1236_v2  ;;  %v1253_v11 = vadd.f32 %v1245_v43, %v1211_v46  ;;  %v1254_v42 = vadd.f32 %v1246_v0, %v1212_v21  ;;  %v1255_v10 = vadd.f32 %v1247_v40, %v1213_v38  ;;  %v4371_v43 = vld [vmem:[%s3511_s21 + $0x88] sm:$0xff] }
 0x196   : >> { %v1256_v50 = vadd.f32 %v1248_v35, %v1214_v48  ;;  %v1257_v14 = vadd.f32 %v1249_v25, %v1215_v13  ;;  %v1258_v19 = vadd.f32 %v1250_v44, %v1216_v26  ;;  %v1259_v32 = vadd.f32 %v1251_v37, %v1217_v34  ;;  %v2721_v25 = vld [vmem:[%s5016_s3 + $0xd] ss:$0 sm:$0xff] }
 0x197   : >> { %v1260_v39 = vadd.f32 %v1252_v12, %v1218_v47  ;;  %v1271_v62 = vsel %vm3538_vm2, %v4089_v8, 0.0  ;;  %v1272_v21 = vsel %vm3551_vm3, %v4206_v7, 0.0  ;;  %v1273_v13 = vsel %vm3557_vm4, %v4209_v6, 0.0 }
 0x198   : >> { %vm5560_vm0 = vnez %v5439_v36  ;;  %v1275_v12 = vsel %vm5449_vm8, %v4215_v57, 0.0  ;;  %v1276_v8 = vsel %vm5457_vm9, %v4218_v53, 0.0  ;;  %vm5561_vm2 = vnez %v5464_v51 }
 0x199   : >> { %v1274_v46 = vsel %vm5560_vm0, %v4212_v52, 0.0  ;;  %v1277_v38 = vsel %vm5561_vm2, %v4221_v33, 0.0  ;;  %vm5562_vm3 = vnez %v5471_v31  ;;  %v1287_v54 = vmul.f32 %v2710_v3, %v1271_v62 }
 0x19a   : >> { %v1278_v48 = vsel %vm5562_vm3, %v4338_v20, 0.0  ;;  %v1288_v26 = vmul.f32 %v2710_v3, %v1272_v21  ;;  %v1289_v34 = vmul.f32 %v2710_v3, %v1273_v13  ;;  %v1290_v47 = vmul.f32 %v2710_v3, %v1274_v46 }
 0x19b   : >> { %v1291_v37 = vmul.f32 %v2710_v3, %v1275_v12  ;;  %v1292_v35 = vmul.f32 %v2710_v3, %v1276_v8  ;;  %v1293_v40 = vmul.f32 %v2710_v3, %v1277_v38  ;;  %v1294_v24 = vmul.f32 %v2710_v3, %v1278_v48  ;;  %v2732_v38 = vld [vmem:[%s5016_s3 + $0xe] ss:$0 sm:$0xff] }
 0x19c   : >> { %v1295_v44 = vadd.f32 %v1287_v54, %v1253_v11  ;;  %v1296_v59 = vadd.f32 %v1288_v26, %v1254_v42  ;;  %v1297_v23 = vadd.f32 %v1289_v34, %v1255_v10  ;;  %v1298_v9 = vadd.f32 %v1290_v47, %v1256_v50 }
 0x19d   : >> { %v1299_v2 = vadd.f32 %v1291_v37, %v1257_v14  ;;  %v1300_v0 = vadd.f32 %v1292_v35, %v1258_v19  ;;  %v1301_v62 = vadd.f32 %v1293_v40, %v1259_v32  ;;  %v1302_v21 = vadd.f32 %v1294_v24, %v1260_v39  ;;  %v5567_v35 = vld [vmem:[#allocation24_spill] sm:$0xff]  ;;  %v5568_v40 = vld [vmem:[#allocation41_spill] sm:$0xff] }
 0x19e   : >> { %v1321_v13 = vmul.f32 %v2721_v25, %v4083_v22  ;;  %v1322_v46 = vmul.f32 %v2721_v25, %v4248_v5  ;;  %v1323_v12 = vmul.f32 %v2721_v25, %v4251_v45  ;;  %v1324_v8 = vmul.f32 %v2721_v25, %v4254_v60  ;;  %v4382_v22 = vld [vmem:[%s3511_s21 + $0x89] sm:$0xff] }
 0x19f   : >> { %v1325_v11 = vmul.f32 %v2721_v25, %v4257_v41  ;;  %v1326_v10 = vmul.f32 %v2721_v25, %v4260_v56  ;;  %v1327_v14 = vmul.f32 %v2721_v25, %v4263_v15  ;;  %v1328_v50 = vmul.f32 %v2721_v25, %v4371_v43 }
 0x1a0   : >> { %v1329_v19 = vadd.f32 %v1321_v13, %v1295_v44  ;;  %v1330_v42 = vadd.f32 %v1322_v46, %v1296_v59  ;;  %v1331_v3 = vadd.f32 %v1323_v12, %v1297_v23  ;;  %v1332_v32 = vadd.f32 %v1324_v8, %v1298_v9  ;;  %v5571_v59 = vld [vmem:[#allocation52_spill] sm:$0xff]  ;;  %v2743_v23 = vld [vmem:[%s5016_s3 + $0xf] ss:$0 sm:$0xff] }
 0x1a1   : >> { %v1333_v39 = vadd.f32 %v1325_v11, %v1299_v2  ;;  %v1334_v48 = vadd.f32 %v1326_v10, %v1300_v0  ;;  %v1335_v54 = vadd.f32 %v1327_v14, %v1301_v62  ;;  %v1336_v26 = vadd.f32 %v1328_v50, %v1302_v21 }
 0x1a2   : >> { %vm5563_vm3 = vnez %v5351_v1  ;;  %vm5564_vm2 = vnez %v5354_v58  ;;  %vm5565_vm9 = vnez %v5357_v49  ;;  %vm5566_vm8 = vnez %v5361_v61 }
 0x1a3   : >> { %v1347_v34 = vsel %vm5563_vm3, %v4183_v63, 0.0  ;;  %v1348_v47 = vsel %vm5564_vm2, %v4293_v29, 0.0  ;;  %v1349_v37 = vsel %vm5565_vm9, %v4296_v17, 0.0  ;;  %v1350_v25 = vsel %vm5566_vm8, %v4299_v18, 0.0 }
 0x1a4   : >> { %vm5569_vm0 = vnez %v5568_v40  ;;  %v1352_v63 = vsel %vm5500_vm13, %v4305_v55, 0.0  ;;  %v1353_v9 = vsel %vm5505_vm11, %v5571_v59, 0.0  ;;  %v1354_v0 = vsel %vm5512_vm6, %v4382_v22, 0.0 }
 0x1a5   : >> { %v1351_v24 = vsel %vm5569_vm0, %v5567_v35, 0.0  ;;  %v1363_v62 = vmul.f32 %v2732_v38, %v1347_v34  ;;  %v1364_v21 = vmul.f32 %v2732_v38, %v1348_v47  ;;  %v1365_v13 = vmul.f32 %v2732_v38, %v1349_v37  ;;  %v5574_v47 = vld [vmem:[#allocation15_spill] sm:$0xff] }
 0x1a6   : >> { %v1366_v46 = vmul.f32 %v2732_v38, %v1350_v25  ;;  %v1367_v12 = vmul.f32 %v2732_v38, %v1351_v24  ;;  %v1368_v8 = vmul.f32 %v2732_v38, %v1352_v63  ;;  %v1369_v11 = vmul.f32 %v2732_v38, %v1353_v9  ;;  %v4418_v25 = vld [vmem:[%s3511_s21 + $0x8f] sm:$0xff] }
 0x1a7   : >> { %v1370_v10 = vmul.f32 %v2732_v38, %v1354_v0  ;;  %v1371_v14 = vadd.f32 %v1363_v62, %v1329_v19  ;;  %v1372_v50 = vadd.f32 %v1364_v21, %v1330_v42  ;;  %v1373_v44 = vadd.f32 %v1365_v13, %v1331_v3  ;;  %v5576_v38 = vld [vmem:[#allocation20_spill] sm:$0xff]  ;;  %v5578_v42 = vld [vmem:[#allocation21_spill] sm:$0xff]  ;;  %v5586_v24 = vld [vmem:[#allocation30_spill] sm:$0xff] }
 0x1a8   : >> { %v1374_v40 = vadd.f32 %v1366_v46, %v1332_v32  ;;  %v1375_v61 = vadd.f32 %v1367_v12, %v1333_v39  ;;  %v1376_v2 = vadd.f32 %v1368_v8, %v1334_v48  ;;  %v1377_v49 = vadd.f32 %v1369_v11, %v1335_v54  ;;  %v5580_v32 = vld [vmem:[#allocation26_spill] sm:$0xff]  ;;  %v5582_v48 = vld [vmem:[#allocation27_spill] sm:$0xff] }
 0x1a9   : >> { %v1378_v34 = vadd.f32 %v1370_v10, %v1336_v26  ;;  %vm5575_vm6 = vnez %v5574_v47  ;;  %vm5577_vm11 = vnez %v5576_v38  ;;  %vm5579_vm13 = vnez %v5578_v42  ;;  %v5588_v63 = vld [vmem:[#allocation14_spill] sm:$0xff] }
 0x1aa   : >> { %v1389_v37 = vsel %vm5575_vm6, %v4206_v7, 0.0  ;;  %v1390_v19 = vsel %vm5577_vm11, %v4209_v6, 0.0  ;;  %v1391_v3 = vsel %vm5579_vm13, %v4212_v52, 0.0  ;;  %vm5581_vm0 = vnez %v5580_v32  ;;  %v5584_v7 = vld [vmem:[#allocation29_spill] sm:$0xff] }
 0x1ab   : >> { %v1392_v39 = vsel %vm5581_vm0, %v4215_v57, 0.0  ;;  %vm5583_vm8 = vnez %v5582_v48  ;;  %vm5585_vm6 = vnez %v5584_v7  ;;  %vm5587_vm9 = vnez %v5586_v24  ;;  %v2754_v24 = vld [vmem:[%s5016_s3 + $0x10] ss:$0 sm:$0xff]  ;;  %v2765_v48 = vld [vmem:[%s5016_s3 + $0x11] ss:$0 sm:$0xff] }
 0x1ac   : >> { %v1393_v54 = vsel %vm5583_vm8, %v4218_v53, 0.0  ;;  %v1394_v26 = vsel %vm5585_vm6, %v4221_v33, 0.0  ;;  %v1395_v6 = vsel %vm5587_vm9, %v4338_v20, 0.0  ;;  %vm5589_vm11 = vnez %v5588_v63 }
 0x1ad   : >> { %v1396_v52 = vsel %vm5589_vm11, %v4418_v25, 0.0  ;;  %v1405_v9 = vmul.f32 %v2743_v23, %v1389_v37  ;;  %v1406_v0 = vmul.f32 %v2743_v23, %v1390_v19  ;;  %v1407_v62 = vmul.f32 %v2743_v23, %v1391_v3  ;;  %v5590_v19 = vld [vmem:[#allocation6_spill] sm:$0xff] }
 0x1ae   : >> { %v1408_v57 = vmul.f32 %v2743_v23, %v1392_v39  ;;  %v1409_v21 = vmul.f32 %v2743_v23, %v1393_v54  ;;  %v1410_v13 = vmul.f32 %v2743_v23, %v1394_v26  ;;  %v1411_v53 = vmul.f32 %v2743_v23, %v1395_v6  ;;  %v4448_v39 = vld [vmem:[%s3511_s21 + $0x90] sm:$0xff]  ;;  %v5602_v54 = vld [vmem:[#allocation12_spill] sm:$0xff]  ;;  %v5604_v26 = vld [vmem:[#allocation13_spill] sm:$0xff] }
 0x1af   : >> { %v1412_v46 = vmul.f32 %v2743_v23, %v1396_v52  ;;  %v1413_v12 = vadd.f32 %v1405_v9, %v1371_v14  ;;  %v1414_v8 = vadd.f32 %v1406_v0, %v1372_v50  ;;  %v1415_v33 = vadd.f32 %v1407_v62, %v1373_v44  ;;  %v5592_v23 = vld [vmem:[#allocation7_spill] sm:$0xff]  ;;  %v5596_v44 = vld [vmem:[#allocation9_spill] sm:$0xff] }
 0x1b0   : >> { %v1416_v11 = vadd.f32 %v1408_v57, %v1374_v40  ;;  %v1417_v10 = vadd.f32 %v1409_v21, %v1375_v61  ;;  %v1418_v63 = vadd.f32 %v1410_v13, %v1376_v2  ;;  %v1419_v7 = vadd.f32 %v1411_v53, %v1377_v49  ;;  %v5594_v40 = vld [vmem:[#allocation8_spill] sm:$0xff]  ;;  %v5598_v49 = vld [vmem:[#allocation10_spill] sm:$0xff] }
 0x1b1   : >> { %v1420_v37 = vadd.f32 %v1412_v46, %v1378_v34  ;;  %vm5591_vm11 = vcmp.lt.s32.totalorder %v5590_v19, 7  ;;  %vm5593_vm9 = vcmp.lt.s32.totalorder %v5592_v23, 7  ;;  %vm5595_vm6 = vcmp.lt.s32.totalorder %v5594_v40, 7 }
 0x1b2   : >> { %v1431_v3 = vsel %vm5591_vm11, %v4248_v5, 0.0  ;;  %v1432_v14 = vsel %vm5593_vm9, %v4251_v45, 0.0  ;;  %v1433_v61 = vsel %vm5595_vm6, %v4254_v60, 0.0  ;;  %vm5597_vm8 = vcmp.lt.s32.totalorder %v5596_v44, 7  ;;  %v5600_v5 = vld [vmem:[#allocation11_spill] sm:$0xff] }
 0x1b3   : >> { %v1434_v2 = vsel %vm5597_vm8, %v4257_v41, 0.0  ;;  %vm5599_vm0 = vcmp.lt.s32.totalorder %v5598_v49, 7  ;;  %vm5601_vm11 = vcmp.lt.s32.totalorder %v5600_v5, 7  ;;  %vm5603_vm13 = vcmp.lt.s32.totalorder %v5602_v54, 7 }
 0x1b4   : >> { %v1435_v50 = vsel %vm5599_vm0, %v4260_v56, 0.0  ;;  %v1436_v34 = vsel %vm5601_vm11, %v4263_v15, 0.0  ;;  %v1437_v45 = vsel %vm5603_vm13, %v4371_v43, 0.0  ;;  %vm5605_vm9 = vcmp.lt.s32.totalorder %v5604_v26, 7 }
 0x1b5   : >> { %v1438_v60 = vsel %vm5605_vm9, %v4448_v39, 0.0  ;;  %v1447_v6 = vmul.f32 %v2754_v24, %v1431_v3  ;;  %v1448_v52 = vmul.f32 %v2754_v24, %v1432_v14  ;;  %v1449_v9 = vmul.f32 %v2754_v24, %v1433_v61  ;;  %v4595_v14 = vld [vmem:[%s3511_s21 + $0xa1] sm:$0xff] }
 0x1b6   : >> { %v1450_v41 = vmul.f32 %v2754_v24, %v1434_v2  ;;  %v1451_v0 = vmul.f32 %v2754_v24, %v1435_v50  ;;  %v1452_v62 = vmul.f32 %v2754_v24, %v1436_v34  ;;  %v1453_v56 = vmul.f32 %v2754_v24, %v1437_v45  ;;  %v4478_v2 = vld [vmem:[%s3511_s21 + $0x91] sm:$0xff] }
 0x1b7   : >> { %v1454_v57 = vmul.f32 %v2754_v24, %v1438_v60  ;;  %v1455_v21 = vadd.f32 %v1447_v6, %v1413_v12  ;;  %v1456_v13 = vadd.f32 %v1448_v52, %v1414_v8  ;;  %v1457_v15 = vadd.f32 %v1449_v9, %v1415_v33  ;;  %v5607_v24 = vld [vmem:[#allocation16_spill] sm:$0xff]  ;;  %v4502_v52 = vld [vmem:[%s3511_s21 + $0x97] sm:$0xff] }
 0x1b8   : >> { %v1458_v53 = vadd.f32 %v1450_v41, %v1416_v11  ;;  %v1459_v46 = vadd.f32 %v1451_v0, %v1417_v10  ;;  %v1460_v32 = vadd.f32 %v1452_v62, %v1418_v63  ;;  %v1461_v42 = vadd.f32 %v1453_v56, %v1419_v7  ;;  %v5610_v11 = vld [vmem:[#allocation31_spill] sm:$0xff]  ;;  %v5612_v63 = vld [vmem:[#allocation22_spill] sm:$0xff]  ;;  %v5614_v10 = vld [vmem:[#allocation33_spill] sm:$0xff] }
 0x1b9   : >> { %v1462_v3 = vadd.f32 %v1454_v57, %v1420_v37  ;;  %v1473_v61 = vsel %vm4112_vm15, %v4293_v29, 0.0  ;;  %vm5608_vm8 = vnez %v5607_v24  ;;  %v1475_v33 = vsel %vm4128_vm5, %v4299_v18, 0.0  ;;  %v5618_v18 = vld [vmem:[#allocation35_spill] sm:$0xff]  ;;  %v4508_v56 = vld [vmem:[%s3511_s21 + $0xa7] sm:$0xff]  ;;  %v4511_v57 = vld [vmem:[%s3511_s21 + $0xaf] sm:$0xff] }
 0x1ba   : >> { %v1474_v12 = vsel %vm5608_vm8, %v4296_v17, 0.0  ;;  %vm5611_vm13 = vnez %v5610_v11  ;;  %vm5613_vm6 = vnez %v5612_v63  ;;  %vm5615_vm0 = vnez %v5614_v10  ;;  %v5616_v17 = vld [vmem:[#allocation23_spill] sm:$0xff]  ;;  %v4550_v11 = vld [vmem:[%s3511_s21 + $0xa0] sm:$0xff]  ;;  %v4556_v8 = vld [vmem:[%s3511_s21 + $0xb0] sm:$0xff] }
 0x1bb   : >> { %v1476_v7 = vsel %vm5611_vm13, %v5567_v35, 0.0  ;;  %v1477_v29 = vsel %vm5613_vm6, %v4305_v55, 0.0  ;;  %v1478_v37 = vsel %vm5615_vm0, %v5571_v59, 0.0  ;;  %vm5617_vm11 = vnez %v5616_v17  ;;  %v4505_v62 = vld [vmem:[%s3511_s21 + $0x9f] sm:$0xff] }
 0x1bc   : >> { %v1479_v50 = vsel %vm5617_vm11, %v4382_v22, 0.0  ;;  %vm5619_vm9 = vnez %v5618_v18  ;;  %v1489_v45 = vmul.f32 %v2765_v48, %v1473_v61  ;;  %v1490_v35 = vmul.f32 %v2765_v48, %v1474_v12 }
 0x1bd   : >> { %v1480_v34 = vsel %vm5619_vm9, %v4478_v2, 0.0  ;;  %v1491_v60 = vmul.f32 %v2765_v48, %v1475_v33  ;;  %v1492_v6 = vmul.f32 %v2765_v48, %v1476_v7  ;;  %v1493_v55 = vmul.f32 %v2765_v48, %v1477_v29  ;;  %v4514_v33 = vld [vmem:[%s3511_s21 + $0xb7] sm:$0xff]  ;;  %v4517_v7 = vld [vmem:[%s3511_s21 + $0xbf] sm:$0xff]  ;;  %v2776_v29 = vld [vmem:[%s5016_s3 + $0x12] ss:$0 sm:$0xff] }
 0x1be   : >> { %v1494_v9 = vmul.f32 %v2765_v48, %v1478_v37  ;;  %v1495_v41 = vmul.f32 %v2765_v48, %v1479_v50  ;;  %v1496_v59 = vmul.f32 %v2765_v48, %v1480_v34  ;;  %v1497_v0 = vadd.f32 %v1489_v45, %v1455_v21  ;;  %v5620_v50 = vld [vmem:[#allocation19_spill] sm:$0xff]  ;;  %v5626_v45 = vld [vmem:[#allocation32_spill] sm:$0xff] }
 0x1bf   : >> { %v1498_v18 = vadd.f32 %v1490_v35, %v1456_v13  ;;  %v1499_v61 = vadd.f32 %v1491_v60, %v1457_v15  ;;  %v1500_v12 = vadd.f32 %v1492_v6, %v1458_v53  ;;  %v1501_v17 = vadd.f32 %v1493_v55, %v1459_v46  ;;  %v5622_v13 = vld [vmem:[#allocation25_spill] sm:$0xff]  ;;  %v5624_v53 = vld [vmem:[#allocation28_spill] sm:$0xff]  ;;  %v5634_v55 = vld [vmem:[#allocation38_spill] sm:$0xff] }
 0x1c0   : >> { %v1502_v48 = vadd.f32 %v1494_v9, %v1460_v32  ;;  %v1503_v21 = vadd.f32 %v1495_v41, %v1461_v42  ;;  %v1504_v37 = vadd.f32 %v1496_v59, %v1462_v3  ;;  %vm5621_vm9 = vnez %v5620_v50  ;;  %v5628_v42 = vld [vmem:[#allocation34_spill] sm:$0xff]  ;;  %v5632_v60 = vld [vmem:[#allocation37_spill] sm:$0xff] }
 0x1c1   : >> { %v1515_v34 = vsel %vm5621_vm9, %v4338_v20, 0.0  ;;  %vm5623_vm11 = vnez %v5622_v13  ;;  %vm5625_vm0 = vnez %v5624_v53  ;;  %vm5627_vm6 = vnez %v5626_v45  ;;  %v5630_v20 = vld [vmem:[#allocation36_spill] sm:$0xff]  ;;  %v4547_v45 = vld [vmem:[%s3511_s21 + $0x98] sm:$0xff] }
 0x1c2   : >> { %v1516_v15 = vsel %vm5623_vm11, %v4418_v25, 0.0  ;;  %v1517_v46 = vsel %vm5625_vm0, %v4502_v52, 0.0  ;;  %v1518_v32 = vsel %vm5627_vm6, %v4505_v62, 0.0  ;;  %vm5629_vm13 = vnez %v5628_v42 }
 0x1c3   : >> { %v1519_v3 = vsel %vm5629_vm13, %v4508_v56, 0.0  ;;  %vm5631_vm9 = vnez %v5630_v20  ;;  %vm5633_vm11 = vnez %v5632_v60  ;;  %vm5635_vm0 = vnez %v5634_v55  ;;  %v4553_v60 = vld [vmem:[%s3511_s21 + $0xa8] sm:$0xff] }
 0x1c4   : >> { %v1520_v35 = vsel %vm5631_vm9, %v4511_v57, 0.0  ;;  %v1521_v6 = vsel %vm5633_vm11, %v4514_v33, 0.0  ;;  %v1522_v9 = vsel %vm5635_vm0, %v4517_v7, 0.0  ;;  %v1531_v41 = vmul.f32 %v2776_v29, %v1515_v34 }
 0x1c5   : >> { %v1532_v59 = vmul.f32 %v2776_v29, %v1516_v15  ;;  %v1533_v50 = vmul.f32 %v2776_v29, %v1517_v46  ;;  %v1534_v13 = vmul.f32 %v2776_v29, %v1518_v32  ;;  %v1535_v53 = vmul.f32 %v2776_v29, %v1519_v3  ;;  %v4559_v46 = vld [vmem:[%s3511_s21 + $0xb8] sm:$0xff]  ;;  %v4562_v32 = vld [vmem:[%s3511_s21 + $0xc0] sm:$0xff]  ;;  %v2787_v3 = vld [vmem:[%s5016_s3 + $0x13] ss:$0 sm:$0xff] }
 0x1c6   : >> { %v1536_v42 = vmul.f32 %v2776_v29, %v1520_v35  ;;  %v1537_v20 = vmul.f32 %v2776_v29, %v1521_v6  ;;  %v1538_v10 = vmul.f32 %v2776_v29, %v1522_v9  ;;  %v1539_v63 = vadd.f32 %v1531_v41, %v1497_v0 }
 0x1c7   : >> { %v1540_v55 = vadd.f32 %v1532_v59, %v1498_v18  ;;  %v1541_v34 = vadd.f32 %v1533_v50, %v1499_v61  ;;  %v1542_v15 = vadd.f32 %v1534_v13, %v1500_v12  ;;  %v1543_v24 = vadd.f32 %v1535_v53, %v1501_v17  ;;  %v4592_v50 = vld [vmem:[%s3511_s21 + $0x99] sm:$0xff] }
 0x1c8   : >> { %v1544_v29 = vadd.f32 %v1536_v42, %v1502_v48  ;;  %v1545_v0 = vadd.f32 %v1537_v20, %v1503_v21  ;;  %v1546_v35 = vadd.f32 %v1538_v10, %v1504_v37  ;;  %vm5636_vm13 = vcmp.ge.s32.totalorder %v5590_v19, 1 }
 0x1c9   : >> { %v1557_v6 = vsel %vm5636_vm13, %v4371_v43, 0.0  ;;  %vm5637_vm6 = vcmp.ge.s32.totalorder %v5592_v23, 1  ;;  %vm5638_vm9 = vcmp.ge.s32.totalorder %v5594_v40, 1  ;;  %vm5639_vm11 = vcmp.ge.s32.totalorder %v5596_v44, 1 }
 0x1ca   : >> { %v1558_v17 = vsel %vm5637_vm6, %v4448_v39, 0.0  ;;  %v1559_v18 = vsel %vm5638_vm9, %v4547_v45, 0.0  ;;  %v1560_v61 = vsel %vm5639_vm11, %v4550_v11, 0.0  ;;  %vm5640_vm0 = vcmp.ge.s32.totalorder %v5598_v49, 1 }
 0x1cb   : >> { %v1561_v10 = vsel %vm5640_vm0, %v4553_v60, 0.0  ;;  %vm5641_vm13 = vcmp.ge.s32.totalorder %v5600_v5, 1  ;;  %vm5642_vm6 = vcmp.ge.s32.totalorder %v5602_v54, 1  ;;  %vm5643_vm9 = vcmp.ge.s32.totalorder %v5604_v26, 1  ;;  %v4598_v54 = vld [vmem:[%s3511_s21 + $0xa9] sm:$0xff]  ;;  %v4601_v5 = vld [vmem:[%s3511_s21 + $0xb1] sm:$0xff] }
 0x1cc   : >> { %v1562_v43 = vsel %vm5641_vm13, %v4556_v8, 0.0  ;;  %v1563_v12 = vsel %vm5642_vm6, %v4559_v46, 0.0  ;;  %v1564_v48 = vsel %vm5643_vm9, %v4562_v32, 0.0  ;;  %v1573_v21 = vmul.f32 %v2787_v3, %v1557_v6 }
 0x1cd   : >> { %v1574_v37 = vmul.f32 %v2787_v3, %v1558_v17  ;;  %v1575_v9 = vmul.f32 %v2787_v3, %v1559_v18  ;;  %v1576_v41 = vmul.f32 %v2787_v3, %v1560_v61  ;;  %v1577_v59 = vmul.f32 %v2787_v3, %v1561_v10  ;;  %v4604_v18 = vld [vmem:[%s3511_s21 + $0xb9] sm:$0xff]  ;;  %v4607_v61 = vld [vmem:[%s3511_s21 + $0xc1] sm:$0xff]  ;;  %v2798_v10 = vld [vmem:[%s5016_s3 + $0x14] ss:$0 sm:$0xff] }
 0x1ce   : >> { %v1578_v13 = vmul.f32 %v2787_v3, %v1562_v43  ;;  %v1579_v53 = vmul.f32 %v2787_v3, %v1563_v12  ;;  %v1580_v42 = vmul.f32 %v2787_v3, %v1564_v48  ;;  %v1581_v20 = vadd.f32 %v1573_v21, %v1539_v63  ;;  %v5644_v12 = vld [vmem:[#allocation42_spill] sm:$0xff] }
 0x1cf   : >> { %v1582_v26 = vadd.f32 %v1574_v37, %v1540_v55  ;;  %v1583_v6 = vadd.f32 %v1575_v9, %v1541_v34  ;;  %v1584_v17 = vadd.f32 %v1576_v41, %v1542_v15  ;;  %v1585_v49 = vadd.f32 %v1577_v59, %v1543_v24  ;;  %v5647_v24 = vld [vmem:[#allocation47_spill] sm:$0xff]  ;;  %v5653_v59 = vld [vmem:[#allocation56_spill] sm:$0xff] }
 0x1d0   : >> { %v1586_v3 = vadd.f32 %v1578_v13, %v1544_v29  ;;  %v1587_v63 = vadd.f32 %v1579_v53, %v1545_v0  ;;  %v1588_v43 = vadd.f32 %v1580_v42, %v1546_v35  ;;  %vm5645_vm11 = vnez %v5644_v12  ;;  %v4637_v9 = vld [vmem:[%s3511_s21 + $0xc7] sm:$0xff] }
 0x1d1   : >> { %v1599_v48 = vsel %vm5645_vm11, %v4382_v22, 0.0  ;;  %v1600_v34 = vsel %vm5547_vm10, %v4478_v2, 0.0  ;;  %vm5648_vm0 = vnez %v5647_v24  ;;  %v1602_v37 = vsel %vm5551_vm7, %v4595_v14, 0.0 }
 0x1d2   : >> { %v1601_v15 = vsel %vm5648_vm0, %v4592_v50, 0.0  ;;  %v1603_v0 = vsel %vm5553_vm14, %v4598_v54, 0.0  ;;  %v1604_v22 = vsel %vm5555_vm12, %v4601_v5, 0.0  ;;  %v1605_v41 = vsel %vm5557_vm1, %v4604_v18, 0.0 }
 0x1d3   : >> { %vm5654_vm10 = vnez %v5653_v59  ;;  %v1615_v53 = vmul.f32 %v2798_v10, %v1599_v48  ;;  %v1616_v42 = vmul.f32 %v2798_v10, %v1600_v34  ;;  %v1617_v12 = vmul.f32 %v2798_v10, %v1601_v15  ;;  %v2809_v59 = vld [vmem:[%s5016_s3 + $0x15] ss:$0 sm:$0xff] }
 0x1d4   : >> { %v1606_v13 = vsel %vm5654_vm10, %v4607_v61, 0.0  ;;  %v1618_v55 = vmul.f32 %v2798_v10, %v1602_v37  ;;  %v1619_v24 = vmul.f32 %v2798_v10, %v1603_v0  ;;  %v1620_v21 = vmul.f32 %v2798_v10, %v1604_v22 }
 0x1d5   : >> { %v1621_v29 = vmul.f32 %v2798_v10, %v1605_v41  ;;  %v1622_v44 = vmul.f32 %v2798_v10, %v1606_v13  ;;  %v1623_v40 = vadd.f32 %v1615_v53, %v1581_v20  ;;  %v1624_v35 = vadd.f32 %v1616_v42, %v1582_v26 }
 0x1d6   : >> { %v1625_v23 = vadd.f32 %v1617_v12, %v1583_v6  ;;  %v1626_v19 = vadd.f32 %v1618_v55, %v1584_v17  ;;  %v1627_v38 = vadd.f32 %v1619_v24, %v1585_v49  ;;  %v1628_v47 = vadd.f32 %v1620_v21, %v1586_v3 }
 0x1d7   : >> { %v1629_v48 = vadd.f32 %v1621_v29, %v1587_v63  ;;  %v1630_v34 = vadd.f32 %v1622_v44, %v1588_v43  ;;  %vm5655_vm12 = vnez %v5286_v27  ;;  %vm5656_vm1 = vnez %v5290_v30 }
 0x1d8   : >> { %v1641_v15 = vsel %vm5655_vm12, %v4418_v25, 0.0  ;;  %v1642_v26 = vsel %vm5656_vm1, %v4502_v52, 0.0  ;;  %v1643_v49 = vsel %vm3557_vm4, %v4505_v62, 0.0  ;;  %vm5657_vm7 = vnez %v5439_v36 }
 0x1d9   : >> { %v1644_v20 = vsel %vm5657_vm7, %v4508_v56, 0.0  ;;  %vm5658_vm14 = vnez %v5448_v4  ;;  %vm5659_vm13 = vnez %v5456_v28  ;;  %vm5660_vm6 = vnez %v5464_v51  ;;  %v2820_v4 = vld [vmem:[%s5016_s3 + $0x16] ss:$0 sm:$0xff] }
 0x1da   : >> { %v1645_v44 = vsel %vm5658_vm14, %v4511_v57, 0.0  ;;  %v1646_v27 = vsel %vm5659_vm13, %v4514_v33, 0.0  ;;  %v1647_v30 = vsel %vm5660_vm6, %v4517_v7, 0.0  ;;  %vm5661_vm9 = vnez %v5471_v31  ;;  %v4670_v31 = vld [vmem:[%s3511_s21 + $0xc8] sm:$0xff] }
 0x1db   : >> { %v1648_v16 = vsel %vm5661_vm9, %v4637_v9, 0.0  ;;  %v1657_v25 = vmul.f32 %v2809_v59, %v1641_v15  ;;  %v1658_v36 = vmul.f32 %v2809_v59, %v1642_v26  ;;  %v1659_v6 = vmul.f32 %v2809_v59, %v1643_v49 }
 0x1dc   : >> { %v1660_v17 = vmul.f32 %v2809_v59, %v1644_v20  ;;  %v1661_v10 = vmul.f32 %v2809_v59, %v1645_v44  ;;  %v1662_v28 = vmul.f32 %v2809_v59, %v1646_v27  ;;  %v1663_v3 = vmul.f32 %v2809_v59, %v1647_v30  ;;  %v5662_v44 = vld [vmem:[#allocation39_spill] sm:$0xff]  ;;  %v5664_v30 = vld [vmem:[#allocation40_spill] sm:$0xff] }
 0x1dd   : >> { %v1664_v63 = vmul.f32 %v2809_v59, %v1648_v16  ;;  %v1665_v43 = vadd.f32 %v1657_v25, %v1623_v40  ;;  %v1666_v51 = vadd.f32 %v1658_v36, %v1624_v35  ;;  %v1667_v37 = vadd.f32 %v1659_v6, %v1625_v23  ;;  %v5666_v25 = vld [vmem:[#allocation41_spill] sm:$0xff]  ;;  %v5668_v6 = vld [vmem:[#allocation43_spill] sm:$0xff] }
 0x1de   : >> { %v1668_v0 = vadd.f32 %v1660_v17, %v1626_v19  ;;  %v1669_v22 = vadd.f32 %v1661_v10, %v1627_v38  ;;  %v1670_v41 = vadd.f32 %v1662_v28, %v1628_v47  ;;  %v1671_v13 = vadd.f32 %v1663_v3, %v1629_v48  ;;  %v2831_v48 = vld [vmem:[%s5016_s3 + $0x17] ss:$0 sm:$0xff]  ;;  %v5672_v17 = vld [vmem:[#allocation45_spill] sm:$0xff] }
 0x1df   : >> { %v1672_v53 = vadd.f32 %v1664_v63, %v1630_v34  ;;  %v1691_v42 = vmul.f32 %v2820_v4, %v4448_v39  ;;  %v1692_v12 = vmul.f32 %v2820_v4, %v4547_v45  ;;  %v1693_v55 = vmul.f32 %v2820_v4, %v4550_v11  ;;  %v4681_v39 = vld [vmem:[%s3511_s21 + $0xc9] sm:$0xff] }
 0x1e0   : >> { %v1694_v24 = vmul.f32 %v2820_v4, %v4553_v60  ;;  %v1695_v40 = vmul.f32 %v2820_v4, %v4556_v8  ;;  %v1696_v23 = vmul.f32 %v2820_v4, %v4559_v46  ;;  %v1697_v38 = vmul.f32 %v2820_v4, %v4562_v32 }
 0x1e1   : >> { %v1698_v19 = vmul.f32 %v2820_v4, %v4670_v31  ;;  %v1699_v47 = vadd.f32 %v1691_v42, %v1665_v43  ;;  %v1700_v21 = vadd.f32 %v1692_v12, %v1666_v51  ;;  %v1701_v29 = vadd.f32 %v1693_v55, %v1667_v37  ;;  %v2840_v12 = vld [vmem:[%s3511_s21 + $0xcf] sm:$0xff]  ;;  %v2842_v55 = vld [vmem:[%s5016_s3 + $0x18] ss:$0 sm:$0xff] }
 0x1e2   : >> { %v1702_v35 = vadd.f32 %v1694_v24, %v1668_v0  ;;  %v1703_v59 = vadd.f32 %v1695_v40, %v1669_v22  ;;  %v1704_v34 = vadd.f32 %v1696_v23, %v1670_v41  ;;  %v1705_v15 = vadd.f32 %v1697_v38, %v1671_v13  ;;  %v5674_v38 = vld [vmem:[#allocation15_spill] sm:$0xff] }
 0x1e3   : >> { %v1706_v26 = vadd.f32 %v1698_v19, %v1672_v53  ;;  %v1717_v49 = vsel %vm5563_vm3, %v4478_v2, 0.0  ;;  %v1718_v20 = vsel %vm5564_vm2, %v4592_v50, 0.0  ;;  %vm5663_vm4 = vnez %v5662_v44  ;;  %v5670_v2 = vld [vmem:[#allocation44_spill] sm:$0xff] }
 0x1e4   : >> { %v1719_v27 = vsel %vm5663_vm4, %v4595_v14, 0.0  ;;  %vm5665_vm11 = vnez %v5664_v30  ;;  %vm5667_vm0 = vnez %v5666_v25  ;;  %vm5669_vm10 = vnez %v5668_v6 }
 0x1e5   : >> { %v1720_v16 = vsel %vm5665_vm11, %v4598_v54, 0.0  ;;  %v1721_v36 = vsel %vm5667_vm0, %v4601_v5, 0.0  ;;  %v1722_v1 = vsel %vm5669_vm10, %v4604_v18, 0.0  ;;  %vm5671_vm3 = vnez %v5670_v2 }
 0x1e6   : >> { %v1723_v58 = vsel %vm5671_vm3, %v4607_v61, 0.0  ;;  %vm5673_vm2 = vnez %v5672_v17  ;;  %v1733_v4 = vmul.f32 %v2831_v48, %v1717_v49  ;;  %v1734_v28 = vmul.f32 %v2831_v48, %v1718_v20  ;;  %v5676_v49 = vld [vmem:[#allocation20_spill] sm:$0xff]  ;;  %v5688_v20 = vld [vmem:[#allocation14_spill] sm:$0xff] }
 0x1e7   : >> { %v1724_v10 = vsel %vm5673_vm2, %v4681_v39, 0.0  ;;  %v1735_v3 = vmul.f32 %v2831_v48, %v1719_v27  ;;  %v1736_v63 = vmul.f32 %v2831_v48, %v1720_v16  ;;  %v1737_v43 = vmul.f32 %v2831_v48, %v1721_v36  ;;  %v2851_v17 = vld [vmem:[%s3511_s21 + $0xd0] sm:$0xff] }
 0x1e8   : >> { %v1738_v51 = vmul.f32 %v2831_v48, %v1722_v1  ;;  %v1739_v37 = vmul.f32 %v2831_v48, %v1723_v58  ;;  %v1740_v0 = vmul.f32 %v2831_v48, %v1724_v10  ;;  %v1741_v22 = vadd.f32 %v1733_v4, %v1699_v47  ;;  %v5682_v48 = vld [vmem:[#allocation27_spill] sm:$0xff] }
 0x1e9   : >> { %v1742_v41 = vadd.f32 %v1734_v28, %v1700_v21  ;;  %v1743_v13 = vadd.f32 %v1735_v3, %v1701_v29  ;;  %v1744_v53 = vadd.f32 %v1736_v63, %v1702_v35  ;;  %v1745_v42 = vadd.f32 %v1737_v43, %v1703_v59  ;;  %v5678_v21 = vld [vmem:[#allocation21_spill] sm:$0xff]  ;;  %v5680_v35 = vld [vmem:[#allocation26_spill] sm:$0xff]  ;;  %v5692_v43 = vld [vmem:[#allocation7_spill] sm:$0xff] }
 0x1ea   : >> { %v1746_v24 = vadd.f32 %v1738_v51, %v1704_v34  ;;  %v1747_v40 = vadd.f32 %v1739_v37, %v1705_v15  ;;  %v1748_v23 = vadd.f32 %v1740_v0, %v1706_v26  ;;  %vm5675_vm12 = vnez %v5674_v38  ;;  %v5684_v15 = vld [vmem:[#allocation29_spill] sm:$0xff]  ;;  %v5686_v26 = vld [vmem:[#allocation30_spill] sm:$0xff]  ;;  %v5694_v37 = vld [vmem:[#allocation8_spill] sm:$0xff] }
 0x1eb   : >> { %v1759_v19 = vsel %vm5675_vm12, %v4502_v52, 0.0  ;;  %vm5677_vm1 = vnez %v5676_v49  ;;  %vm5679_vm7 = vnez %v5678_v21  ;;  %vm5681_vm14 = vnez %v5680_v35  ;;  %v5690_v3 = vld [vmem:[#allocation6_spill] sm:$0xff] }
 0x1ec   : >> { %v1760_v47 = vsel %vm5677_vm1, %v4505_v62, 0.0  ;;  %v1761_v29 = vsel %vm5679_vm7, %v4508_v56, 0.0  ;;  %v1762_v59 = vsel %vm5681_vm14, %v4511_v57, 0.0  ;;  %vm5683_vm13 = vnez %v5682_v48 }
 0x1ed   : >> { %v1763_v34 = vsel %vm5683_vm13, %v4514_v33, 0.0  ;;  %vm5685_vm6 = vnez %v5684_v15  ;;  %vm5687_vm9 = vnez %v5686_v26  ;;  %vm5689_vm4 = vnez %v5688_v20 }
 0x1ee   : >> { %v1764_v52 = vsel %vm5685_vm6, %v4517_v7, 0.0  ;;  %v1765_v62 = vsel %vm5687_vm9, %v4637_v9, 0.0  ;;  %v1766_v56 = vsel %vm5689_vm4, %v2840_v12, 0.0  ;;  %v1775_v44 = vmul.f32 %v2842_v55, %v1759_v19  ;;  %v2853_v9 = vld [vmem:[%s5016_s3 + $0x19] ss:$0 sm:$0xff]  ;;  %v5702_v12 = vld [vmem:[#allocation12_spill] sm:$0xff] }
 0x1ef   : >> { %v1776_v27 = vmul.f32 %v2842_v55, %v1760_v47  ;;  %v1777_v30 = vmul.f32 %v2842_v55, %v1761_v29  ;;  %v1778_v57 = vmul.f32 %v2842_v55, %v1762_v59  ;;  %v1779_v16 = vmul.f32 %v2842_v55, %v1763_v34  ;;  %v2862_v59 = vld [vmem:[%s3511_s21 + $0xd1] sm:$0xff] }
 0x1f0   : >> { %v1780_v25 = vmul.f32 %v2842_v55, %v1764_v52  ;;  %v1781_v36 = vmul.f32 %v2842_v55, %v1765_v62  ;;  %v1782_v33 = vmul.f32 %v2842_v55, %v1766_v56  ;;  %v1783_v6 = vadd.f32 %v1775_v44, %v1741_v22  ;;  %v5696_v22 = vld [vmem:[#allocation9_spill] sm:$0xff] }
 0x1f1   : >> { %v1784_v1 = vadd.f32 %v1776_v27, %v1742_v41  ;;  %v1785_v2 = vadd.f32 %v1777_v30, %v1743_v13  ;;  %v1786_v7 = vadd.f32 %v1778_v57, %v1744_v53  ;;  %v1787_v58 = vadd.f32 %v1779_v16, %v1745_v42  ;;  %v5698_v13 = vld [vmem:[#allocation10_spill] sm:$0xff]  ;;  %v5700_v42 = vld [vmem:[#allocation11_spill] sm:$0xff]  ;;  %v5704_v55 = vld [vmem:[#allocation13_spill] sm:$0xff] }
 0x1f2   : >> { %v1788_v10 = vadd.f32 %v1780_v25, %v1746_v24  ;;  %v1789_v4 = vadd.f32 %v1781_v36, %v1747_v40  ;;  %v1790_v28 = vadd.f32 %v1782_v33, %v1748_v23  ;;  %vm5691_vm11 = vcmp.lt.s32.totalorder %v5690_v3, 7  ;;  %v5709_v27 = vld [vmem:[#allocation31_spill] sm:$0xff]  ;;  %v5711_v57 = vld [vmem:[#allocation22_spill] sm:$0xff]  ;;  %v5713_v25 = vld [vmem:[#allocation33_spill] sm:$0xff] }
 0x1f3   : >> { %v1801_v63 = vsel %vm5691_vm11, %v4547_v45, 0.0  ;;  %vm5693_vm0 = vcmp.lt.s32.totalorder %v5692_v43, 7  ;;  %vm5695_vm10 = vcmp.lt.s32.totalorder %v5694_v37, 7  ;;  %vm5697_vm3 = vcmp.lt.s32.totalorder %v5696_v22, 7  ;;  %v5715_v36 = vld [vmem:[#allocation23_spill] sm:$0xff] }
 0x1f4   : >> { %v1802_v51 = vsel %vm5693_vm0, %v4550_v11, 0.0  ;;  %v1803_v0 = vsel %vm5695_vm10, %v4553_v60, 0.0  ;;  %v1804_v41 = vsel %vm5697_vm3, %v4556_v8, 0.0  ;;  %vm5699_vm2 = vcmp.lt.s32.totalorder %v5698_v13, 7  ;;  %v5717_v33 = vld [vmem:[#allocation35_spill] sm:$0xff] }
 0x1f5   : >> { %v1805_v53 = vsel %vm5699_vm2, %v4559_v46, 0.0  ;;  %vm5701_vm12 = vcmp.lt.s32.totalorder %v5700_v42, 7  ;;  %vm5703_vm1 = vcmp.lt.s32.totalorder %v5702_v12, 7  ;;  %vm5705_vm7 = vcmp.lt.s32.totalorder %v5704_v55, 7 }
 0x1f6   : >> { %v1806_v45 = vsel %vm5701_vm12, %v4562_v32, 0.0  ;;  %v1807_v11 = vsel %vm5703_vm1, %v4670_v31, 0.0  ;;  %v1808_v60 = vsel %vm5705_vm7, %v2851_v17, 0.0  ;;  %v1817_v24 = vmul.f32 %v2853_v9, %v1801_v63  ;;  %v2864_v31 = vld [vmem:[%s5016_s3 + $0x1a] ss:$0 sm:$0xff] }
 0x1f7   : >> { %v1818_v40 = vmul.f32 %v2853_v9, %v1802_v51  ;;  %v1819_v23 = vmul.f32 %v2853_v9, %v1803_v0  ;;  %v1820_v8 = vmul.f32 %v2853_v9, %v1804_v41  ;;  %v1821_v38 = vmul.f32 %v2853_v9, %v1805_v53 }
 0x1f8   : >> { %v1822_v19 = vmul.f32 %v2853_v9, %v1806_v45  ;;  %v1823_v49 = vmul.f32 %v2853_v9, %v1807_v11  ;;  %v1824_v46 = vmul.f32 %v2853_v9, %v1808_v60  ;;  %v1825_v47 = vadd.f32 %v1817_v24, %v1783_v6 }
 0x1f9   : >> { %v1826_v21 = vadd.f32 %v1818_v40, %v1784_v1  ;;  %v1827_v29 = vadd.f32 %v1819_v23, %v1785_v2  ;;  %v1828_v32 = vadd.f32 %v1820_v8, %v1786_v7  ;;  %v1829_v35 = vadd.f32 %v1821_v38, %v1787_v58 }
 0x1fa   : >> { %v1830_v48 = vadd.f32 %v1822_v19, %v1788_v10  ;;  %v1831_v34 = vadd.f32 %v1823_v49, %v1789_v4  ;;  %v1832_v15 = vadd.f32 %v1824_v46, %v1790_v28  ;;  %v1843_v26 = vsel %vm4112_vm15, %v4592_v50, 0.0 }
 0x1fb   : >> { %v1844_v20 = vsel %vm5608_vm8, %v4595_v14, 0.0  ;;  %v1845_v44 = vsel %vm4128_vm5, %v4598_v54, 0.0  ;;  %vm5710_vm14 = vnez %v5709_v27  ;;  %vm5712_vm13 = vnez %v5711_v57 }
 0x1fc   : >> { %v1846_v30 = vsel %vm5710_vm14, %v4601_v5, 0.0  ;;  %v1847_v16 = vsel %vm5712_vm13, %v4604_v18, 0.0  ;;  %vm5714_vm6 = vnez %v5713_v25  ;;  %vm5716_vm15 = vnez %v5715_v36  ;;  %v2865_v18 = vld [vmem:[%s5017_s4] ss:$0 sm:$0xff] }
 0x1fd   : >> { %v1848_v50 = vsel %vm5714_vm6, %v4607_v61, 0.0  ;;  %v1849_v14 = vsel %vm5716_vm15, %v4681_v39, 0.0  ;;  %vm5718_vm8 = vnez %v5717_v33  ;;  %v1859_v54 = vmul.f32 %v2864_v31, %v1843_v26 }
 0x1fe   : >> { %v1850_v6 = vsel %vm5718_vm8, %v2862_v59, 0.0  ;;  %v1860_v1 = vmul.f32 %v2864_v31, %v1844_v20  ;;  %v1861_v2 = vmul.f32 %v2864_v31, %v1845_v44  ;;  %v1862_v7 = vmul.f32 %v2864_v31, %v1846_v30 }
 0x1ff   : >> { %v1863_v5 = vmul.f32 %v2864_v31, %v1847_v16  ;;  %v1864_v58 = vmul.f32 %v2864_v31, %v1848_v50  ;;  %v1865_v17 = vmul.f32 %v2864_v31, %v1849_v14  ;;  %v1866_v9 = vmul.f32 %v2864_v31, %v1850_v6 }
 0x200   : >> { %v1867_v61 = vadd.f32 %v1859_v54, %v1825_v47  ;;  %v1868_v10 = vadd.f32 %v1860_v1, %v1826_v21  ;;  %v1869_v4 = vadd.f32 %v1861_v2, %v1827_v29  ;;  %v1870_v28 = vadd.f32 %v1862_v7, %v1828_v32 }
 0x201   : >> { %v1871_v39 = vadd.f32 %v1863_v5, %v1829_v35  ;;  %v1872_v3 = vadd.f32 %v1864_v58, %v1830_v48  ;;  %v1873_v63 = vadd.f32 %v1865_v17, %v1831_v34  ;;  %v1874_v43 = vadd.f32 %v1866_v9, %v1832_v15 }
 0x202   : >> { %v4794_v51 = vadd.f32 %v2865_v18, %v1867_v61  ;;  %v4796_v37 = vadd.f32 %v2865_v18, %v1868_v10  ;;  %v4798_v0 = vadd.f32 %v2865_v18, %v1869_v4  ;;  %v4800_v22 = vadd.f32 %v2865_v18, %v1870_v28 }
 0x203   : >> { %v4802_v41 = vadd.f32 %v2865_v18, %v1871_v39  ;;  %v4804_v13 = vadd.f32 %v2865_v18, %v1872_v3  ;;  %v4806_v53 = vadd.f32 %v2865_v18, %v1873_v63  ;;  %v4808_v42 = vadd.f32 %v2865_v18, %v1874_v43 }
 0x204   : >> { %v1890_v45 = vand.u32 2147483647, %v4794_v51  ;;  %v1891_v12 = vand.u32 2147483647, %v4796_v37  ;;  %v1892_v11 = vand.u32 2147483647, %v4798_v0 }
 0x205   : >> { %v1893_v55 = vand.u32 2147483647, %v4800_v22  ;;  %v1894_v60 = vand.u32 2147483647, %v4802_v41  ;;  %v1895_v24 = vand.u32 2147483647, %v4804_v13 }
 0x206   : >> { %v1896_v40 = vand.u32 2147483647, %v4806_v53  ;;  %v1897_v23 = vand.u32 2147483647, %v4808_v42  ;;  %v1898_v8 = vsub.f32 0.0, %v1890_v45  ;;  %v1899_v38 = vsub.f32 0.0, %v1891_v12 }
 0x207   : >> { %v1900_v19 = vsub.f32 0.0, %v1892_v11  ;;  %v1901_v49 = vsub.f32 0.0, %v1893_v55  ;;  %v1902_v46 = vsub.f32 0.0, %v1894_v60  ;;  %v1903_v47 = vsub.f32 0.0, %v1895_v24 }
 0x208   : >> { %v1904_v21 = vsub.f32 0.0, %v1896_v40  ;;  %v1906_v29 = vmul.f32 1.442695, %v1898_v8  ;;  %v1908_v32 = vmul.f32 1.442695, %v1899_v38  ;;  %v1905_v35 = vsub.f32 0.0, %v1897_v23 }
 0x209   : >> { %v1910_v59 = vmul.f32 1.442695, %v1900_v19  ;;  %v1912_v31 = vmul.f32 1.442695, %v1901_v49  ;;  %v1914_v48 = vmul.f32 1.442695, %v1902_v46 }
 0x20a   : >> { %3180 = vpow2.f32 %v1906_v29  ;;  %v1916_v34 = vmul.f32 1.442695, %v1903_v47  ;;  %v1918_v15 = vmul.f32 1.442695, %v1904_v21  ;;  %v1920_v52 = vmul.f32 1.442695, %v1905_v35 }
 0x20b   : >> { %3182 = vpow2.f32 %v1908_v32  ;;  %vm1946_vm5 = vcmp.ge.f32.partialorder %v4794_v51, 0.0  ;;  %vm1947_vm9 = vcmp.ge.f32.partialorder %v4796_v37, 0.0  ;;  %vm1948_vm4 = vcmp.ge.f32.partialorder %v4798_v0, 0.0 }
 0x20c   : >> { %3184 = vpow2.f32 %v1910_v59  ;;  %vm1949_vm11 = vcmp.ge.f32.partialorder %v4800_v22, 0.0  ;;  %vm1950_vm0 = vcmp.ge.f32.partialorder %v4802_v41, 0.0  ;;  %vm1951_vm10 = vcmp.ge.f32.partialorder %v4804_v13, 0.0 }
 0x20d   : >> { %3186 = vpow2.f32 %v1912_v31  ;;  %vm1952_vm3 = vcmp.ge.f32.partialorder %v4806_v53, 0.0  ;;  %vm1953_vm2 = vcmp.ge.f32.partialorder %v4808_v42, 0.0  ;;  %vm3262_vm12 = vmmov (%p662_p5), 0  }
 0x20e   : >> { %3188 = vpow2.f32 %v1914_v48  ;;  %vm2106_vm1 = vcmask (%p662_p5), 1043456   ;;  %vm2102_vm14 = vcmask (%p662_p5), 31744  }
 0x20f   : >> { %3190 = vpow2.f32 %v1916_v34 }
 0x210   : >> { %3192 = vpow2.f32 %v1918_v15 }
 0x211   : >> { %3194 = vpow2.f32 %v1920_v52  ;;  %v5719_v52 = vld [vmem:[#allocation4_spill] sm:$0xff] }
 0x214   : >> { %v3181_v26 = vpop.eup %3180 }
 0x215   : >> { %v3183_v62 = vpop.eup %3182  ;;  %v1922_v20 = vadd.f32 1.0, %v3181_v26 }
 0x216   : >> { %v3185_v56 = vpop.eup %3184  ;;  %v1923_v44 = vadd.f32 1.0, %v3183_v62 }
 0x217   : >> { %v3187_v27 = vpop.eup %3186  ;;  %v1924_v30 = vadd.f32 1.0, %v3185_v56  ;;  %3196 = vrcp.f32 %v1922_v20  ;;  %v5721_v20 = vmov (%p662_p5), 0.0  }
 0x218   : >> { %v3189_v57 = vpop.eup %3188  ;;  %v1925_v16 = vadd.f32 1.0, %v3187_v27  ;;  %3198 = vrcp.f32 %v1923_v44  ;;  %2978 = vmatprep.subr.mxu1 (%p662_p5), %v5721_v20  ;;  %2975 = vmatprep.mubr.msk.f32.mxu0 (%p662_p5), %vm3262_vm12, %v5721_v20 }
 0x219   : >> { %v3191_v25 = vpop.eup %3190  ;;  %v1926_v50 = vadd.f32 1.0, %v3189_v57  ;;  %3200 = vrcp.f32 %v1924_v30  ;;  %2980 = vmatprep.mubr.msk.f32.mxu1 (%p662_p5), %vm3262_vm12, %v5721_v20 }
 0x21a   : >> { %v3193_v36 = vpop.eup %3192  ;;  %v1927_v14 = vadd.f32 1.0, %v3191_v25  ;;  %3202 = vrcp.f32 %v1925_v16  ;;  %v2007_v16 = vld [vmem:[%s5018_s5 + $0x28] sm:$0xff] (%p662_p5) }
 0x21b   : >> { %v3195_v33 = vpop.eup %3194  ;;  %v1928_v6 = vadd.f32 1.0, %v3193_v36  ;;  %3204 = vrcp.f32 %v1926_v50  ;;  %v2008_v50 = vld [vmem:[%s5018_s5 + $0x30] sm:$0xff] (%p662_p5) }
 0x21c   : >> { %v1929_v54 = vadd.f32 1.0, %v3195_v33  ;;  %3206 = vrcp.f32 %v1927_v14 }
 0x21d   : >> { %3208 = vrcp.f32 %v1928_v6  ;;  %v2011_v6 = vld [vmem:[%s5018_s5 + $0x48] sm:$0xff] (%p662_p5) }
 0x21e   : >> { %3210 = vrcp.f32 %v1929_v54 }
 0x221   : >> { %v3197_v1 = vpop.eup %3196 }
 0x222   : >> { %v3199_v2 = vpop.eup %3198  ;;  %v1954_v7 = vmul.f32 %v3197_v1, %v3181_v26 }
 0x223   : >> { %v3201_v5 = vpop.eup %3200  ;;  %v1955_v18 = vmul.f32 %v3199_v2, %v3183_v62  ;;  %v2004_v62 = vld [vmem:[%s5018_s5 + $0x10] sm:$0xff] (%p662_p5) }
 0x224   : >> { %v3203_v58 = vpop.eup %3202  ;;  %v1956_v17 = vmul.f32 %v3201_v5, %v3185_v56  ;;  %v1962_v9 = vsel %vm1946_vm5, %v3197_v1, %v1954_v7  ;;  %v3261_v56 = vmov (%p662_p5), 0.0|0.0   ;;  %v2012_v1 = vld [vmem:[%s5018_s5 + $0x50] sm:$0xff] (%p662_p5) }
 0x225   : >> { %v3205_v61 = vpop.eup %3204  ;;  %v1957_v10 = vmul.f32 %v3203_v58, %v3187_v27  ;;  %v1963_v4 = vsel %vm1947_vm9, %v3199_v2, %v1955_v18  ;;  %v1970_v28 = vmul.f32 %v1962_v9, %v4794_v51  ;;  %3031 = vmatprep.subr.bf16.mxu0 (%p662_p5), %v3261_v56  ;;  %v2005_v27 = vld [vmem:[%s5018_s5 + $0x18] sm:$0xff] (%p662_p5)  ;;  %v2015_v18 = vld [vmem:[%s5018_s5 + $0x68] sm:$0xff] (%p662_p5) }
 0x226   : >> { %v3207_v39 = vpop.eup %3206  ;;  %v1958_v3 = vmul.f32 %v3205_v61, %v3189_v57  ;;  %v1964_v63 = vsel %vm1948_vm4, %v3201_v5, %v1956_v17  ;;  %v1971_v43 = vmul.f32 %v1963_v4, %v4796_v37  ;;  %v3035_v30 = vpack.c.bf16 (%p662_p5), %v2005_v27, %v2004_v62  ;;  %v2006_v57 = vld [vmem:[%s5018_s5 + $0x20] sm:$0xff] (%p662_p5)  ;;  %v2013_v2 = vld [vmem:[%s5018_s5 + $0x58] sm:$0xff] (%p662_p5)  ;;  %v2016_v17 = vld [vmem:[%s5018_s5 + $0x70] sm:$0xff] (%p662_p5) }
 0x227   : >> { %v3209_v45 = vpop.eup %3208  ;;  %v1959_v12 = vmul.f32 %v3207_v39, %v3191_v25  ;;  %v1965_v11 = vsel %vm1949_vm11, %v3203_v58, %v1957_v10  ;;  %v1972_v55 = vmul.f32 %v1964_v63, %v4798_v0  ;;  %1979 = vst [vmem:[%s1978_s27] sm:$0xff] %v1970_v28  ;;  %v3038_v25 = vpack.c.bf16 (%p662_p5), %v2007_v16, %v2006_v57  ;;  %v2014_v5 = vld [vmem:[%s5018_s5 + $0x60] sm:$0xff] (%p662_p5)  ;;  %v2017_v9 = vld [vmem:[%s5018_s5 + $0x78] sm:$0xff] (%p662_p5) }
 0x228   : >> { %v3211_v60 = vpop.eup %3210  ;;  %v1960_v51 = vmul.f32 %v3209_v45, %v3193_v36  ;;  %v1966_v24 = vsel %vm1950_vm0, %v3205_v61, %v1958_v3  ;;  %v1973_v40 = vmul.f32 %v1965_v11, %v4800_v22  ;;  %1980 = vst [vmem:[%s1978_s27 + $0x8] sm:$0xff] %v1971_v43  ;;  %v1987_v37 = vadd.f32 %v1971_v43, %v1970_v28  ;;  %v2009_v36 = vld [vmem:[%s5018_s5 + $0x38] sm:$0xff] (%p662_p5)  ;;  %v2100_v4 = vld [vmem:[%s5020_s7] sm:$0xf] (%p662_p5) }
 0x229   : >> { %v1961_v23 = vmul.f32 %v3211_v60, %v3195_v33  ;;  %v1967_v8 = vsel %vm1951_vm10, %v3207_v39, %v1959_v12  ;;  %v1974_v38 = vmul.f32 %v1966_v24, %v4802_v41  ;;  %1981 = vst [vmem:[%s1978_s27 + $0x10] sm:$0xff] %v1972_v55  ;;  %v3041_v14 = vpack.c.bf16 (%p662_p5), %v2009_v36, %v2008_v50  ;;  %v2010_v33 = vld [vmem:[%s5018_s5 + $0x40] sm:$0xff] (%p662_p5) }
 0x22a   : >> { %v1968_v0 = vsel %vm1952_vm3, %v3209_v45, %v1960_v51  ;;  %v1975_v19 = vmul.f32 %v1967_v8, %v4804_v13  ;;  %1982 = vst [vmem:[%s1978_s27 + $0x18] sm:$0xff] %v1973_v40  ;;  %v1988_v49 = vadd.f32 %v1987_v37, %v1972_v55  ;;  %v3044_v54 = vpack.c.bf16 (%p662_p5), %v2011_v6, %v2010_v33  ;;  %v2018_v28 = vld [vmem:[%s5019_s6] sm:$0x1] (%p662_p5) }
 0x22b   : >> { %v1969_v46 = vsel %vm1953_vm2, %v3211_v60, %v1961_v23  ;;  %v1976_v22 = vmul.f32 %v1968_v0, %v4806_v53  ;;  %1983 = vst [vmem:[%s1978_s27 + $0x20] sm:$0xff] %v1974_v38  ;;  %v2002_v53 = vld [vmem:[%s5018_s5] sm:$0xff] (%p662_p5)  ;;  %v3047_v7 = vpack.c.bf16 (%p662_p5), %v2013_v2, %v2012_v1  ;;  %v3050_v58 = vpack.c.bf16 (%p662_p5), %v2015_v18, %v2014_v5 }
 0x22c   : >> { %v1977_v47 = vmul.f32 %v1969_v46, %v4808_v42  ;;  %1984 = vst [vmem:[%s1978_s27 + $0x28] sm:$0xff] %v1975_v19  ;;  %v1989_v21 = vadd.f32 %v1988_v49, %v1973_v40  ;;  %v2003_v42 = vld [vmem:[%s5018_s5 + $0x8] sm:$0xff] (%p662_p5)  ;;  %v3053_v61 = vpack.c.bf16 (%p662_p5), %v2017_v9, %v2016_v17  ;;  %2979 = vmatpush3.msk.msra.mxu1 (%p662_p5), %vm2106_vm1, %v2100_v4  ;;  %v2101_v37 = vld [vmem:[%s5021_s8] sm:$0x1] (%p662_p5) }
 0x22d   : >> { %1985 = vst [vmem:[%s1978_s27 + $0x30] sm:$0xff] %v1976_v22  ;;  %v3032_v44 = vpack.c.bf16 (%p662_p5), %v2003_v42, %v2002_v53 }
 0x22e   : >> { %1986 = vst [vmem:[%s1978_s27 + $0x38] sm:$0xff] %v1977_v47  ;;  %v1990_v41 = vadd.f32 %v1989_v21, %v1974_v38 }
 0x22f   : > { %3033 = vmatpush3.bf16.msra.mxu0 (%p662_p5), %v3032_v44 }
 0x230   : >> { %v1991_v29 = vadd.f32 %v1990_v41, %v1975_v19  ;;  %3034 = vmatprep.subr.bf16.mxu0 (%p662_p5), %v3261_v56 }
 0x232   : >> { %v1992_v32 = vadd.f32 %v1991_v29, %v1976_v22 }
 0x233   : > { %3036 = vmatpush3.bf16.msra.mxu0 (%p662_p5), %v3035_v30 }
 0x234   : >> { %v1993_v35 = vadd.f32 %v1992_v32, %v1977_v47  ;;  %3037 = vmatprep.subr.bf16.mxu0 (%p662_p5), %v3261_v56 }
 0x236   : >> { %v1994_v59 = vrot.slane %v1993_v35, 4 }
 0x237   : > { %3039 = vmatpush3.bf16.msra.mxu0 (%p662_p5), %v3038_v25 }
 0x238   : >> { %v1995_v13 = vadd.f32 %v1994_v59, %v1993_v35  ;;  %3040 = vmatprep.subr.bf16.mxu0 (%p662_p5), %v3261_v56 }
 0x23a   : >> { %v1996_v31 = vrot.slane %v1995_v13, 2 }
 0x23b   : > { %3042 = vmatpush3.bf16.msra.mxu0 (%p662_p5), %v3041_v14 }
 0x23c   : >> { %v1997_v48 = vadd.f32 %v1996_v31, %v1995_v13  ;;  %3043 = vmatprep.subr.bf16.mxu0 (%p662_p5), %v3261_v56 }
 0x23e   : >> { %v1998_v34 = vrot.slane %v1997_v48, 1  ;;  %664 = sbr.rel (!%p662_p5) target bundleno = 280 (0x118), region = 185 }
 0x23f   : > { %3045 = vmatpush3.bf16.msra.mxu0 (%p662_p5), %v3044_v54 }
 0x240   : >> { %v1999_v15 = vadd.f32 %v1998_v34, %v1997_v48  ;;  %3046 = vmatprep.subr.bf16.mxu0 (%p662_p5), %v3261_v56 }
 0x242   : >> { %v2000_v26 = vadd.f32 %v5719_v52, %v1999_v15  }
 0x243   : > { %3048 = vmatpush3.bf16.msra.mxu0 (%p662_p5), %v3047_v7 }
 0x244   : >> { %v5720_v31 = vmov %v2000_v26  ;;  %3049 = vmatprep.subr.bf16.mxu0 (%p662_p5), %v3261_v56  ;;  %v2001_v10 = vmul.f32 (%p662_p5), 0.001953125, %v2000_v26 }
 0x247   : > { %3051 = vmatpush3.bf16.msra.mxu0 %v3050_v58 }
 0x248   : > { %3052 = vmatprep.subr.bf16.mxu0 %v3261_v56 }
 0x24b   : > { %3054 = vmatpush3.bf16.msra.mxu0 %v3053_v61 }
 0x24e   : > { %2976 = vmatmul.mubr.f32.vlgmr.msra.gmra.mrb[0].mxu0 %v2001_v10 }
 0x321   : > { %v2085_v39 = vpop.f32.mrb[0].mxu0 }
 0x322   : > { %v2086_v3 = vadd.f32 %v2085_v39, %v2018_v28  ;;  %v2977_v63 = vpop.f32.mrb[1].mxu0 }
 0x324   : > { %v2089_v43 = vand.u32 2147483647, %v2086_v3  ;;  %vm2096_vm7 = vcmp.ge.f32.partialorder %v2086_v3, 0.0 }
 0x326   : > { %v2090_v45 = vsub.f32 0.0, %v2089_v43 }
 0x328   : > { %v2091_v12 = vmul.f32 1.442695, %v2090_v45 }
 0x32a   : > { %3212 = vpow2.f32 %v2091_v12 }
 0x334   : > { %v3213_v11 = vpop.eup %3212 }
 0x335   : > { %v2093_v55 = vadd.f32 1.0, %v3213_v11 }
 0x337   : > { %3214 = vrcp.f32 %v2093_v55 }
 0x341   : > { %v3215_v60 = vpop.eup %3214 }
 0x342   : > { %v2097_v51 = vmul.f32 %v3215_v60, %v3213_v11 }
 0x344   : > { %v2098_v24 = vsel %vm2096_vm7, %v3215_v60, %v2097_v51 }
 0x345   : > { %v2099_v40 = vmul.f32 %v2098_v24, %v2086_v3 }
 0x347   : > { %2981 = vmatmul.mubr.msk.f32.vlgmr.msra.gmra.mrb[0].mxu1 %vm2102_vm14, %v2099_v40 }
 0x41a   : > { %v2176_v23 = vpop.f32.mrb[0].mxu1 }
 0x41b   : > { %v2177_v8 = vadd.f32 %v2176_v23, %v2101_v37  ;;  %v2982_v38 = vpop.f32.mrb[1].mxu1 }
 0x41d   : > { %v2180_v0 = vand.u32 2147483647, %v2177_v8  ;;  %vm2187_vm13 = vcmp.ge.f32.partialorder %v2177_v8, 0.0 }
 0x41f   : > { %v2181_v19 = vsub.f32 0.0, %v2180_v0 }
 0x421   : > { %v2182_v49 = vmul.f32 1.442695, %v2181_v19 }
 0x423   : > { %3216 = vpow2.f32 %v2182_v49 }
 0x42d   : > { %v3217_v46 = vpop.eup %3216 }
 0x42e   : > { %v2184_v22 = vadd.f32 1.0, %v3217_v46 }
 0x430   : > { %3218 = vrcp.f32 %v2184_v22 }
 0x43a   : > { %v3219_v47 = vpop.eup %3218 }
 0x43b   : > { %v2188_v21 = vmul.f32 %v3219_v47, %v3217_v46 }
 0x43d   : > { %v4911_v41 = vsel %vm2187_vm13, %v3219_v47, %v2188_v21 }
 0x43e LB: >> { %v2218_v29 = vld [vmem:[%s5022_s9] sm:$0xff]  ;;  %v2219_v32 = vld [vmem:[%s5022_s9 + $0x8] sm:$0xff]  ;;  %v2220_v35 = vld [vmem:[%s5022_s9 + $0x10] sm:$0xff]  ;;  %s4938_s30 = sshll.u32 %s3258_s14, 6  ;;  %vm5723_vm6 = vcmask 130048   ;;  %s2195_s14 = sadd.s32 1, %s3258_s14   ;;  %s3258_s14 = sphi %s4913_s14, %s2195_s14  }
 0x43f   : >> { %v5722_v59 = vld [vmem:[#allocation5_spill] sm:$0xff]  ;;  %v3055_v31 = vpack.c.bf16 %v2219_v32, %v2218_v29  ;;  %v2221_v48 = vld [vmem:[%s5022_s9 + $0x18] sm:$0xff]  ;;  %v2223_v52 = vld [vmem:[%s5022_s9 + $0x28] sm:$0xff]  ;;  %s4944_s12 = scalar_lea.vmem [#allocation3], %s4938_s30  ;;  %s2346_s21 = scalar_lea.vmem %s3360_s23, %s4938_s30 }
 0x440   : >> { %v2208_v13 = vsub.s32 0, %v5722_v59  ;;  %v3059_v34 = vpack.c.bf16 %v2221_v48, %v2220_v35  ;;  %v2222_v15 = vld [vmem:[%s5022_s9 + $0x20] sm:$0xff]  ;;  %v2224_v20 = vld [vmem:[%s5022_s9 + $0x30] sm:$0xff]  ;;  %v2225_v56 = vld [vmem:[%s5022_s9 + $0x38] sm:$0xff]  ;;  %p2192_p6 = scmp.ge.s32.totalorder %s2195_s14, 8  }
 0x441   : >> { %3056 = vmatprep.subr.bf16.mxu0 %v3055_v31  ;;  %3089 = vmatprep.subr.bf16.mxu1 %v3055_v31  ;;  %v3063_v53 = vpack.c.bf16 %v2223_v52, %v2222_v15  ;;  %v2198_v42 = vld [vmem:[%s4944_s12] sm:$0xff]  ;;  %v3067_v30 = vpack.c.bf16 %v2225_v56, %v2224_v20  ;;  %v2227_v16 = vld [vmem:[%s5022_s9 + $0x48] sm:$0xff]  ;;  %v2228_v50 = vld [vmem:[%s5022_s9 + $0x50] sm:$0xff] }
 0x442   : >> { %v4941_v26 = vrot.slane %v4911_v41, %v2208_v13  ;;  %3058 = vmatpush3.bf16.msra.mxu0 %v3055_v31  ;;  %3097 = vmatpush3.bf16.msra.mxu1 %v3055_v31  ;;  %v2202_v62 = vld [vmem:[%s4944_s12 + $0x20] sm:$0xff]  ;;  %v2229_v36 = vld [vmem:[%s5022_s9 + $0x58] sm:$0xff]  ;;  %v2231_v6 = vld [vmem:[%s5022_s9 + $0x68] sm:$0xff] }
 0x443   : >> { %3060 = vmatprep.subr.bf16.mxu0 %v3059_v34  ;;  %3090 = vmatprep.subr.bf16.mxu1 %v3059_v34  ;;  %v2226_v57 = vld [vmem:[%s5022_s9 + $0x40] sm:$0xff]  ;;  %v3075_v14 = vpack.c.bf16 %v2229_v36, %v2228_v50  ;;  %v2232_v1 = vld [vmem:[%s5022_s9 + $0x70] sm:$0xff]  ;;  %v2233_v2 = vld [vmem:[%s5022_s9 + $0x78] sm:$0xff] }
 0x444   : >> { %v2210_v44 = vmul.f32 %v4941_v26, %v2198_v42  ;;  %v2214_v27 = vmul.f32 %v4941_v26, %v2202_v62  ;;  %v3071_v25 = vpack.c.bf16 %v2227_v16, %v2226_v57  ;;  %v2230_v33 = vld [vmem:[%s5022_s9 + $0x60] sm:$0xff]  ;;  %v3083_v7 = vpack.c.bf16 %v2233_v2, %v2232_v1  ;;  %v2199_v5 = vld [vmem:[%s4944_s12 + $0x8] sm:$0xff]  ;;  %v2200_v58 = vld [vmem:[%s4944_s12 + $0x10] sm:$0xff] }
 0x445   : >> { %v3079_v54 = vpack.c.bf16 %v2231_v6, %v2230_v33  ;;  %v2203_v18 = vld [vmem:[%s4944_s12 + $0x28] sm:$0xff]  ;;  %v2204_v17 = vld [vmem:[%s4944_s12 + $0x30] sm:$0xff]  ;;  %v2211_v9 = vmul.f32 %v4941_v26, %v2199_v5  ;;  %v2212_v10 = vmul.f32 %v4941_v26, %v2200_v58  ;;  %v2201_v28 = vld [vmem:[%s4944_s12 + $0x18] sm:$0xff] }
 0x446   : >> { %3062 = vmatpush3.bf16.msra.mxu0 %v3059_v34  ;;  %3098 = vmatpush3.bf16.msra.mxu1 %v3059_v34  ;;  %v2215_v61 = vmul.f32 %v4941_v26, %v2203_v18  ;;  %v2216_v4 = vmul.f32 %v4941_v26, %v2204_v17  ;;  %v2205_v39 = vld [vmem:[%s4944_s12 + $0x38] sm:$0xff]  ;;  %v2213_v3 = vmul.f32 %v4941_v26, %v2201_v28  ;;  %v2869_v43 = vld [vmem:[%s5023_s10] ss:$0 sm:$0xff]  ;;  %v2348_v12 = vld [vmem:[%s2346_s21 + $0x8] sm:$0xff]  ;;  %s2363_s12 = scalar_lea.vmem %s3365_s26, %s4938_s30 }
 0x447   : >> { %3064 = vmatprep.subr.bf16.mxu0 %v3063_v53  ;;  %3091 = vmatprep.subr.bf16.mxu1 %v3063_v53  ;;  %v2217_v63 = vmul.f32 %v4941_v26, %v2205_v39  ;;  %v2352_v55 = vld [vmem:[%s2346_s21 + $0x28] sm:$0xff]  ;;  %v2347_v40 = vld [vmem:[%s2346_s21] sm:$0xff]  ;;  %v2350_v47 = vld [vmem:[%s2346_s21 + $0x18] sm:$0xff] }
 0x448   : >> { %3015 = vmatprep.mubr.f32.mxu0 %v2210_v44  ;;  %3021 = vmatprep.mubr.f32.mxu1 %v2214_v27  ;;  %v2351_v23 = vld [vmem:[%s2346_s21 + $0x20] sm:$0xff]  ;;  %v2354_v29 = vld [vmem:[%s2346_s21 + $0x38] sm:$0xff]  ;;  %vm5724_vm15 = vmmov %vm5723_vm6 }
 0x449   : >> { %v2349_v13 = vld [vmem:[%s2346_s21 + $0x10] sm:$0xff]  ;;  %vm5725_vm8 = vmmov %vm5723_vm6 }
 0x44a   : >> { %3066 = vmatpush3.bf16.msra.mxu0 %v3063_v53  ;;  %3099 = vmatpush3.bf16.msra.mxu1 %v3063_v53  ;;  %v2353_v48 = vld [vmem:[%s2346_s21 + $0x30] sm:$0xff]  ;;  %vm5726_vm5 = vmmov %vm5723_vm6 }
 0x44b   : >> { %3068 = vmatprep.subr.bf16.mxu0 %v3067_v30  ;;  %3092 = vmatprep.subr.bf16.mxu1 %v3067_v30  ;;  %vm5727_vm9 = vmmov %vm5726_vm5 }
 0x44c   : >> { %vm5728_vm4 = vmmov %vm5726_vm5 }
 0x44d   : >> { %vm5729_vm11 = vmmov %vm5728_vm4 }
 0x44e   : >> { %3070 = vmatpush3.bf16.msra.mxu0 %v3067_v30  ;;  %3100 = vmatpush3.bf16.msra.mxu1 %v3067_v30  ;;  %vm5730_vm0 = vmmov %vm5728_vm4 }
 0x44f   : >> { %3072 = vmatprep.subr.bf16.mxu0 %v3071_v25  ;;  %3093 = vmatprep.subr.bf16.mxu1 %v3071_v25 }
 0x452   : >> { %3074 = vmatpush3.bf16.msra.mxu0 %v3071_v25  ;;  %3101 = vmatpush3.bf16.msra.mxu1 %v3071_v25 }
 0x453   : >> { %3076 = vmatprep.subr.bf16.mxu0 %v3075_v14  ;;  %3094 = vmatprep.subr.bf16.mxu1 %v3075_v14 }
 0x456   : >> { %3078 = vmatpush3.bf16.msra.mxu0 %v3075_v14  ;;  %3102 = vmatpush3.bf16.msra.mxu1 %v3075_v14 }
 0x457   : >> { %3080 = vmatprep.subr.bf16.mxu0 %v3079_v54  ;;  %3095 = vmatprep.subr.bf16.mxu1 %v3079_v54 }
 0x45a   : >> { %3082 = vmatpush3.bf16.msra.mxu0 %v3079_v54  ;;  %3103 = vmatpush3.bf16.msra.mxu1 %v3079_v54 }
 0x45b   : >> { %3084 = vmatprep.subr.bf16.mxu0 %v3083_v7  ;;  %3096 = vmatprep.subr.bf16.mxu1 %v3083_v7 }
 0x45e   : >> { %3086 = vmatpush3.bf16.msra.mxu0 %v3083_v7  ;;  %3104 = vmatpush3.bf16.msra.mxu1 %v3083_v7 }
 0x461   : >> { %3016 = vmatmul.mubr.f32.vlgmr.msra.gmra.mrb[0].mxu0 %v2211_v9  ;;  %3022 = vmatmul.mubr.f32.vlgmr.msra.gmra.mrb[0].mxu1 %v2215_v61 }
 0x462   : >> { %3018 = vmatprep.mubr.f32.mxu0 %v2212_v10  ;;  %3024 = vmatprep.mubr.f32.mxu1 %v2216_v4 }
 0x465   : >> { %3019 = vmatmul.mubr.f32.gmra.mrb[2].mxu0 %v2213_v3  ;;  %3025 = vmatmul.mubr.f32.gmra.mrb[2].mxu1 %v2217_v63 }
 0x534   : >> { %v3017_v45 = vpop.f32.mrb[0].mxu0  ;;  %v3023_v11 = vpop.f32.mrb[0].mxu1 }
 0x535   : >> { %v2313_v60 = vadd.f32 %v3017_v45, %v2869_v43  ;;  %v2333_v51 = vadd.f32 %v3023_v11, %v2869_v43  ;;  %v2307_v24 = vpop.f32.mrb[1].mxu0  ;;  %v2327_v37 = vpop.f32.mrb[1].mxu1 }
 0x536   : >> { %v2308_v8 = vadd.f32 %v2869_v43, %v2307_v24  ;;  %v2328_v38 = vadd.f32 %v2869_v43, %v2327_v37 }
 0x537   : >> { %v2356_v0 = vadd.f32 %v2348_v12, %v2313_v60  ;;  %v2360_v19 = vadd.f32 %v2352_v55, %v2333_v51 }
 0x538   : >> { %v2355_v49 = vadd.f32 %v2347_v40, %v2308_v8  ;;  %v2359_v46 = vadd.f32 %v2351_v23, %v2328_v38  ;;  %v3020_v22 = vpop.f32.mrb[2].mxu0  ;;  %v3026_v21 = vpop.f32.mrb[2].mxu1 }
 0x539   : >> { %2366 = vst.msk [vmem:[%s2363_s12 + $0x8] sm:$0xff] %vm5723_vm6, %v2356_v0  ;;  %v2323_v32 = vadd.f32 %v3020_v22, %v2869_v43  ;;  %v2343_v35 = vadd.f32 %v3026_v21, %v2869_v43  ;;  %v2317_v59 = vpop.f32.mrb[3].mxu0  ;;  %v2337_v31 = vpop.f32.mrb[3].mxu1 }
 0x53a   : >> { %2370 = vst.msk [vmem:[%s2363_s12 + $0x28] sm:$0xff] %vm5724_vm15, %v2360_v19  ;;  %v2318_v34 = vadd.f32 %v2869_v43, %v2317_v59  ;;  %v2338_v15 = vadd.f32 %v2869_v43, %v2337_v31  ;;  %2194 = sbr.rel (!%p2192_p6) target bundleno = 1086 (0x43e), region = 196 }
 0x53b   : >> { %2365 = vst.msk [vmem:[%s2363_s12] sm:$0xff] %vm5725_vm8, %v2355_v49  ;;  %v2358_v52 = vadd.f32 %v2350_v47, %v2323_v32  ;;  %v2362_v26 = vadd.f32 %v2354_v29, %v2343_v35 }
 0x53c   : >> { %2369 = vst.msk [vmem:[%s2363_s12 + $0x20] sm:$0xff] %vm5726_vm5, %v2359_v46  ;;  %v2357_v53 = vadd.f32 %v2349_v13, %v2318_v34  ;;  %v2361_v42 = vadd.f32 %v2353_v48, %v2338_v15 }
 0x53d   : >> { %2368 = vst.msk [vmem:[%s2363_s12 + $0x18] sm:$0xff] %vm5727_vm9, %v2358_v52 }
 0x53e   : >> { %2372 = vst.msk [vmem:[%s2363_s12 + $0x38] sm:$0xff] %vm5728_vm4, %v2362_v26 }
 0x53f   : >> { %2367 = vst.msk [vmem:[%s2363_s12 + $0x10] sm:$0xff] %vm5729_vm11, %v2357_v53 }
 0x540   : >> { %2371 = vst.msk [vmem:[%s2363_s12 + $0x30] sm:$0xff] %vm5730_vm0, %v2361_v42 }
 0x541 PF: > { %s21_s17 = sadd.s32 1, %s3242_s17  }
 0x542   : > { %p18_p7 = scmp.ge.s32.totalorder %s21_s17, 4  }
 0x544   :  { %20 = sbr.rel (!%p18_p7) target bundleno = 1 (0x1), region = 207 }

</bundles_post_ra>
